<compile_context>
chip_gen: v7x
topology: tpu7x:2x2x1
jax: 0.10.0
libtpu: 0.0.40
codegen_flags: <defaults>
</compile_context>

<pallas_src>
import functools
import math

import jax
import jax.numpy as jnp
from jax.experimental import pallas as pl
from jax.experimental.pallas import tpu as pltpu


# ----------------------------------------------------------------------------
# Fused MGUIT forward kernel (per row-tile of M = B*H*W pixels)
# ----------------------------------------------------------------------------
def _mguit_fused_kernel(x_ref, rw_ref, wenc_ref, benc_ref, kt_ref, vcat_ref,
                        wgen_ref, bgen_ref,
                        gen_ref, mem_ref, loss_ref,
                        *, C, kdim, vdim, msize):
    f32, bf16 = jnp.float32, jnp.bfloat16
    EW = 2 * (kdim + vdim)

    x = x_ref[...]                                        # (tm, 2C+2) bf16: [xA|xB|mA|mB]
    mA = x[:, 2 * C:2 * C + 1].astype(f32)                # (tm, 1)
    mB = x[:, 2 * C + 1:2 * C + 2].astype(f32)

    # ---- fused content+attr encoders, both domains, one matmul ----
    enc = jnp.dot(x, wenc_ref[...], preferred_element_type=f32) + benc_ref[...]
    enc = jnp.where(enc >= 0.0, enc, 0.2 * enc)           # LeakyReLU(0.2)
    enc_a = enc[:, 0:kdim + vdim]                         # [cont_a | sty_a]
    enc_b = enc[:, kdim + vdim:EW]                        # [cont_b | sty_b]
    cont_a, sty_a = enc_a[:, 0:kdim], enc_a[:, kdim:kdim + vdim]
    cont_b, sty_b = enc_b[:, 0:kdim], enc_b[:, kdim:kdim + vdim]

    # ---- memory attention (keys pre-transposed, 1/sqrt(kdim) pre-folded) ----
    kt = kt_ref[...]                                      # (kdim, msize) bf16

    def attend(cont):
        s = jnp.dot(cont.astype(bf16), kt, preferred_element_type=f32)   # (tm, msize)
        m = jnp.max(s, axis=-1, keepdims=True)
        e = jnp.exp(s - m)
        return e * pl.reciprocal(jnp.sum(e, axis=-1, keepdims=True), approx=True)

    wA = attend(cont_a)                                   # (tm, msize) f32
    wB = attend(cont_b)

    # ---- memory reads: one matmul per domain against [Va | Vb | K] ----
    vcat = vcat_ref[...]                                  # (msize, 2*vdim+kdim) bf16
    read_a = jnp.dot(wA.astype(bf16), vcat, preferred_element_type=f32)
    read_b = jnp.dot(wB.astype(bf16), vcat, preferred_element_type=f32)
    # TODO(synk): original Memory partitions items per semantic class using masks;
    # here masks only gate the retrieved style features (all-ones masks = identity).
    sty_pair_a = read_a[:, 0:2 * vdim] * mA               # masked [sty_aa | sty_ab]
    sty_pair_b = read_b[:, 0:2 * vdim] * mB               # masked [sty_ba | sty_bb]
    rk_a = read_a[:, 2 * vdim:2 * vdim + kdim]
    rk_b = read_b[:, 2 * vdim:2 * vdim + kdim]

    # ---- random memory reads (detached addressing weights from the wrapper) ----
    rw = rw_ref[...]                                      # (tm, 2*msize) bf16
    vab = vcat[:, 0:2 * vdim]
    rand_a = jnp.dot(rw[:, 0:msize], vab, preferred_element_type=f32)          # [rand_aa|rand_ab]
    rand_b = jnp.dot(rw[:, msize:2 * msize], vab, preferred_element_type=f32)  # [rand_ba|rand_bb]

    # ---- generator: accumulate all 8 outputs into one lane-dense (tm, 8*16) slab ----
    r0 = EW
    r1 = r0 + 2 * vdim
    r2 = r1 + 2 * vdim
    r3 = r2 + 2 * vdim
    r4 = r3 + 2 * vdim
    acc = jnp.dot(enc.astype(bf16), wgen_ref[0:r0, :], preferred_element_type=f32)
    acc = acc + jnp.dot(sty_pair_a.astype(bf16), wgen_ref[r0:r1, :], preferred_element_type=f32)
    acc = acc + jnp.dot(sty_pair_b.astype(bf16), wgen_ref[r1:r2, :], preferred_element_type=f32)
    acc = acc + jnp.dot(rand_a.astype(bf16), wgen_ref[r2:r3, :], preferred_element_type=f32)
    acc = acc + jnp.dot(rand_b.astype(bf16), wgen_ref[r3:r4, :], preferred_element_type=f32)
    gen_ref[...] = jnp.tanh(acc + bgen_ref[...])

    # ---- per-tile memory-update partials: w.T @ [cont | sty]  (reduced over tiles in JAX) ----
    upd_a = jnp.dot(wA.T, enc_a, preferred_element_type=f32)   # (msize, kdim+vdim)
    upd_b = jnp.dot(wB.T, enc_b, preferred_element_type=f32)
    mem_ref[0, 0:msize, :] = upd_a
    mem_ref[0, msize:2 * msize, :] = upd_b

    # ---- per-tile key/value reconstruction-loss partial column sums ----
    loss_ref[0, :, 0:kdim] = jnp.sum((cont_a - rk_a) ** 2, axis=0, keepdims=True)
    loss_ref[0, :, kdim:2 * kdim] = jnp.sum((cont_b - rk_b) ** 2, axis=0, keepdims=True)
    loss_ref[0, :, 2 * kdim:2 * kdim + vdim] = jnp.sum(
        (sty_a - sty_pair_a[:, 0:vdim]) ** 2, axis=0, keepdims=True)
    loss_ref[0, :, 2 * kdim + vdim:EW] = jnp.sum(
        (sty_b - sty_pair_b[:, vdim:2 * vdim]) ** 2, axis=0, keepdims=True)


def _pick_tm(M, cap=1024):
    # Biggest tile that fits, but keep >=2 grid steps so the "parallel" axis can be
    # split across v7x's two TensorCores; cap keeps double-buffered tiles well inside
    # v7x's smaller (64 MiB physical / 32 MiB scoped) VMEM.
    for tm in (1024, 512, 256, 128, 64, 32, 16, 8):
        if tm <= cap and M % tm == 0 and M // tm >= 2:
            return tm
    return M


# ----------------------------------------------------------------------------
# Host-side weight / memory-bank packing (tiny, done once per forward under jit)
# ----------------------------------------------------------------------------
def _pack_weights(params, memory_bank, C, kdim, vdim, msize, gslot):
    bf16 = jnp.bfloat16
    EW = 2 * (kdim + vdim)
    GW = 8 * gslot
    GK = EW + 8 * vdim

    # combined content+attr encoder for both domains (mask rows stay zero)
    Wenc = jnp.zeros((2 * C + 2, EW), jnp.float32)
    Wenc = Wenc.at[0:C, 0:kdim].set(params["enc_c_w"])
    Wenc = Wenc.at[0:C, kdim:kdim + vdim].set(params["enc_a_w"])
    Wenc = Wenc.at[C:2 * C, kdim + vdim:2 * kdim + vdim].set(params["enc_c_w"])
    Wenc = Wenc.at[C:2 * C, 2 * kdim + vdim:EW].set(params["enc_a_w"])
    benc = jnp.concatenate([params["enc_c_b"], params["enc_a_b"],
                            params["enc_c_b"], params["enc_a_b"]], axis=1)

    # memory bank: keys pre-transposed & pre-scaled; values+keys concatenated for reads
    K = memory_bank["key"]
    Va = memory_bank["value_a"]
    Vb = memory_bank["value_b"]
    KT = (K * (1.0 / math.sqrt(kdim))).T                  # (kdim, msize)
    Vcat = jnp.concatenate([Va, Vb, K], axis=1)           # (msize, 2*vdim + kdim)

    # generator block-matrix mapping the 5 accumulation pieces onto 8 padded output slots
    # slots: 0 fake_BA, 1 fake_AA, 2 rand_BA, 3 rand_AA, 4 fake_AB, 5 fake_BB, 6 rand_AB, 7 rand_BB
    Wg_a, Wg_b = params["gen_a_w"], params["gen_b_w"]
    Wa_c, Wa_s = Wg_a[0:kdim], Wg_a[kdim:kdim + vdim]
    Wb_c, Wb_s = Wg_b[0:kdim], Wg_b[kdim:kdim + vdim]

    def col(s):
        return slice(s * gslot, s * gslot + C)

    Wgen = jnp.zeros((GK, GW), jnp.float32)
    # piece 1: enc = [cont_a | sty_a | cont_b | sty_b]   (sty_* rows stay zero)
    ca = slice(0, kdim)
    cb = slice(kdim + vdim, 2 * kdim + vdim)
    for s, rows, wmat in ((1, ca, Wa_c), (3, ca, Wa_c), (4, ca, Wb_c), (6, ca, Wb_c),
                          (0, cb, Wa_c), (2, cb, Wa_c), (5, cb, Wb_c), (7, cb, Wb_c)):
        Wgen = Wgen.at[rows, col(s)].set(wmat)
    # piece 2: masked [sty_aa | sty_ab]
    r = EW
    Wgen = Wgen.at[r:r + vdim, col(1)].set(Wa_s)
    Wgen = Wgen.at[r + vdim:r + 2 * vdim, col(4)].set(Wb_s)
    # piece 3: masked [sty_ba | sty_bb]
    r += 2 * vdim
    Wgen = Wgen.at[r:r + vdim, col(0)].set(Wa_s)
    Wgen = Wgen.at[r + vdim:r + 2 * vdim, col(5)].set(Wb_s)
    # piece 4: [rand_aa | rand_ab] (detached)
    r += 2 * vdim
    Wgen = Wgen.at[r:r + vdim, col(3)].set(Wa_s)
    Wgen = Wgen.at[r + vdim:r + 2 * vdim, col(6)].set(Wb_s)
    # piece 5: [rand_ba | rand_bb] (detached)
    r += 2 * vdim
    Wgen = Wgen.at[r:r + vdim, col(2)].set(Wa_s)
    Wgen = Wgen.at[r + vdim:r + 2 * vdim, col(7)].set(Wb_s)

    bgen = jnp.zeros((1, GW), jnp.float32)
    for s in range(8):
        b = params["gen_a_b"] if s < 4 else params["gen_b_b"]
        bgen = bgen.at[:, col(s)].set(b)

    return {
        "Wenc": Wenc.astype(bf16), "benc": benc,
        "KT": KT.astype(bf16), "Vcat": Vcat.astype(bf16),
        "Wgen": Wgen.astype(bf16), "bgen": bgen,
    }


# ----------------------------------------------------------------------------
# Parameter / memory-bank initialization (deterministic, in-script)
# ----------------------------------------------------------------------------
def _l2norm(x, axis=-1, eps=1e-8):
    return x / (jnp.sqrt(jnp.sum(x * x, axis=axis, keepdims=True)) + eps)


def init_params(key, input_dim=3, kdim=32, vdim=32, msize=8):
    ks = jax.random.split(key, 8)

    def w(k, shape, scale=0.05):
        return scale * jax.random.normal(k, shape, jnp.float32)

    params = {
        "enc_c_w": w(ks[0], (input_dim, kdim)),
        "enc_c_b": jnp.zeros((1, kdim), jnp.float32),
        "enc_a_w": w(ks[1], (input_dim, vdim)),
        "enc_a_b": jnp.zeros((1, vdim), jnp.float32),
        "gen_a_w": w(ks[2], (kdim + vdim, input_dim)),
        "gen_a_b": jnp.zeros((1, input_dim), jnp.float32),
        "gen_b_w": w(ks[3], (kdim + vdim, input_dim)),
        "gen_b_b": jnp.zeros((1, input_dim), jnp.float32),
    }
    memory_bank = {
        "key":     _l2norm(jax.random.normal(ks[4], (msize, kdim), jnp.float32)),
        "value_a": _l2norm(jax.random.normal(ks[5], (msize, vdim), jnp.float32)),
        "value_b": _l2norm(jax.random.normal(ks[6], (msize, vdim), jnp.float32)),
    }
    return params, memory_bank


# ----------------------------------------------------------------------------
# MGUIT.forward()
# ----------------------------------------------------------------------------
def mguit_forward(params, input_A, input_B, masks_A, masks_B, memory_bank, rng):
    B, C, H, W = input_A.shape
    M = B * H * W
    kdim = params["enc_c_w"].shape[1]
    vdim = params["enc_a_w"].shape[1]
    msize = memory_bank["key"].shape[0]
    EW = 2 * (kdim + vdim)
    gslot = ((C + 15) // 16) * 16        # pad each generated image to 16 channels
    GW = 8 * gslot                       # lane-dense generator slab width (128 for C=3)
    GK = EW + 8 * vdim
    tm = _pick_tm(M)
    assert M % tm == 0
    num_tiles = M // tm

    def flat(x, c):                      # NCHW -> NHWC -> (M, c)
        return jnp.transpose(x, (0, 2, 3, 1)).reshape(M, c)

    # one lane-packed input slab: [xA | xB | mA | mB]
    X = jnp.concatenate(
        [flat(input_A, C), flat(input_B, C), flat(masks_A, 1), flat(masks_B, 1)],
        axis=1).astype(jnp.bfloat16)

    # random memory addressing (detached in the torch graph)
    # TODO(synk): the original Memory module draws detached random addressing;
    # softmax(uniform) is used as its analogue here.
    r1, r2 = jax.random.split(rng)
    rwA = jax.nn.softmax(jax.random.uniform(r1, (M, msize), jnp.float32), axis=-1)
    rwB = jax.nn.softmax(jax.random.uniform(r2, (M, msize), jnp.float32), axis=-1)
    RW = jax.lax.stop_gradient(jnp.concatenate([rwA, rwB], axis=1)).astype(jnp.bfloat16)

    packed = _pack_weights(params, memory_bank, C, kdim, vdim, msize, gslot)

    kern = functools.partial(_mguit_fused_kernel, C=C, kdim=kdim, vdim=vdim, msize=msize)
    gen_out, mem_out, loss_out = pl.pallas_call(
        kern,
        out_shape=(
            jax.ShapeDtypeStruct((M, GW), jnp.float32),
            jax.ShapeDtypeStruct((num_tiles, 2 * msize, kdim + vdim), jnp.float32),
            jax.ShapeDtypeStruct((num_tiles, 1, EW), jnp.float32),
        ),
        grid=(num_tiles,),
        in_specs=[
            pl.BlockSpec((tm, 2 * C + 2), lambda i: (i, 0)),          # packed pixels+masks
            pl.BlockSpec((tm, 2 * msize), lambda i: (i, 0)),          # random read weights
            pl.BlockSpec((2 * C + 2, EW), lambda i: (0, 0)),          # fused encoder weights
            pl.BlockSpec((1, EW), lambda i: (0, 0)),                  # fused encoder bias
            pl.BlockSpec((kdim, msize), lambda i: (0, 0)),            # keys^T * 1/sqrt(kdim)
            pl.BlockSpec((msize, 2 * vdim + kdim), lambda i: (0, 0)), # [Va | Vb | K]
            pl.BlockSpec((GK, GW), lambda i: (0, 0)),                 # fused generator weights
            pl.BlockSpec((1, GW), lambda i: (0, 0)),                  # fused generator bias
        ],
        out_specs=[
            pl.BlockSpec((tm, GW), lambda i: (i, 0)),
            pl.BlockSpec((1, 2 * msize, kdim + vdim), lambda i: (i, 0, 0)),
            pl.BlockSpec((1, 1, EW), lambda i: (i, 0, 0)),
        ],
        compiler_params=pltpu.CompilerParams(dimension_semantics=("parallel",)),
    )(X, RW, packed["Wenc"], packed["benc"], packed["KT"], packed["Vcat"],
      packed["Wgen"], packed["bgen"])

    # ---- memory losses (per-tile partial column sums -> scalars) ----
    lk = loss_out[:, 0, :]
    key_loss = (lk[:, 0:kdim].sum() + lk[:, kdim:2 * kdim].sum()) / (M * kdim)
    value_loss = (lk[:, 2 * kdim:2 * kdim + vdim].sum()
                  + lk[:, 2 * kdim + vdim:EW].sum()) / (M * vdim)

    # ---- memory update (attention-weighted sums accumulated in-kernel) ----
    upd = mem_out.sum(axis=0)                        # (2*msize, kdim+vdim)
    upd_a, upd_b = upd[0:msize], upd[msize:2 * msize]
    K, Va, Vb = memory_bank["key"], memory_bank["value_a"], memory_bank["value_b"]
    updated_memory = {
        "key":     _l2norm(K + upd_a[:, 0:kdim] + upd_b[:, 0:kdim]),
        "value_a": _l2norm(Va + upd_a[:, kdim:kdim + vdim]),
        "value_b": _l2norm(Vb + upd_b[:, kdim:kdim + vdim]),
    }

    # ---- unpack the 8 generated images (exact split order of MGUIT.forward) ----
    def img(slot):
        y = gen_out[:, slot * gslot: slot * gslot + C]
        return jnp.transpose(y.reshape(B, H, W, C), (0, 3, 1, 2))

    names = ("fake_BA", "fake_AA", "rand_BA", "rand_AA",
             "fake_AB", "fake_BB", "rand_AB", "rand_BB")
    outputs = {n: img(s) for s, n in enumerate(names)}
    return updated_memory, key_loss, value_loss, outputs


# ----------------------------------------------------------------------------
if __name__ == "__main__":
    B, C, H, W = 2, 3, 16, 16
    KDIM, VDIM, MSIZE = 32, 32, 8

    root = jax.random.PRNGKey(0)
    k_param, k_a, k_b, k_rng = jax.random.split(root, 4)

    params, memory_bank = init_params(k_param, input_dim=C, kdim=KDIM, vdim=VDIM, msize=MSIZE)

    input_A = jax.random.normal(k_a, (B, C, H, W), jnp.float32)
    input_B = jax.random.normal(k_b, (B, C, H, W), jnp.float32)
    masks_A = jnp.ones((B, 1, H, W), jnp.float32)
    masks_B = jnp.ones((B, 1, H, W), jnp.float32)

    fwd = jax.jit(mguit_forward)
    updated_memory, key_loss, value_loss, outs = fwd(
        params, input_A, input_B, masks_A, masks_B, memory_bank, k_rng)
    jax.block_until_ready((updated_memory, key_loss, value_loss, outs))

    assert updated_memory["key"].shape == (MSIZE, KDIM)
    assert updated_memory["value_a"].shape == (MSIZE, VDIM)
    assert outs["fake_BA"].shape == (B, C, H, W)
    assert outs["rand_BB"].shape == (B, C, H, W)
    assert bool(jnp.isfinite(key_loss)) and bool(jnp.isfinite(value_loss))
    assert all(bool(jnp.all(jnp.isfinite(v))) for v in outs.values())
    print("KERNEL_OK")
</pallas_src>

<mosaic_0001>
module attributes {stable_mosaic.version = 11 : i64} {
  func.func @_mguit_fused_kernel(%arg0: i32, %arg1: memref<256x8xbf16, #tpu.memory_space<vmem>>, %arg2: memref<256x16xbf16, #tpu.memory_space<vmem>>, %arg3: memref<8x128xbf16, #tpu.memory_space<vmem>>, %arg4: memref<1x128xf32, #tpu.memory_space<vmem>>, %arg5: memref<32x8xbf16, #tpu.memory_space<vmem>>, %arg6: memref<8x96xbf16, #tpu.memory_space<vmem>>, %arg7: memref<384x128xbf16, #tpu.memory_space<vmem>>, %arg8: memref<1x128xf32, #tpu.memory_space<vmem>>, %arg9: memref<256x128xf32, #tpu.memory_space<vmem>>, %arg10: memref<1x16x64xf32, #tpu.memory_space<vmem>>, %arg11: memref<1x1x128xf32, #tpu.memory_space<vmem>>) attributes {dimension_semantics = [#tpu.dimension_semantics<parallel>], iteration_bounds = array<i64: 2>, scalar_prefetch = 0 : i64, scratch_operands = 0 : i64, tpu.core_type = #tpu.core_type<tc>, window_params = [{transform_indices = @transform_0, window_bounds = array<i64: 256, 8>}, {transform_indices = @transform_1, window_bounds = array<i64: 256, 16>}, {pipeline_mode = #tpu.pipeline_mode<synchronous>, transform_indices = @transform_2, window_bounds = array<i64: 8, 128>}, {pipeline_mode = #tpu.pipeline_mode<synchronous>, transform_indices = @transform_3, window_bounds = array<i64: 1, 128>}, {pipeline_mode = #tpu.pipeline_mode<synchronous>, transform_indices = @transform_4, window_bounds = array<i64: 32, 8>}, {pipeline_mode = #tpu.pipeline_mode<synchronous>, transform_indices = @transform_5, window_bounds = array<i64: 8, 96>}, {pipeline_mode = #tpu.pipeline_mode<synchronous>, transform_indices = @transform_6, window_bounds = array<i64: 384, 128>}, {pipeline_mode = #tpu.pipeline_mode<synchronous>, transform_indices = @transform_7, window_bounds = array<i64: 1, 128>}, {transform_indices = @transform_8, window_bounds = array<i64: 256, 128>}, {transform_indices = @transform_9, window_bounds = array<i64: 1, 16, 64>}, {transform_indices = @transform_10, window_bounds = array<i64: 1, 1, 128>}]} {
    %c0 = arith.constant 0 : index
    %c0_0 = arith.constant 0 : index
    %0 = vector.load %arg1[%c0, %c0_0] : memref<256x8xbf16, #tpu.memory_space<vmem>>, vector<256x8xbf16>
    %1 = vector.extract_strided_slice %0 {offsets = [0, 6], sizes = [256, 1], strides = [1, 1]} : vector<256x8xbf16> to vector<256x1xbf16>
    %2 = arith.extf %1 : vector<256x1xbf16> to vector<256x1xf32>
    %3 = vector.extract_strided_slice %0 {offsets = [0, 7], sizes = [256, 1], strides = [1, 1]} : vector<256x8xbf16> to vector<256x1xbf16>
    %4 = arith.extf %3 : vector<256x1xbf16> to vector<256x1xf32>
    %c0_1 = arith.constant 0 : index
    %c0_2 = arith.constant 0 : index
    %5 = vector.load %arg3[%c0_1, %c0_2] : memref<8x128xbf16, #tpu.memory_space<vmem>>, vector<8x128xbf16>
    %cst = arith.constant dense<0.000000e+00> : vector<256x128xf32>
    %6 = tpu.matmul %0, %5, %cst {dimension_numbers = #tpu.dot_dimension_numbers<[1], [0], [0], [1], [0, 0, 1, 1], [], []>} : vector<256x8xbf16>, vector<8x128xbf16>, vector<256x128xf32> -> vector<256x128xf32>
    %c0_3 = arith.constant 0 : index
    %c0_4 = arith.constant 0 : index
    %7 = vector.load %arg4[%c0_3, %c0_4] : memref<1x128xf32, #tpu.memory_space<vmem>>, vector<1x128xf32>
    %8 = vector.broadcast %7 : vector<1x128xf32> to vector<256x128xf32>
    %9 = arith.addf %6, %8 : vector<256x128xf32>
    %cst_5 = arith.constant 0.000000e+00 : f32
    %10 = vector.broadcast %cst_5 : f32 to vector<256x128xf32>
    %11 = arith.cmpf oge, %9, %10 : vector<256x128xf32>
    %cst_6 = arith.constant 2.000000e-01 : f32
    %12 = vector.broadcast %cst_6 : f32 to vector<256x128xf32>
    %13 = arith.mulf %12, %9 : vector<256x128xf32>
    %14 = arith.select %11, %9, %13 : vector<256x128xi1>, vector<256x128xf32>
    %15 = vector.extract_strided_slice %14 {offsets = [0, 0], sizes = [256, 64], strides = [1, 1]} : vector<256x128xf32> to vector<256x64xf32>
    %16 = vector.extract_strided_slice %14 {offsets = [0, 64], sizes = [256, 64], strides = [1, 1]} : vector<256x128xf32> to vector<256x64xf32>
    %17 = vector.extract_strided_slice %15 {offsets = [0, 0], sizes = [256, 32], strides = [1, 1]} : vector<256x64xf32> to vector<256x32xf32>
    %18 = vector.extract_strided_slice %15 {offsets = [0, 32], sizes = [256, 32], strides = [1, 1]} : vector<256x64xf32> to vector<256x32xf32>
    %19 = vector.extract_strided_slice %16 {offsets = [0, 0], sizes = [256, 32], strides = [1, 1]} : vector<256x64xf32> to vector<256x32xf32>
    %20 = vector.extract_strided_slice %16 {offsets = [0, 32], sizes = [256, 32], strides = [1, 1]} : vector<256x64xf32> to vector<256x32xf32>
    %c0_7 = arith.constant 0 : index
    %c0_8 = arith.constant 0 : index
    %21 = vector.load %arg5[%c0_7, %c0_8] : memref<32x8xbf16, #tpu.memory_space<vmem>>, vector<32x8xbf16>
    %22 = arith.truncf %17 : vector<256x32xf32> to vector<256x32xbf16>
    %cst_9 = arith.constant dense<0.000000e+00> : vector<256x8xf32>
    %23 = tpu.matmul %22, %21, %cst_9 {dimension_numbers = #tpu.dot_dimension_numbers<[1], [0], [0], [1], [0, 0, 1, 1], [], []>} : vector<256x32xbf16>, vector<32x8xbf16>, vector<256x8xf32> -> vector<256x8xf32>
    %cst_10 = arith.constant dense<0xFF800000> : vector<256xf32>
    %24 = vector.multi_reduction <maximumf>, %23, %cst_10 [1] : vector<256x8xf32> to vector<256xf32>
    %25 = vector.shape_cast %24 : vector<256xf32> to vector<256x1xf32>
    %26 = vector.broadcast %25 : vector<256x1xf32> to vector<256x8xf32>
    %27 = arith.subf %23, %26 : vector<256x8xf32>
    %28 = math.exp %27 : vector<256x8xf32>
    %cst_11 = arith.constant dense<0.000000e+00> : vector<256xf32>
    %29 = vector.multi_reduction <add>, %28, %cst_11 [1] : vector<256x8xf32> to vector<256xf32>
    %30 = vector.shape_cast %29 : vector<256xf32> to vector<256x1xf32>
    %31 = tpu.reciprocal %30 {approx = true} : vector<256x1xf32> -> vector<256x1xf32>
    %32 = vector.broadcast %31 : vector<256x1xf32> to vector<256x8xf32>
    %33 = arith.mulf %28, %32 : vector<256x8xf32>
    %34 = arith.truncf %19 : vector<256x32xf32> to vector<256x32xbf16>
    %cst_12 = arith.constant dense<0.000000e+00> : vector<256x8xf32>
    %35 = tpu.matmul %34, %21, %cst_12 {dimension_numbers = #tpu.dot_dimension_numbers<[1], [0], [0], [1], [0, 0, 1, 1], [], []>} : vector<256x32xbf16>, vector<32x8xbf16>, vector<256x8xf32> -> vector<256x8xf32>
    %cst_13 = arith.constant dense<0xFF800000> : vector<256xf32>
    %36 = vector.multi_reduction <maximumf>, %35, %cst_13 [1] : vector<256x8xf32> to vector<256xf32>
    %37 = vector.shape_cast %36 : vector<256xf32> to vector<256x1xf32>
    %38 = vector.broadcast %37 : vector<256x1xf32> to vector<256x8xf32>
    %39 = arith.subf %35, %38 : vector<256x8xf32>
    %40 = math.exp %39 : vector<256x8xf32>
    %cst_14 = arith.constant dense<0.000000e+00> : vector<256xf32>
    %41 = vector.multi_reduction <add>, %40, %cst_14 [1] : vector<256x8xf32> to vector<256xf32>
    %42 = vector.shape_cast %41 : vector<256xf32> to vector<256x1xf32>
    %43 = tpu.reciprocal %42 {approx = true} : vector<256x1xf32> -> vector<256x1xf32>
    %44 = vector.broadcast %43 : vector<256x1xf32> to vector<256x8xf32>
    %45 = arith.mulf %40, %44 : vector<256x8xf32>
    %c0_15 = arith.constant 0 : index
    %c0_16 = arith.constant 0 : index
    %46 = vector.load %arg6[%c0_15, %c0_16] : memref<8x96xbf16, #tpu.memory_space<vmem>>, vector<8x96xbf16>
    %47 = arith.truncf %33 : vector<256x8xf32> to vector<256x8xbf16>
    %cst_17 = arith.constant dense<0.000000e+00> : vector<256x96xf32>
    %48 = tpu.matmul %47, %46, %cst_17 {dimension_numbers = #tpu.dot_dimension_numbers<[1], [0], [0], [1], [0, 0, 1, 1], [], []>} : vector<256x8xbf16>, vector<8x96xbf16>, vector<256x96xf32> -> vector<256x96xf32>
    %49 = arith.truncf %45 : vector<256x8xf32> to vector<256x8xbf16>
    %cst_18 = arith.constant dense<0.000000e+00> : vector<256x96xf32>
    %50 = tpu.matmul %49, %46, %cst_18 {dimension_numbers = #tpu.dot_dimension_numbers<[1], [0], [0], [1], [0, 0, 1, 1], [], []>} : vector<256x8xbf16>, vector<8x96xbf16>, vector<256x96xf32> -> vector<256x96xf32>
    %51 = vector.extract_strided_slice %48 {offsets = [0, 0], sizes = [256, 64], strides = [1, 1]} : vector<256x96xf32> to vector<256x64xf32>
    %52 = vector.broadcast %2 : vector<256x1xf32> to vector<256x64xf32>
    %53 = arith.mulf %51, %52 : vector<256x64xf32>
    %54 = vector.extract_strided_slice %50 {offsets = [0, 0], sizes = [256, 64], strides = [1, 1]} : vector<256x96xf32> to vector<256x64xf32>
    %55 = vector.broadcast %4 : vector<256x1xf32> to vector<256x64xf32>
    %56 = arith.mulf %54, %55 : vector<256x64xf32>
    %57 = vector.extract_strided_slice %48 {offsets = [0, 64], sizes = [256, 32], strides = [1, 1]} : vector<256x96xf32> to vector<256x32xf32>
    %58 = vector.extract_strided_slice %50 {offsets = [0, 64], sizes = [256, 32], strides = [1, 1]} : vector<256x96xf32> to vector<256x32xf32>
    %c0_19 = arith.constant 0 : index
    %c0_20 = arith.constant 0 : index
    %59 = vector.load %arg2[%c0_19, %c0_20] : memref<256x16xbf16, #tpu.memory_space<vmem>>, vector<256x16xbf16>
    %60 = vector.extract_strided_slice %46 {offsets = [0, 0], sizes = [8, 64], strides = [1, 1]} : vector<8x96xbf16> to vector<8x64xbf16>
    %61 = vector.extract_strided_slice %59 {offsets = [0, 0], sizes = [256, 8], strides = [1, 1]} : vector<256x16xbf16> to vector<256x8xbf16>
    %cst_21 = arith.constant dense<0.000000e+00> : vector<256x64xf32>
    %62 = tpu.matmul %61, %60, %cst_21 {dimension_numbers = #tpu.dot_dimension_numbers<[1], [0], [0], [1], [0, 0, 1, 1], [], []>} : vector<256x8xbf16>, vector<8x64xbf16>, vector<256x64xf32> -> vector<256x64xf32>
    %63 = vector.extract_strided_slice %59 {offsets = [0, 8], sizes = [256, 8], strides = [1, 1]} : vector<256x16xbf16> to vector<256x8xbf16>
    %cst_22 = arith.constant dense<0.000000e+00> : vector<256x64xf32>
    %64 = tpu.matmul %63, %60, %cst_22 {dimension_numbers = #tpu.dot_dimension_numbers<[1], [0], [0], [1], [0, 0, 1, 1], [], []>} : vector<256x8xbf16>, vector<8x64xbf16>, vector<256x64xf32> -> vector<256x64xf32>
    %65 = arith.truncf %14 : vector<256x128xf32> to vector<256x128xbf16>
    %c0_23 = arith.constant 0 : index
    %c0_24 = arith.constant 0 : index
    %66 = vector.load %arg7[%c0_23, %c0_24] : memref<384x128xbf16, #tpu.memory_space<vmem>>, vector<128x128xbf16>
    %cst_25 = arith.constant dense<0.000000e+00> : vector<256x128xf32>
    %67 = tpu.matmul %65, %66, %cst_25 {dimension_numbers = #tpu.dot_dimension_numbers<[1], [0], [0], [1], [0, 0, 1, 1], [], []>} : vector<256x128xbf16>, vector<128x128xbf16>, vector<256x128xf32> -> vector<256x128xf32>
    %68 = arith.truncf %53 : vector<256x64xf32> to vector<256x64xbf16>
    %c128 = arith.constant 128 : index
    %c0_26 = arith.constant 0 : index
    %69 = vector.load %arg7[%c128, %c0_26] : memref<384x128xbf16, #tpu.memory_space<vmem>>, vector<64x128xbf16>
    %cst_27 = arith.constant dense<0.000000e+00> : vector<256x128xf32>
    %70 = tpu.matmul %68, %69, %cst_27 {dimension_numbers = #tpu.dot_dimension_numbers<[1], [0], [0], [1], [0, 0, 1, 1], [], []>} : vector<256x64xbf16>, vector<64x128xbf16>, vector<256x128xf32> -> vector<256x128xf32>
    %71 = arith.addf %67, %70 : vector<256x128xf32>
    %72 = arith.truncf %56 : vector<256x64xf32> to vector<256x64xbf16>
    %c192 = arith.constant 192 : index
    %c0_28 = arith.constant 0 : index
    %73 = vector.load %arg7[%c192, %c0_28] : memref<384x128xbf16, #tpu.memory_space<vmem>>, vector<64x128xbf16>
    %cst_29 = arith.constant dense<0.000000e+00> : vector<256x128xf32>
    %74 = tpu.matmul %72, %73, %cst_29 {dimension_numbers = #tpu.dot_dimension_numbers<[1], [0], [0], [1], [0, 0, 1, 1], [], []>} : vector<256x64xbf16>, vector<64x128xbf16>, vector<256x128xf32> -> vector<256x128xf32>
    %75 = arith.addf %71, %74 : vector<256x128xf32>
    %76 = arith.truncf %62 : vector<256x64xf32> to vector<256x64xbf16>
    %c256 = arith.constant 256 : index
    %c0_30 = arith.constant 0 : index
    %77 = vector.load %arg7[%c256, %c0_30] : memref<384x128xbf16, #tpu.memory_space<vmem>>, vector<64x128xbf16>
    %cst_31 = arith.constant dense<0.000000e+00> : vector<256x128xf32>
    %78 = tpu.matmul %76, %77, %cst_31 {dimension_numbers = #tpu.dot_dimension_numbers<[1], [0], [0], [1], [0, 0, 1, 1], [], []>} : vector<256x64xbf16>, vector<64x128xbf16>, vector<256x128xf32> -> vector<256x128xf32>
    %79 = arith.addf %75, %78 : vector<256x128xf32>
    %80 = arith.truncf %64 : vector<256x64xf32> to vector<256x64xbf16>
    %c320 = arith.constant 320 : index
    %c0_32 = arith.constant 0 : index
    %81 = vector.load %arg7[%c320, %c0_32] : memref<384x128xbf16, #tpu.memory_space<vmem>>, vector<64x128xbf16>
    %cst_33 = arith.constant dense<0.000000e+00> : vector<256x128xf32>
    %82 = tpu.matmul %80, %81, %cst_33 {dimension_numbers = #tpu.dot_dimension_numbers<[1], [0], [0], [1], [0, 0, 1, 1], [], []>} : vector<256x64xbf16>, vector<64x128xbf16>, vector<256x128xf32> -> vector<256x128xf32>
    %83 = arith.addf %79, %82 : vector<256x128xf32>
    %c0_34 = arith.constant 0 : index
    %c0_35 = arith.constant 0 : index
    %84 = vector.load %arg8[%c0_34, %c0_35] : memref<1x128xf32, #tpu.memory_space<vmem>>, vector<1x128xf32>
    %85 = vector.broadcast %84 : vector<1x128xf32> to vector<256x128xf32>
    %86 = arith.addf %83, %85 : vector<256x128xf32>
    %87 = math.tanh %86 : vector<256x128xf32>
    %c0_36 = arith.constant 0 : index
    %c0_37 = arith.constant 0 : index
    %88 = vector.load %arg9[%c0_36, %c0_37] : memref<256x128xf32, #tpu.memory_space<vmem>>, vector<256x128xf32>
    tpu.vector_store %arg9[%c0_36, %c0_37], %87 {strides = array<i32>} : memref<256x128xf32, #tpu.memory_space<vmem>>, vector<256x128xf32>,
    %89 = tpu.transpose %33, [1, 0] : vector<256x8xf32> -> vector<8x256xf32>
    %cst_38 = arith.constant dense<0.000000e+00> : vector<8x64xf32>
    %90 = tpu.matmul %89, %15, %cst_38 {dimension_numbers = #tpu.dot_dimension_numbers<[1], [0], [0], [1], [0, 0, 1, 1], [], []>} : vector<8x256xf32>, vector<256x64xf32>, vector<8x64xf32> -> vector<8x64xf32>
    %91 = tpu.transpose %45, [1, 0] : vector<256x8xf32> -> vector<8x256xf32>
    %cst_39 = arith.constant dense<0.000000e+00> : vector<8x64xf32>
    %92 = tpu.matmul %91, %16, %cst_39 {dimension_numbers = #tpu.dot_dimension_numbers<[1], [0], [0], [1], [0, 0, 1, 1], [], []>} : vector<8x256xf32>, vector<256x64xf32>, vector<8x64xf32> -> vector<8x64xf32>
    %c0_40 = arith.constant 0 : index
    %c0_41 = arith.constant 0 : index
    %c0_42 = arith.constant 0 : index
    %93 = vector.load %arg10[%c0_40, %c0_41, %c0_42] : memref<1x16x64xf32, #tpu.memory_space<vmem>>, vector<1x8x64xf32>
    %94 = vector.shape_cast %93 : vector<1x8x64xf32> to vector<8x64xf32>
    %95 = vector.shape_cast %90 : vector<8x64xf32> to vector<1x8x64xf32>
    tpu.vector_store %arg10[%c0_40, %c0_41, %c0_42], %95 {strides = array<i32>} : memref<1x16x64xf32, #tpu.memory_space<vmem>>, vector<1x8x64xf32>,
    %c0_43 = arith.constant 0 : index
    %c8 = arith.constant 8 : index
    %c0_44 = arith.constant 0 : index
    %96 = vector.load %arg10[%c0_43, %c8, %c0_44] : memref<1x16x64xf32, #tpu.memory_space<vmem>>, vector<1x8x64xf32>
    %97 = vector.shape_cast %96 : vector<1x8x64xf32> to vector<8x64xf32>
    %98 = vector.shape_cast %92 : vector<8x64xf32> to vector<1x8x64xf32>
    tpu.vector_store %arg10[%c0_43, %c8, %c0_44], %98 {strides = array<i32>} : memref<1x16x64xf32, #tpu.memory_space<vmem>>, vector<1x8x64xf32>,
    %99 = arith.subf %17, %57 : vector<256x32xf32>
    %100 = arith.mulf %99, %99 : vector<256x32xf32>
    %cst_45 = arith.constant dense<0.000000e+00> : vector<32xf32>
    %101 = vector.multi_reduction <add>, %100, %cst_45 [0] : vector<256x32xf32> to vector<32xf32>
    %102 = vector.shape_cast %101 : vector<32xf32> to vector<1x32xf32>
    %c0_46 = arith.constant 0 : index
    %c0_47 = arith.constant 0 : index
    %c0_48 = arith.constant 0 : index
    %103 = vector.load %arg11[%c0_46, %c0_47, %c0_48] : memref<1x1x128xf32, #tpu.memory_space<vmem>>, vector<1x1x32xf32>
    %104 = vector.shape_cast %103 : vector<1x1x32xf32> to vector<1x32xf32>
    %105 = vector.shape_cast %102 : vector<1x32xf32> to vector<1x1x32xf32>
    tpu.vector_store %arg11[%c0_46, %c0_47, %c0_48], %105 {strides = array<i32>} : memref<1x1x128xf32, #tpu.memory_space<vmem>>, vector<1x1x32xf32>,
    %106 = arith.subf %19, %58 : vector<256x32xf32>
    %107 = arith.mulf %106, %106 : vector<256x32xf32>
    %cst_49 = arith.constant dense<0.000000e+00> : vector<32xf32>
    %108 = vector.multi_reduction <add>, %107, %cst_49 [0] : vector<256x32xf32> to vector<32xf32>
    %109 = vector.shape_cast %108 : vector<32xf32> to vector<1x32xf32>
    %c0_50 = arith.constant 0 : index
    %c0_51 = arith.constant 0 : index
    %c32 = arith.constant 32 : index
    %110 = vector.load %arg11[%c0_50, %c0_51, %c32] : memref<1x1x128xf32, #tpu.memory_space<vmem>>, vector<1x1x32xf32>
    %111 = vector.shape_cast %110 : vector<1x1x32xf32> to vector<1x32xf32>
    %112 = vector.shape_cast %109 : vector<1x32xf32> to vector<1x1x32xf32>
    tpu.vector_store %arg11[%c0_50, %c0_51, %c32], %112 {strides = array<i32>} : memref<1x1x128xf32, #tpu.memory_space<vmem>>, vector<1x1x32xf32>,
    %113 = vector.extract_strided_slice %53 {offsets = [0, 0], sizes = [256, 32], strides = [1, 1]} : vector<256x64xf32> to vector<256x32xf32>
    %114 = arith.subf %18, %113 : vector<256x32xf32>
    %115 = arith.mulf %114, %114 : vector<256x32xf32>
    %cst_52 = arith.constant dense<0.000000e+00> : vector<32xf32>
    %116 = vector.multi_reduction <add>, %115, %cst_52 [0] : vector<256x32xf32> to vector<32xf32>
    %117 = vector.shape_cast %116 : vector<32xf32> to vector<1x32xf32>
    %c0_53 = arith.constant 0 : index
    %c0_54 = arith.constant 0 : index
    %c64 = arith.constant 64 : index
    %118 = vector.load %arg11[%c0_53, %c0_54, %c64] : memref<1x1x128xf32, #tpu.memory_space<vmem>>, vector<1x1x32xf32>
    %119 = vector.shape_cast %118 : vector<1x1x32xf32> to vector<1x32xf32>
    %120 = vector.shape_cast %117 : vector<1x32xf32> to vector<1x1x32xf32>
    tpu.vector_store %arg11[%c0_53, %c0_54, %c64], %120 {strides = array<i32>} : memref<1x1x128xf32, #tpu.memory_space<vmem>>, vector<1x1x32xf32>,
    %121 = vector.extract_strided_slice %56 {offsets = [0, 32], sizes = [256, 32], strides = [1, 1]} : vector<256x64xf32> to vector<256x32xf32>
    %122 = arith.subf %20, %121 : vector<256x32xf32>
    %123 = arith.mulf %122, %122 : vector<256x32xf32>
    %cst_55 = arith.constant dense<0.000000e+00> : vector<32xf32>
    %124 = vector.multi_reduction <add>, %123, %cst_55 [0] : vector<256x32xf32> to vector<32xf32>
    %125 = vector.shape_cast %124 : vector<32xf32> to vector<1x32xf32>
    %c0_56 = arith.constant 0 : index
    %c0_57 = arith.constant 0 : index
    %c96 = arith.constant 96 : index
    %126 = vector.load %arg11[%c0_56, %c0_57, %c96] : memref<1x1x128xf32, #tpu.memory_space<vmem>>, vector<1x1x32xf32>
    %127 = vector.shape_cast %126 : vector<1x1x32xf32> to vector<1x32xf32>
    %128 = vector.shape_cast %125 : vector<1x32xf32> to vector<1x1x32xf32>
    tpu.vector_store %arg11[%c0_56, %c0_57, %c96], %128 {strides = array<i32>} : memref<1x1x128xf32, #tpu.memory_space<vmem>>, vector<1x1x32xf32>,
    return
  }
  func.func @transform_0(%arg0: i32) -> (i32, i32) {
    %c0_i32 = arith.constant 0 : i32
    %c0_i32_0 = arith.constant 0 : i32
    return %arg0, %c0_i32 : i32, i32
  }
  func.func @transform_1(%arg0: i32) -> (i32, i32) {
    %c0_i32 = arith.constant 0 : i32
    %c0_i32_0 = arith.constant 0 : i32
    return %arg0, %c0_i32 : i32, i32
  }
  func.func @transform_2(%arg0: i32) -> (i32, i32) {
    %c0_i32 = arith.constant 0 : i32
    %c0_i32_0 = arith.constant 0 : i32
    %c0_i32_1 = arith.constant 0 : i32
    return %c0_i32, %c0_i32_0 : i32, i32
  }
  func.func @transform_3(%arg0: i32) -> (i32, i32) {
    %c0_i32 = arith.constant 0 : i32
    %c0_i32_0 = arith.constant 0 : i32
    %c0_i32_1 = arith.constant 0 : i32
    return %c0_i32, %c0_i32_0 : i32, i32
  }
  func.func @transform_4(%arg0: i32) -> (i32, i32) {
    %c0_i32 = arith.constant 0 : i32
    %c0_i32_0 = arith.constant 0 : i32
    %c0_i32_1 = arith.constant 0 : i32
    return %c0_i32, %c0_i32_0 : i32, i32
  }
  func.func @transform_5(%arg0: i32) -> (i32, i32) {
    %c0_i32 = arith.constant 0 : i32
    %c0_i32_0 = arith.constant 0 : i32
    %c0_i32_1 = arith.constant 0 : i32
    return %c0_i32, %c0_i32_0 : i32, i32
  }
  func.func @transform_6(%arg0: i32) -> (i32, i32) {
    %c0_i32 = arith.constant 0 : i32
    %c0_i32_0 = arith.constant 0 : i32
    %c0_i32_1 = arith.constant 0 : i32
    return %c0_i32, %c0_i32_0 : i32, i32
  }
  func.func @transform_7(%arg0: i32) -> (i32, i32) {
    %c0_i32 = arith.constant 0 : i32
    %c0_i32_0 = arith.constant 0 : i32
    %c0_i32_1 = arith.constant 0 : i32
    return %c0_i32, %c0_i32_0 : i32, i32
  }
  func.func @transform_8(%arg0: i32) -> (i32, i32) {
    %c0_i32 = arith.constant 0 : i32
    %c0_i32_0 = arith.constant 0 : i32
    return %arg0, %c0_i32 : i32, i32
  }
  func.func @transform_9(%arg0: i32) -> (i32, i32, i32) {
    %c0_i32 = arith.constant 0 : i32
    %c0_i32_0 = arith.constant 0 : i32
    %c0_i32_1 = arith.constant 0 : i32
    return %arg0, %c0_i32, %c0_i32_0 : i32, i32, i32
  }
  func.func @transform_10(%arg0: i32) -> (i32, i32, i32) {
    %c0_i32 = arith.constant 0 : i32
    %c0_i32_0 = arith.constant 0 : i32
    %c0_i32_1 = arith.constant 0 : i32
    return %arg0, %c0_i32, %c0_i32_0 : i32, i32, i32
  }
}

</mosaic_0001>

<bundles_post_ra>
// kernel: mguit_forward.3
= control target key start
LH: loop header
LB: loop body
LE: loop exit
PB: predicated region body
PF: predicated region fallthrough
CT: control target
= control target key end

     0   :  { %s8361_s13 = smov 0   ;;  %s11358_s0 = inlined_call_operand.vmem [shape: bf16[512,8], index: 0, kind: input, shape index: {}]   ;;  %s11359_s1 = inlined_call_operand.vmem [shape: bf16[512,16], index: 1, kind: input, shape index: {}]   ;;  %s11360_s2 = inlined_call_operand.vmem [shape: bf16[8,128], index: 2, kind: input, shape index: {}]   ;;  %s11361_s3 = inlined_call_operand.vmem [shape: f32[1,128], index: 3, kind: input, shape index: {}]   ;;  %s11362_s4 = inlined_call_operand.vmem [shape: bf16[32,8], index: 4, kind: input, shape index: {}]   ;;  %s11363_s5 = inlined_call_operand.vmem [shape: bf16[8,96], index: 5, kind: input, shape index: {}]   ;;  %s11364_s6 = inlined_call_operand.vmem [shape: bf16[384,128], index: 6, kind: input, shape index: {}]   ;;  %s11365_s7 = inlined_call_operand.vmem [shape: f32[1,128], index: 7, kind: input, shape index: {}]   ;;  %s11366_s8 = inlined_call_operand.vmem [shape: f32[512,128], index: 8, kind: output, shape index: {0}]   ;;  %s11367_s9 = inlined_call_operand.vmem [shape: f32[2,16,64], index: 9, kind: output, shape index: {1}]   ;;  %s11368_s10 = inlined_call_operand.vmem [shape: f32[2,1,128], index: 10, kind: output, shape index: {2}]  }
   0x1 LB: > { %s8367_s14 = sadd.s32 4294967295, %s8298_s13   ;;  %p6356_p0 = scmp.ge.s32.totalorder %s8298_s13, 1  ;;  %s8298_s13 = sphi %s8361_s13, %s21_s13  }
   0x2   : > { %p329_p1 = scmp.lt.s32.totalorder %s8298_s13, 3 }
   0x4   : > { %p330_p2 = pnand %p6356_p0, %p329_p1 }
   0x6   : > { %333 = sbr.rel (%p330_p2) target bundleno = 1623 (0x657), region = 52 }
   0xd   : > { %v471_v0 = vld [vmem:[%s11360_s2] sm:$0xf]  ;;  %vm608_vm0 = vcmask 1043456   ;;  %s6357_s17 = sshll.u32 %s8367_s14, 5  ;;  %vm559_vm1 = vcmask 64512   ;;  %v8397_v6 = vld [vmem:[%s11362_s4 + $0x8] sm:$0xff]  }
   0xe   : > { %v8378_v1 = vld [vmem:[%s11362_s4] sm:$0xff]   ;;  %7543 = vmatprep.subr.msk.bf16.mxu0 %vm608_vm0, %v471_v0  ;;  %v610_v2 = vsel %vm608_vm0, %v471_v0, 0  ;;  %p381_p3 = scmp.lt.s32.totalorder %s6357_s17, 63  ;;  %vm901_vm6 = vcmask 261120   ;;  %s8300_s11 = smov 64  }
   0xf   : > { %6900 = vmatpush3.bf16.msra.mxu0 %v610_v2  ;;  %v8440_v20 = vld [vmem:[%s11361_s3] ss:$0 sm:$0xff]  ;;  %s8303_s29 = smov 120   ;;  %s8304_s22 = smov 32  }
  0x10   : > { %s12046_s17 = smov (!%p381_p3, %s6357_s17), 63  ;;  %6933 = vmatprep.subr.bf16.mxu0 %v8378_v1  ;;  %p398_p4 = scmp.lt.s32.totalorder %s8367_s14, 1 }
  0x11   : > { %s6358_s20 = sshll.u32 %s12046_s17, 2  ;;  %s6362_s30 = sshll.u32 %s12046_s17, 3 }
  0x12   : > { %s8389_s23 = scalar_lea.vmem %s11358_s0, %s6358_s20  ;;  %s8403_s28 = scalar_lea.vmem %s11359_s1, %s6358_s20 }
  0x13   : > { %v407_v3 = vld [vmem:[%s8389_s23] sm:$0xff]   ;;  %v409_v4 = vld [vmem:[%s8389_s23 + $0x8] sm:$0xff]   ;;  %v411_v5 = vld [vmem:[%s8389_s23 + $0x10] sm:$0xff]   ;;  %s12048_s14 = smov (!%p398_p4, %s8367_s14), 1  ;;  %s11295_s15 = scalar_lea.vmem %s11366_s8, %s6362_s30 }
  0x14   : > { %6901 = vmatprep.mubr.msk.bf16.mxu0 %vm559_vm1, %v407_v3  ;;  %v413_v7 = vld [vmem:[%s8389_s23 + $0x18] sm:$0xff]   ;;  %v415_v8 = vld [vmem:[%s8389_s23 + $0x20] sm:$0xff]   ;;  %v417_v9 = vld [vmem:[%s8389_s23 + $0x28] sm:$0xff]   ;;  %s6603_s21 = sshll.u32 %s12048_s14, 4 }
  0x15   : > { %6902 = vmatmul.mubr.msk.bf16.vlgmr.msra.gmra.mrb[0].mxu0 %vm559_vm1, %v409_v4  ;;  %v419_v10 = vld [vmem:[%s8389_s23 + $0x30] sm:$0xff]   ;;  %v421_v11 = vld [vmem:[%s8389_s23 + $0x38] sm:$0xff]   ;;  %v423_v12 = vld [vmem:[%s8389_s23 + $0x40] sm:$0xff]   ;;  %s402_s25 = scalar_lea.vmem %s11367_s9, %s6603_s21 }
  0x16   : > { %6905 = vmatprep.mubr.msk.bf16.mxu0 %vm559_vm1, %v411_v5  ;;  %6934 = vmatpush3.bf16.msra.mxu0 %v8378_v1  ;;  %v425_v13 = vld [vmem:[%s8389_s23 + $0x48] sm:$0xff]   ;;  %v427_v14 = vld [vmem:[%s8389_s23 + $0x50] sm:$0xff]   ;;  %v429_v15 = vld [vmem:[%s8389_s23 + $0x58] sm:$0xff]  }
  0x17   : > { %6935 = vmatprep.subr.bf16.mxu0 %v8397_v6  ;;  %v431_v16 = vld [vmem:[%s8389_s23 + $0x60] sm:$0xff]   ;;  %v433_v17 = vld [vmem:[%s8389_s23 + $0x68] sm:$0xff]   ;;  %v435_v18 = vld [vmem:[%s8389_s23 + $0x70] sm:$0xff]  }
  0x18   : > { %v437_v19 = vld [vmem:[%s8389_s23 + $0x78] sm:$0xff]  }
  0x1a   : > { %6936 = vmatpush3.bf16.msra.mxu0 %v8397_v6 }
  0x1b   : > { %6969 = vmatprep.subr.bf16.mxu0 %v8378_v1 }
  0x1d   : > { %6906 = vmatmul.mubr.msk.bf16.gmra.mrb[4].mxu0 %vm559_vm1, %v413_v7 }
  0x1e   : > { %6909 = vmatprep.mubr.msk.bf16.mxu0 %vm559_vm1, %v415_v8 }
  0x25   : > { %6910 = vmatmul.mubr.msk.bf16.gmra.mrb[8].mxu0 %vm559_vm1, %v417_v9 }
  0x26   : > { %6913 = vmatprep.mubr.msk.bf16.mxu0 %vm559_vm1, %v419_v10 }
  0x2d   : > { %6914 = vmatmul.mubr.msk.bf16.gmra.mrb[12].mxu0 %vm559_vm1, %v421_v11 }
  0x2e   : > { %6917 = vmatprep.mubr.msk.bf16.mxu0 %vm559_vm1, %v423_v12 }
  0x35   : > { %6918 = vmatmul.mubr.msk.bf16.gmra.mrb[16].mxu0 %vm559_vm1, %v425_v13 }
  0x36   : > { %6921 = vmatprep.mubr.msk.bf16.mxu0 %vm559_vm1, %v427_v14 }
  0x3d   : > { %6922 = vmatmul.mubr.msk.bf16.gmra.mrb[20].mxu0 %vm559_vm1, %v429_v15 }
  0x3e   : > { %6925 = vmatprep.mubr.msk.bf16.mxu0 %vm559_vm1, %v431_v16 }
  0x45   : > { %6926 = vmatmul.mubr.msk.bf16.gmra.mrb[24].mxu0 %vm559_vm1, %v433_v17 }
  0x46   : > { %6929 = vmatprep.mubr.msk.bf16.mxu0 %vm559_vm1, %v435_v18 }
  0x4d   : > { %6930 = vmatmul.mubr.msk.bf16.gmra.mrb[28].mxu0 %vm559_vm1, %v437_v19 }
  0xe8   : > { %v6903_v21 = vpop.f32.mrb[0].mxu0 }
  0xe9   : > { %v655_v22 = vadd.f32 %v6903_v21, %v8440_v20  ;;  %v646_v23 = vpop.f32.mrb[1].mxu0 }
  0xea   : > { %v647_v24 = vadd.f32 %v8440_v20, %v646_v23  ;;  %v6904_v25 = vpop.f32.mrb[2].mxu0 }
  0xeb   : > { %v658_v26 = vadd.f32 %v6904_v25, %v8440_v20  ;;  %v649_v27 = vpop.f32.mrb[3].mxu0  ;;  %v807_v30 = vmul.f32 0.2, %v655_v22  ;;  %vm775_vm4 = vcmp.ge.f32.partialorder %v655_v22, 0.0 }
  0xec   : > { %v805_v28 = vmul.f32 0.2, %v647_v24  ;;  %v650_v29 = vadd.f32 %v8440_v20, %v649_v27  ;;  %vm773_vm2 = vcmp.ge.f32.partialorder %v647_v24, 0.0 }
  0xed   : > { %vm776_vm3 = vcmp.ge.f32.partialorder %v658_v26, 0.0  ;;  %v808_v31 = vmul.f32 0.2, %v658_v26  ;;  %v8452_v37 = vsel %vm775_vm4, %v655_v22, %v807_v30 }
  0xee   : > { %vm774_vm5 = vcmp.ge.f32.partialorder %v650_v29, 0.0  ;;  %v806_v32 = vmul.f32 0.2, %v650_v29  ;;  %v8448_v34 = vsel %vm773_vm2, %v647_v24, %v805_v28  ;;  %11603 = vst [vmem:[#allocation5_spill] sm:$0xff] %v8452_v37 }
  0xef   : > { %v8446_v33 = vsel %vm776_vm3, %v658_v26, %v808_v31  ;;  %11601 = vst [vmem:[#allocation3_spill] sm:$0xff] %v8448_v34 }
  0xf0   : > { %11600 = vst [vmem:[#allocation2_spill] sm:$0xff] %v8446_v33  ;;  %v8450_v35 = vsel %vm774_vm5, %v650_v29, %v806_v32  ;;  %v6907_v36 = vpop.f32.mrb[4].mxu0  ;;  %v8461_v41 = vpack.c.bf16 %v8446_v33, %v8452_v37 }
  0xf1   : > { %11602 = vst [vmem:[#allocation4_spill] sm:$0xff] %v8450_v35  ;;  %v671_v38 = vadd.f32 %v6907_v36, %v8440_v20  ;;  %v662_v39 = vpop.f32.mrb[5].mxu0  ;;  %v8457_v40 = vpack.c.bf16 %v8450_v35, %v8448_v34 }
  0xf2   : > { %11605 = vst [vmem:[#allocation7_spill] sm:$0xff] %v8461_v41  ;;  %v663_v42 = vadd.f32 %v8440_v20, %v662_v39  ;;  %v6908_v43 = vpop.f32.mrb[6].mxu0 }
  0xf3   : > { %11604 = vst [vmem:[#allocation6_spill] sm:$0xff] %v8457_v40  ;;  %v674_v44 = vadd.f32 %v6908_v43, %v8440_v20  ;;  %v665_v45 = vpop.f32.mrb[7].mxu0  ;;  %1479 = vrot.lane.b32.xlu0 %v8457_v40, %s8300_s11  ;;  %6937 = vmatprep.mubr.msk.bf16.mxu0 %vm901_vm6, %v8457_v40  ;;  %v811_v48 = vmul.f32 0.2, %v671_v38  ;;  %vm779_vm9 = vcmp.ge.f32.partialorder %v671_v38, 0.0 }
  0xf4   : > { %v809_v46 = vmul.f32 0.2, %v663_v42  ;;  %v666_v47 = vadd.f32 %v8440_v20, %v665_v45  ;;  %6938 = vmatmul.mubr.msk.bf16.vlgmr.msra.gmra.mrb[32].mxu0 %vm901_vm6, %v8461_v41  ;;  %vm777_vm7 = vcmp.ge.f32.partialorder %v663_v42, 0.0 }
  0xf5   : > { %vm780_vm8 = vcmp.ge.f32.partialorder %v674_v44, 0.0  ;;  %v812_v49 = vmul.f32 0.2, %v674_v44  ;;  %6970 = vmatpush3.bf16.msra.mxu0 %v8378_v1  ;;  %v8482_v55 = vsel %vm779_vm9, %v671_v38, %v811_v48 }
  0xf6   : > { %vm778_vm10 = vcmp.ge.f32.partialorder %v666_v47, 0.0  ;;  %v810_v50 = vmul.f32 0.2, %v666_v47  ;;  %6971 = vmatprep.subr.bf16.mxu0 %v8397_v6  ;;  %v8478_v52 = vsel %vm777_vm7, %v663_v42, %v809_v46  ;;  %11609 = vst [vmem:[#allocation11_spill] sm:$0xff] %v8482_v55 }
  0xf7   : > { %v8474_v51 = vsel %vm780_vm8, %v674_v44, %v812_v49  ;;  %1481 = vrot.lane.b32.xlu0 %v8461_v41, %s8300_s11  ;;  %11607 = vst [vmem:[#allocation9_spill] sm:$0xff] %v8478_v52 }
  0xf8   : > { %11606 = vst [vmem:[#allocation8_spill] sm:$0xff] %v8474_v51  ;;  %v8480_v53 = vsel %vm778_vm10, %v666_v47, %v810_v50  ;;  %v6911_v54 = vpop.f32.mrb[8].mxu0  ;;  %v8493_v61 = vpack.c.bf16 %v8474_v51, %v8482_v55 }
  0xf9   : > { %11608 = vst [vmem:[#allocation10_spill] sm:$0xff] %v8480_v53  ;;  %v687_v56 = vadd.f32 %v6911_v54, %v8440_v20  ;;  %v678_v57 = vpop.f32.mrb[9].mxu0  ;;  %v8487_v58 = vpack.c.bf16 %v8480_v53, %v8478_v52  ;;  %6972 = vmatpush3.bf16.msra.mxu0 %v8397_v6 }
  0xfa   : > { %v679_v59 = vadd.f32 %v8440_v20, %v678_v57  ;;  %v6912_v60 = vpop.f32.mrb[10].mxu0  ;;  %11611 = vst [vmem:[#allocation13_spill] sm:$0xff] %v8493_v61 }
  0xfb   : > { %11610 = vst [vmem:[#allocation12_spill] sm:$0xff] %v8487_v58  ;;  %v815_v62 = vmul.f32 0.2, %v687_v56  ;;  %v690_v63 = vadd.f32 %v6912_v60, %v8440_v20  ;;  %v681_v0 = vpop.f32.mrb[11].mxu0  ;;  %1483 = vrot.lane.b32.xlu1 %v8487_v58, %s8300_s11  ;;  %6941 = vmatprep.mubr.msk.bf16.mxu0 %vm901_vm6, %v8487_v58  ;;  %vm783_vm11 = vcmp.ge.f32.partialorder %v687_v56, 0.0 }
  0xfc   : > { %v813_v1 = vmul.f32 0.2, %v679_v59  ;;  %v682_v2 = vadd.f32 %v8440_v20, %v681_v0  ;;  %6942 = vmatmul.mubr.msk.bf16.gmra.mrb[36].mxu0 %vm901_vm6, %v8493_v61  ;;  %vm781_vm12 = vcmp.ge.f32.partialorder %v679_v59, 0.0 }
  0xfd   : > { %vm784_vm13 = vcmp.ge.f32.partialorder %v690_v63, 0.0  ;;  %v816_v3 = vmul.f32 0.2, %v690_v63  ;;  %v8503_v5 = vsel %vm783_vm11, %v687_v56, %v815_v62 }
  0xfe   : > { %vm782_vm14 = vcmp.ge.f32.partialorder %v682_v2, 0.0  ;;  %v814_v4 = vmul.f32 0.2, %v682_v2  ;;  %11612 = vst [vmem:[#allocation14_spill] sm:$0xff] %v8503_v5  ;;  %v8509_v7 = vsel %vm781_vm12, %v679_v59, %v813_v1 }
  0xff   : > { %v8505_v6 = vsel %vm784_vm13, %v690_v63, %v816_v3  ;;  %1485 = vrot.lane.b32.xlu1 %v8493_v61, %s8300_s11  ;;  %11614 = vst [vmem:[#allocation16_spill] sm:$0xff] %v8509_v7 }
 0x100   : > { %11613 = vst [vmem:[#allocation15_spill] sm:$0xff] %v8505_v6  ;;  %v8511_v8 = vsel %vm782_vm14, %v682_v2, %v814_v4  ;;  %v6915_v9 = vpop.f32.mrb[12].mxu0  ;;  %v8515_v10 = vpack.c.bf16 %v8505_v6, %v8503_v5 }
 0x101   : > { %11615 = vst [vmem:[#allocation17_spill] sm:$0xff] %v8511_v8  ;;  %v703_v11 = vadd.f32 %v6915_v9, %v8440_v20  ;;  %v694_v12 = vpop.f32.mrb[13].mxu0  ;;  %v8520_v13 = vpack.c.bf16 %v8511_v8, %v8509_v7 }
 0x102   : > { %11616 = vst [vmem:[#allocation18_spill] sm:$0xff] %v8515_v10  ;;  %v695_v14 = vadd.f32 %v8440_v20, %v694_v12  ;;  %v6916_v15 = vpop.f32.mrb[14].mxu0 }
 0x103   : > { %11617 = vst [vmem:[#allocation19_spill] sm:$0xff] %v8520_v13  ;;  %v819_v16 = vmul.f32 0.2, %v703_v11  ;;  %v706_v17 = vadd.f32 %v6916_v15, %v8440_v20  ;;  %v697_v18 = vpop.f32.mrb[15].mxu0  ;;  %1489 = vrot.lane.b32.xlu1 %v8515_v10, %s8300_s11  ;;  %1487 = vrot.lane.b32.xlu0 %v8520_v13, %s8300_s11  ;;  %vm787_vm15 = vcmp.ge.f32.partialorder %v703_v11, 0.0 }
 0x104   : > { %v817_v19 = vmul.f32 0.2, %v695_v14  ;;  %v698_v21 = vadd.f32 %v8440_v20, %v697_v18  ;;  %6945 = vmatprep.mubr.msk.bf16.mxu0 %vm901_vm6, %v8520_v13  ;;  %vm785_vm2 = vcmp.ge.f32.partialorder %v695_v14, 0.0 }
 0x105   : > { %vm788_vm3 = vcmp.ge.f32.partialorder %v706_v17, 0.0  ;;  %v820_v22 = vmul.f32 0.2, %v706_v17  ;;  %6946 = vmatmul.mubr.msk.bf16.gmra.mrb[40].mxu0 %vm901_vm6, %v8515_v10  ;;  %v8533_v24 = vsel %vm787_vm15, %v703_v11, %v819_v16 }
 0x106   : > { %vm786_vm4 = vcmp.ge.f32.partialorder %v698_v21, 0.0  ;;  %v818_v23 = vmul.f32 0.2, %v698_v21  ;;  %11618 = vst [vmem:[#allocation20_spill] sm:$0xff] %v8533_v24  ;;  %v8537_v26 = vsel %vm785_vm2, %v695_v14, %v817_v19 }
 0x107   : > { %v8535_v25 = vsel %vm788_vm3, %v706_v17, %v820_v22  ;;  %11620 = vst [vmem:[#allocation22_spill] sm:$0xff] %v8537_v26 }
 0x108   : > { %11619 = vst [vmem:[#allocation21_spill] sm:$0xff] %v8535_v25  ;;  %v8539_v27 = vsel %vm786_vm4, %v698_v21, %v818_v23  ;;  %v6919_v28 = vpop.f32.mrb[16].mxu0  ;;  %v8543_v29 = vpack.c.bf16 %v8535_v25, %v8533_v24 }
 0x109   : > { %11621 = vst [vmem:[#allocation23_spill] sm:$0xff] %v8539_v27  ;;  %v719_v30 = vadd.f32 %v6919_v28, %v8440_v20  ;;  %v710_v31 = vpop.f32.mrb[17].mxu0  ;;  %v8548_v32 = vpack.c.bf16 %v8539_v27, %v8537_v26 }
 0x10a   : > { %11622 = vst [vmem:[#allocation24_spill] sm:$0xff] %v8543_v29  ;;  %v711_v36 = vadd.f32 %v8440_v20, %v710_v31  ;;  %v6920_v38 = vpop.f32.mrb[18].mxu0  ;;  %1493 = vrot.lane.b32.xlu1 %v8543_v29, %s8300_s11 }
 0x10b   : > { %11623 = vst [vmem:[#allocation25_spill] sm:$0xff] %v8548_v32  ;;  %v823_v39 = vmul.f32 0.2, %v719_v30  ;;  %v722_v42 = vadd.f32 %v6920_v38, %v8440_v20  ;;  %v713_v43 = vpop.f32.mrb[19].mxu0  ;;  %1491 = vrot.lane.b32.xlu0 %v8548_v32, %s8300_s11  ;;  %6949 = vmatprep.mubr.msk.bf16.mxu0 %vm901_vm6, %v8548_v32  ;;  %vm791_vm5 = vcmp.ge.f32.partialorder %v719_v30, 0.0 }
 0x10c   : > { %v821_v44 = vmul.f32 0.2, %v711_v36  ;;  %v714_v45 = vadd.f32 %v8440_v20, %v713_v43  ;;  %vm789_vm7 = vcmp.ge.f32.partialorder %v711_v36, 0.0 }
 0x10d   : > { %vm792_vm8 = vcmp.ge.f32.partialorder %v722_v42, 0.0  ;;  %v824_v46 = vmul.f32 0.2, %v722_v42  ;;  %6950 = vmatmul.mubr.msk.bf16.gmra.mrb[44].mxu0 %vm901_vm6, %v8543_v29  ;;  %v8561_v48 = vsel %vm791_vm5, %v719_v30, %v823_v39 }
 0x10e   : > { %vm790_vm9 = vcmp.ge.f32.partialorder %v714_v45, 0.0  ;;  %v822_v47 = vmul.f32 0.2, %v714_v45  ;;  %11624 = vst [vmem:[#allocation26_spill] sm:$0xff] %v8561_v48  ;;  %v8565_v50 = vsel %vm789_vm7, %v711_v36, %v821_v44 }
 0x10f   : > { %v8563_v49 = vsel %vm792_vm8, %v722_v42, %v824_v46  ;;  %11626 = vst [vmem:[#allocation28_spill] sm:$0xff] %v8565_v50 }
 0x110   : > { %11625 = vst [vmem:[#allocation27_spill] sm:$0xff] %v8563_v49  ;;  %v8567_v54 = vsel %vm790_vm9, %v714_v45, %v822_v47  ;;  %v6923_v56 = vpop.f32.mrb[20].mxu0  ;;  %v8571_v57 = vpack.c.bf16 %v8563_v49, %v8561_v48  ;;  %vm5618_vm9 = vcmask 785920  }
 0x111   : > { %11627 = vst [vmem:[#allocation29_spill] sm:$0xff] %v8567_v54  ;;  %v735_v59 = vadd.f32 %v6923_v56, %v8440_v20  ;;  %v726_v60 = vpop.f32.mrb[21].mxu0  ;;  %v8576_v62 = vpack.c.bf16 %v8567_v54, %v8565_v50 }
 0x112   : > { %11628 = vst [vmem:[#allocation30_spill] sm:$0xff] %v8571_v57  ;;  %v727_v63 = vadd.f32 %v8440_v20, %v726_v60  ;;  %v6924_v0 = vpop.f32.mrb[22].mxu0  ;;  %1497 = vrot.lane.b32.xlu1 %v8571_v57, %s8300_s11 }
 0x113   : > { %11629 = vst [vmem:[#allocation31_spill] sm:$0xff] %v8576_v62  ;;  %v827_v1 = vmul.f32 0.2, %v735_v59  ;;  %v738_v2 = vadd.f32 %v6924_v0, %v8440_v20  ;;  %v729_v3 = vpop.f32.mrb[23].mxu0  ;;  %1495 = vrot.lane.b32.xlu0 %v8576_v62, %s8300_s11  ;;  %6953 = vmatprep.mubr.msk.bf16.mxu0 %vm901_vm6, %v8576_v62  ;;  %vm795_vm10 = vcmp.ge.f32.partialorder %v735_v59, 0.0 }
 0x114   : > { %v825_v4 = vmul.f32 0.2, %v727_v63  ;;  %v730_v9 = vadd.f32 %v8440_v20, %v729_v3  ;;  %vm793_vm11 = vcmp.ge.f32.partialorder %v727_v63, 0.0 }
 0x115   : > { %vm796_vm12 = vcmp.ge.f32.partialorder %v738_v2, 0.0  ;;  %v828_v11 = vmul.f32 0.2, %v738_v2  ;;  %6954 = vmatmul.mubr.msk.bf16.gmra.mrb[48].mxu0 %vm901_vm6, %v8571_v57  ;;  %v8589_v14 = vsel %vm795_vm10, %v735_v59, %v827_v1  ;;  %vm6154_vm10 = vcmask 1048320  }
 0x116   : > { %vm794_vm13 = vcmp.ge.f32.partialorder %v730_v9, 0.0  ;;  %v826_v12 = vmul.f32 0.2, %v730_v9  ;;  %11630 = vst [vmem:[#allocation32_spill] sm:$0xff] %v8589_v14  ;;  %v8593_v16 = vsel %vm793_vm11, %v727_v63, %v825_v4  ;;  %vm5692_vm11 = vcmask 516352  }
 0x117   : > { %v8591_v15 = vsel %vm796_vm12, %v738_v2, %v828_v11  ;;  %11632 = vst [vmem:[#allocation34_spill] sm:$0xff] %v8593_v16  ;;  %vm5960_vm12 = vcmask 778752  }
 0x118   : > { %11631 = vst [vmem:[#allocation33_spill] sm:$0xff] %v8591_v15  ;;  %v8595_v17 = vsel %vm794_vm13, %v730_v9, %v826_v12  ;;  %v6927_v18 = vpop.f32.mrb[24].mxu0  ;;  %v8599_v19 = vpack.c.bf16 %v8591_v15, %v8589_v14  ;;  %vm6224_vm13 = vcmask 1041152  }
 0x119   : > { %11633 = vst [vmem:[#allocation35_spill] sm:$0xff] %v8595_v17  ;;  %v751_v21 = vadd.f32 %v6927_v18, %v8440_v20  ;;  %v742_v22 = vpop.f32.mrb[25].mxu0  ;;  %v8604_v23 = vpack.c.bf16 %v8595_v17, %v8593_v16 }
 0x11a   : > { %11634 = vst [vmem:[#allocation36_spill] sm:$0xff] %v8599_v19  ;;  %v743_v28 = vadd.f32 %v8440_v20, %v742_v22  ;;  %v6928_v30 = vpop.f32.mrb[26].mxu0  ;;  %1501 = vrot.lane.b32.xlu1 %v8599_v19, %s8300_s11 }
 0x11b   : > { %11635 = vst [vmem:[#allocation37_spill] sm:$0xff] %v8604_v23  ;;  %v831_v31 = vmul.f32 0.2, %v751_v21  ;;  %v754_v36 = vadd.f32 %v6928_v30, %v8440_v20  ;;  %v745_v38 = vpop.f32.mrb[27].mxu0  ;;  %1499 = vrot.lane.b32.xlu0 %v8604_v23, %s8300_s11  ;;  %6957 = vmatprep.mubr.msk.bf16.mxu0 %vm901_vm6, %v8604_v23  ;;  %vm799_vm14 = vcmp.ge.f32.partialorder %v751_v21, 0.0 }
 0x11c   : > { %v829_v39 = vmul.f32 0.2, %v743_v28  ;;  %v746_v42 = vadd.f32 %v8440_v20, %v745_v38  ;;  %vm797_vm15 = vcmp.ge.f32.partialorder %v743_v28, 0.0 }
 0x11d   : > { %vm800_vm2 = vcmp.ge.f32.partialorder %v754_v36, 0.0  ;;  %v832_v43 = vmul.f32 0.2, %v754_v36  ;;  %6958 = vmatmul.mubr.msk.bf16.gmra.mrb[52].mxu0 %vm901_vm6, %v8599_v19  ;;  %v8617_v45 = vsel %vm799_vm14, %v751_v21, %v831_v31 }
 0x11e   : > { %vm798_vm3 = vcmp.ge.f32.partialorder %v746_v42, 0.0  ;;  %v830_v44 = vmul.f32 0.2, %v746_v42  ;;  %11636 = vst [vmem:[#allocation38_spill] sm:$0xff] %v8617_v45  ;;  %v8621_v47 = vsel %vm797_vm15, %v743_v28, %v829_v39 }
 0x11f   : > { %v8619_v46 = vsel %vm800_vm2, %v754_v36, %v832_v43  ;;  %11638 = vst [vmem:[#allocation40_spill] sm:$0xff] %v8621_v47 }
 0x120   : > { %11637 = vst [vmem:[#allocation39_spill] sm:$0xff] %v8619_v46  ;;  %v8623_v56 = vsel %vm798_vm3, %v746_v42, %v830_v44  ;;  %v6931_v59 = vpop.f32.mrb[28].mxu0  ;;  %v8627_v60 = vpack.c.bf16 %v8619_v46, %v8617_v45 }
 0x121   : > { %11639 = vst [vmem:[#allocation41_spill] sm:$0xff] %v8623_v56  ;;  %v767_v63 = vadd.f32 %v6931_v59, %v8440_v20  ;;  %v758_v0 = vpop.f32.mrb[29].mxu0  ;;  %v8632_v1 = vpack.c.bf16 %v8623_v56, %v8621_v47 }
 0x122   : > { %11640 = vst [vmem:[#allocation42_spill] sm:$0xff] %v8627_v60  ;;  %v759_v2 = vadd.f32 %v8440_v20, %v758_v0  ;;  %v6932_v3 = vpop.f32.mrb[30].mxu0  ;;  %1505 = vrot.lane.b32.xlu1 %v8627_v60, %s8300_s11 }
 0x123   : > { %11641 = vst [vmem:[#allocation43_spill] sm:$0xff] %v8632_v1  ;;  %v835_v4 = vmul.f32 0.2, %v767_v63  ;;  %v770_v9 = vadd.f32 %v6932_v3, %v8440_v20  ;;  %v761_v11 = vpop.f32.mrb[31].mxu0  ;;  %1503 = vrot.lane.b32.xlu0 %v8632_v1, %s8300_s11  ;;  %6961 = vmatprep.mubr.msk.bf16.mxu0 %vm901_vm6, %v8632_v1  ;;  %vm803_vm4 = vcmp.ge.f32.partialorder %v767_v63, 0.0 }
 0x124   : > { %v833_v12 = vmul.f32 0.2, %v759_v2  ;;  %v762_v18 = vadd.f32 %v8440_v20, %v761_v11  ;;  %vm801_vm5 = vcmp.ge.f32.partialorder %v759_v2, 0.0 }
 0x125   : > { %vm804_vm7 = vcmp.ge.f32.partialorder %v770_v9, 0.0  ;;  %v836_v21 = vmul.f32 0.2, %v770_v9  ;;  %6962 = vmatmul.mubr.msk.bf16.gmra.mrb[56].mxu0 %vm901_vm6, %v8627_v60  ;;  %v8645_v28 = vsel %vm803_vm4, %v767_v63, %v835_v4 }
 0x126   : > { %vm802_vm8 = vcmp.ge.f32.partialorder %v762_v18, 0.0  ;;  %v834_v22 = vmul.f32 0.2, %v762_v18  ;;  %11642 = vst [vmem:[#allocation44_spill] sm:$0xff] %v8645_v28  ;;  %v8649_v31 = vsel %vm801_vm5, %v759_v2, %v833_v12 }
 0x127   : > { %v8647_v30 = vsel %vm804_vm7, %v770_v9, %v836_v21  ;;  %11644 = vst [vmem:[#allocation46_spill] sm:$0xff] %v8649_v31 }
 0x128   : > { %11643 = vst [vmem:[#allocation45_spill] sm:$0xff] %v8647_v30  ;;  %v8651_v36 = vsel %vm802_vm8, %v762_v18, %v834_v22  ;;  %v8655_v38 = vpack.c.bf16 %v8647_v30, %v8645_v28 }
 0x129   : > { %11645 = vst [vmem:[#allocation47_spill] sm:$0xff] %v8651_v36  ;;  %v8659_v20 = vpack.c.bf16 %v8651_v36, %v8649_v31 }
 0x12a   : > { %11646 = vst [vmem:[#allocation48_spill] sm:$0xff] %v8655_v38  ;;  %1509 = vrot.lane.b32.xlu1 %v8655_v38, %s8300_s11 }
 0x12b   : > { %11647 = vst [vmem:[#allocation49_spill] sm:$0xff] %v8659_v20  ;;  %1507 = vrot.lane.b32.xlu0 %v8659_v20, %s8300_s11  ;;  %6965 = vmatprep.mubr.msk.bf16.mxu0 %vm901_vm6, %v8659_v20 }
 0x12d   : > { %6966 = vmatmul.mubr.msk.bf16.gmra.mrb[60].mxu0 %vm901_vm6, %v8655_v38 }
 0x165   : > { %v1480_v39 = vpop.permute.xlu0 %1479 }
 0x166   : > { %6973 = vmatprep.mubr.msk.bf16.mxu0 %vm901_vm6, %v1480_v39 }
 0x169   : > { %v1482_v42 = vpop.permute.xlu0 %1481 }
 0x16a   : > { %6974 = vmatmul.mubr.msk.bf16.vlgmr.msra.gmra.mrb[64].mxu0 %vm901_vm6, %v1482_v42 }
 0x16d   : > { %v1484_v43 = vpop.permute.xlu1 %1483 }
 0x16e   : > { %6977 = vmatprep.mubr.msk.bf16.mxu0 %vm901_vm6, %v1484_v43 }
 0x171   : > { %v1486_v44 = vpop.permute.xlu1 %1485 }
 0x172   : > { %6978 = vmatmul.mubr.msk.bf16.gmra.mrb[68].mxu0 %vm901_vm6, %v1486_v44 }
 0x175   : > { %v1488_v59 = vpop.permute.xlu0 %1487  ;;  %v1490_v63 = vpop.permute.xlu1 %1489 }
 0x176   : > { %6981 = vmatprep.mubr.msk.bf16.mxu0 %vm901_vm6, %v1488_v59 }
 0x17a   : > { %6982 = vmatmul.mubr.msk.bf16.gmra.mrb[72].mxu0 %vm901_vm6, %v1490_v63 }
 0x17c   : > { %v1494_v2 = vpop.permute.xlu1 %1493 }
 0x17d   : > { %v1492_v0 = vpop.permute.xlu0 %1491 }
 0x17e   : > { %6985 = vmatprep.mubr.msk.bf16.mxu0 %vm901_vm6, %v1492_v0 }
 0x182   : > { %6986 = vmatmul.mubr.msk.bf16.gmra.mrb[76].mxu0 %vm901_vm6, %v1494_v2 }
 0x184   : > { %v1498_v4 = vpop.permute.xlu1 %1497 }
 0x185   : > { %v1496_v3 = vpop.permute.xlu0 %1495 }
 0x186   : > { %6989 = vmatprep.mubr.msk.bf16.mxu0 %vm901_vm6, %v1496_v3 }
 0x18a   : > { %6990 = vmatmul.mubr.msk.bf16.gmra.mrb[80].mxu0 %vm901_vm6, %v1498_v4 }
 0x18c   : > { %v1502_v11 = vpop.permute.xlu1 %1501 }
 0x18d   : > { %v1500_v9 = vpop.permute.xlu0 %1499 }
 0x18e   : > { %6993 = vmatprep.mubr.msk.bf16.mxu0 %vm901_vm6, %v1500_v9 }
 0x192   : > { %6994 = vmatmul.mubr.msk.bf16.gmra.mrb[84].mxu0 %vm901_vm6, %v1502_v11 }
 0x194   : > { %v1506_v18 = vpop.permute.xlu1 %1505 }
 0x195   : > { %v1504_v12 = vpop.permute.xlu0 %1503 }
 0x196   : > { %6997 = vmatprep.mubr.msk.bf16.mxu0 %vm901_vm6, %v1504_v12 }
 0x19a   : > { %6998 = vmatmul.mubr.msk.bf16.gmra.mrb[88].mxu0 %vm901_vm6, %v1506_v18 }
 0x19c   : > { %v1510_v22 = vpop.permute.xlu1 %1509 }
 0x19d   : > { %v1508_v21 = vpop.permute.xlu0 %1507 }
 0x19e   : > { %7001 = vmatprep.mubr.msk.bf16.mxu0 %vm901_vm6, %v1508_v21 }
 0x1a2   : > { %7002 = vmatmul.mubr.msk.bf16.gmra.mrb[92].mxu0 %vm901_vm6, %v1510_v22 }
 0x1c7   : > { %v8685_v39 = vpop.f32.mrb[32].mxu0 }
 0x1c8   : > { %v8687_v42 = vpop.f32.mrb[33].mxu0  ;;  %v1117_v0 = vsel %vm559_vm1, %v8685_v39, -inf }
 0x1c9   : > { %v8689_v43 = vpop.f32.mrb[34].mxu0  ;;  %v1111_v44 = vsel %vm559_vm1, %v8687_v42, -inf }
 0x1ca   : > { %1112 = vmax.xlane.f32.xlu0 %v1111_v44  ;;  %v8693_v59 = vpop.f32.mrb[35].mxu0  ;;  %v1120_v9 = vsel %vm559_vm1, %v8689_v43, -inf }
 0x1cb   : > { %v1114_v63 = vsel %vm559_vm1, %v8693_v59, -inf }
 0x1cc   : > { %1115 = vmax.xlane.f32.xlu1 %v1114_v63 }
 0x1ce   : > { %1118 = vmax.xlane.f32.xlu0 %v1117_v0 }
 0x1cf   : > { %v8699_v2 = vpop.f32.mrb[36].mxu0 }
 0x1d0   : > { %v8701_v3 = vpop.f32.mrb[37].mxu0  ;;  %v1129_v18 = vsel %vm559_vm1, %v8699_v2, -inf }
 0x1d1   : > { %v8703_v4 = vpop.f32.mrb[38].mxu0  ;;  %v1123_v11 = vsel %vm559_vm1, %v8701_v3, -inf }
 0x1d2   : > { %1121 = vmax.xlane.f32.xlu0 %v1120_v9  ;;  %1124 = vmax.xlane.f32.xlu1 %v1123_v11  ;;  %v8709_v12 = vpop.f32.mrb[39].mxu0  ;;  %v1132_v63 = vsel %vm559_vm1, %v8703_v4, -inf }
 0x1d3   : > { %v1126_v21 = vsel %vm559_vm1, %v8709_v12, -inf }
 0x1d6   : > { %1130 = vmax.xlane.f32.xlu1 %v1129_v18  ;;  %1127 = vmax.xlane.f32.xlu0 %v1126_v21 }
 0x1d8   : > { %v8715_v22 = vpop.f32.mrb[40].mxu0 }
 0x1d9   : > { %v8717_v44 = vpop.f32.mrb[41].mxu0  ;;  %v1141_v21 = vsel %vm559_vm1, %v8715_v22, -inf }
 0x1da   : > { %v8721_v0 = vpop.f32.mrb[42].mxu0  ;;  %1133 = vmax.xlane.f32.xlu0 %v1132_v63  ;;  %v1135_v9 = vsel %vm559_vm1, %v8717_v44, -inf }
 0x1db   : > { %1136 = vmax.xlane.f32.xlu1 %v1135_v9  ;;  %v8725_v11 = vpop.f32.mrb[43].mxu0  ;;  %v1144_v63 = vsel %vm559_vm1, %v8721_v0, -inf }
 0x1dc   : > { %v1138_v18 = vsel %vm559_vm1, %v8725_v11, -inf }
 0x1de   : > { %1139 = vmax.xlane.f32.xlu0 %v1138_v18 }
 0x1df   : > { %1142 = vmax.xlane.f32.xlu1 %v1141_v21 }
 0x1e0   : > { %v8731_v29 = vpop.f32.mrb[44].mxu0 }
 0x1e1   : > { %v8733_v38 = vpop.f32.mrb[45].mxu0  ;;  %v1153_v21 = vsel %vm559_vm1, %v8731_v29, -inf }
 0x1e2   : > { %v8737_v32 = vpop.f32.mrb[46].mxu0  ;;  %1145 = vmax.xlane.f32.xlu0 %v1144_v63  ;;  %v1147_v9 = vsel %vm559_vm1, %v8733_v38, -inf }
 0x1e3   : > { %1148 = vmax.xlane.f32.xlu1 %v1147_v9  ;;  %v8741_v20 = vpop.f32.mrb[47].mxu0  ;;  %v1156_v63 = vsel %vm559_vm1, %v8737_v32, -inf }
 0x1e4   : > { %v1150_v18 = vsel %vm559_vm1, %v8741_v20, -inf }
 0x1e6   : > { %1151 = vmax.xlane.f32.xlu0 %v1150_v18 }
 0x1e7   : > { %1154 = vmax.xlane.f32.xlu1 %v1153_v21 }
 0x1e8   : > { %v8747_v10 = vpop.f32.mrb[48].mxu0 }
 0x1e9   : > { %v8749_v60 = vpop.f32.mrb[49].mxu0  ;;  %v1165_v21 = vsel %vm559_vm1, %v8747_v10, -inf }
 0x1ea   : > { %v8753_v13 = vpop.f32.mrb[50].mxu0  ;;  %1157 = vmax.xlane.f32.xlu0 %v1156_v63  ;;  %v1159_v9 = vsel %vm559_vm1, %v8749_v60, -inf }
 0x1eb   : > { %1160 = vmax.xlane.f32.xlu1 %v1159_v9  ;;  %v8757_v1 = vpop.f32.mrb[51].mxu0  ;;  %v1168_v63 = vsel %vm559_vm1, %v8753_v13, -inf }
 0x1ec   : > { %v1162_v18 = vsel %vm559_vm1, %v8757_v1, -inf }
 0x1ee   : > { %1163 = vmax.xlane.f32.xlu0 %v1162_v18 }
 0x1ef   : > { %1166 = vmax.xlane.f32.xlu1 %v1165_v21 }
 0x1f0   : > { %v8763_v61 = vpop.f32.mrb[52].mxu0 }
 0x1f1   : > { %v8765_v19 = vpop.f32.mrb[53].mxu0  ;;  %v1177_v21 = vsel %vm559_vm1, %v8763_v61, -inf }
 0x1f2   : > { %v8769_v58 = vpop.f32.mrb[54].mxu0  ;;  %1169 = vmax.xlane.f32.xlu0 %v1168_v63  ;;  %v1171_v9 = vsel %vm559_vm1, %v8765_v19, -inf }
 0x1f3   : > { %1172 = vmax.xlane.f32.xlu1 %v1171_v9  ;;  %v8773_v23 = vpop.f32.mrb[55].mxu0  ;;  %v1180_v63 = vsel %vm559_vm1, %v8769_v58, -inf }
 0x1f4   : > { %v1174_v18 = vsel %vm559_vm1, %v8773_v23, -inf }
 0x1f6   : > { %1175 = vmax.xlane.f32.xlu0 %v1174_v18 }
 0x1f7   : > { %1178 = vmax.xlane.f32.xlu1 %v1177_v21 }
 0x1f8   : > { %v8779_v41 = vpop.f32.mrb[56].mxu0 }
 0x1f9   : > { %v8781_v57 = vpop.f32.mrb[57].mxu0  ;;  %v1189_v21 = vsel %vm559_vm1, %v8779_v41, -inf }
 0x1fa   : > { %v8785_v40 = vpop.f32.mrb[58].mxu0  ;;  %1181 = vmax.xlane.f32.xlu0 %v1180_v63  ;;  %v1183_v9 = vsel %vm559_vm1, %v8781_v57, -inf }
 0x1fb   : > { %1184 = vmax.xlane.f32.xlu1 %v1183_v9  ;;  %v8789_v62 = vpop.f32.mrb[59].mxu0  ;;  %v1192_v63 = vsel %vm559_vm1, %v8785_v40, -inf }
 0x1fc   : > { %v1186_v18 = vsel %vm559_vm1, %v8789_v62, -inf }
 0x1fe   : > { %1187 = vmax.xlane.f32.xlu0 %v1186_v18 }
 0x1ff   : > { %1190 = vmax.xlane.f32.xlu1 %v1189_v21 }
 0x200   : > { %v8795_v30 = vpop.f32.mrb[60].mxu0 }
 0x201   : > { %v8797_v28 = vpop.f32.mrb[61].mxu0  ;;  %v1201_v21 = vsel %vm559_vm1, %v8795_v30, -inf }
 0x202   : > { %v8801_v36 = vpop.f32.mrb[62].mxu0  ;;  %1193 = vmax.xlane.f32.xlu0 %v1192_v63  ;;  %v1195_v9 = vsel %vm559_vm1, %v8797_v28, -inf }
 0x203   : > { %1196 = vmax.xlane.f32.xlu1 %v1195_v9  ;;  %v8805_v31 = vpop.f32.mrb[63].mxu0  ;;  %v1204_v46 = vsel %vm559_vm1, %v8801_v36, -inf }
 0x204   : > { %v1198_v18 = vsel %vm559_vm1, %v8805_v31, -inf }
 0x206   : > { %1199 = vmax.xlane.f32.xlu0 %v1198_v18 }
 0x207   : > { %1202 = vmax.xlane.f32.xlu1 %v1201_v21 }
 0x20a   : > { %1205 = vmax.xlane.f32.xlu0 %v1204_v46 }
 0x23d   : > { %v8813_v45 = vpop.f32.mrb[64].mxu0 }
 0x23e   : > { %v8815_v63 = vpop.f32.mrb[65].mxu0  ;;  %v1726_v9 = vsel %vm559_vm1, %v8813_v45, -inf }
 0x23f   : > { %1727 = vmax.xlane.f32.xlu1 %v1726_v9  ;;  %v8819_v56 = vpop.f32.mrb[66].mxu0  ;;  %v1720_v21 = vsel %vm559_vm1, %v8815_v63, -inf }
 0x240   : > { %v8821_v47 = vpop.f32.mrb[67].mxu0  ;;  %v1729_v18 = vsel %vm559_vm1, %v8819_v56, -inf }
 0x241   : > { %1730 = vmax.xlane.f32.xlu0 %v1729_v18  ;;  %v1723_v46 = vsel %vm559_vm1, %v8821_v47, -inf }
 0x243   : > { %1721 = vmax.xlane.f32.xlu1 %v1720_v21 }
 0x245   : > { %v8829_v15 = vpop.f32.mrb[68].mxu0  ;;  %1724 = vmax.xlane.f32.xlu0 %v1723_v46 }
 0x246   : > { %v8831_v14 = vpop.f32.mrb[69].mxu0  ;;  %v1738_v9 = vsel %vm559_vm1, %v8829_v15, -inf }
 0x247   : > { %1739 = vmax.xlane.f32.xlu1 %v1738_v9  ;;  %v8835_v17 = vpop.f32.mrb[70].mxu0  ;;  %v1732_v21 = vsel %vm559_vm1, %v8831_v14, -inf }
 0x248   : > { %v8837_v16 = vpop.f32.mrb[71].mxu0  ;;  %v1741_v18 = vsel %vm559_vm1, %v8835_v17, -inf }
 0x249   : > { %1742 = vmax.xlane.f32.xlu0 %v1741_v18  ;;  %v1735_v46 = vsel %vm559_vm1, %v8837_v16, -inf }
 0x24b   : > { %1733 = vmax.xlane.f32.xlu1 %v1732_v21 }
 0x24d   : > { %v8845_v25 = vpop.f32.mrb[72].mxu0  ;;  %1736 = vmax.xlane.f32.xlu0 %v1735_v46 }
 0x24e   : > { %v8847_v24 = vpop.f32.mrb[73].mxu0 }
 0x24f   : > { %v8849_v9 = vpop.f32.mrb[74].mxu0  ;;  %v1744_v49 = vsel %vm559_vm1, %v8847_v24, -inf }
 0x250   : > { %1745 = vmax.xlane.f32.xlu1 %v1744_v49  ;;  %v8853_v48 = vpop.f32.mrb[75].mxu0 }
 0x251   : > { %11648 = vst [vmem:[#allocation50_spill] sm:$0xff] %v8853_v48  ;;  %v1747_v18 = vsel %vm559_vm1, %v8853_v48, -inf }
 0x252   : > { %1748 = vmax.xlane.f32.xlu0 %v1747_v18 }
 0x255   : > { %v8857_v21 = vpop.f32.mrb[76].mxu0 }
 0x256   : > { %v8859_v27 = vpop.f32.mrb[77].mxu0 }
 0x257   : > { %v1113_v26 = vpop.xlane.xlu0 %1112  ;;  %v8861_v46 = vpop.f32.mrb[78].mxu0 }
 0x258   : > { %v8863_v35 = vpop.f32.mrb[79].mxu0  ;;  %v1207_v34 = vsub.f32 %v8687_v42, %v1113_v26 }
 0x259   : > { %v1116_v6 = vpop.xlane.xlu1 %1115 }
 0x25a   : > { %v1239_v8 = vmul.f32 1.442695, %v1207_v34  ;;  %v1208_v18 = vsub.f32 %v8693_v59, %v1116_v6 }
 0x25b   : > { %v1119_v5 = vpop.xlane.xlu0 %1118 }
 0x25c   : > { %v1209_v49 = vsub.f32 %v8685_v39, %v1119_v5  ;;  %v1241_v34 = vmul.f32 1.442695, %v1208_v18 }
 0x25d   : > { %v8867_v7 = vpop.f32.mrb[80].mxu0 }
 0x25e   : > { %v1243_v51 = vmul.f32 1.442695, %v1209_v49  ;;  %v8870_v55 = vpop.f32.mrb[81].mxu0 }
 0x25f   : > { %v1122_v53 = vpop.xlane.xlu0 %1121  ;;  %v1125_v52 = vpop.xlane.xlu1 %1124 }
 0x260   : > { %7955 = vpow2.f32 %v1243_v51  ;;  %v1210_v33 = vsub.f32 %v8689_v43, %v1122_v53  ;;  %v8873_v37 = vpop.f32.mrb[82].mxu0  ;;  %v1211_v26 = vsub.f32 %v8701_v3, %v1125_v52 }
 0x261   : > { %7957 = vpow2.f32 %v1239_v8  ;;  %v8876_v42 = vpop.f32.mrb[83].mxu0 }
 0x262   : > { %v1245_v5 = vmul.f32 1.442695, %v1210_v33  ;;  %v1247_v59 = vmul.f32 1.442695, %v1211_v26 }
 0x263   : > { %v1131_v39 = vpop.xlane.xlu1 %1130  ;;  %v1128_v54 = vpop.xlane.xlu0 %1127 }
 0x264   : > { %7959 = vpow2.f32 %v1245_v5  ;;  %v1213_v6 = vsub.f32 %v8699_v2, %v1131_v39  ;;  %v1212_v53 = vsub.f32 %v8709_v12, %v1128_v54 }
 0x265   : > { %v8879_v49 = vpop.f32.mrb[84].mxu0  ;;  %7961 = vpow2.f32 %v1241_v34 }
 0x266   : > { %v1251_v51 = vmul.f32 1.442695, %v1213_v6  ;;  %v8882_v43 = vpop.f32.mrb[85].mxu0  ;;  %v1249_v26 = vmul.f32 1.442695, %v1212_v53 }
 0x267   : > { %v1134_v8 = vpop.xlane.xlu0 %1133  ;;  %v8884_v52 = vpop.f32.mrb[86].mxu0 }
 0x268   : > { %11649 = vst [vmem:[#allocation51_spill] sm:$0xff] %v8884_v52  ;;  %7963 = vpow2.f32 %v1251_v51  ;;  %v1214_v33 = vsub.f32 %v8703_v4, %v1134_v8  ;;  %v1137_v3 = vpop.xlane.xlu1 %1136  ;;  %v8887_v18 = vpop.f32.mrb[87].mxu0 }
 0x269   : > { %7965 = vpow2.f32 %v1247_v59  ;;  %v1215_v54 = vsub.f32 %v8717_v44, %v1137_v3 }
 0x26a   : > { %v8889_v2 = vpop.eup %7955  ;;  %v1253_v5 = vmul.f32 1.442695, %v1214_v33 }
 0x26b   : > { %11650 = vst [vmem:[#allocation52_spill] sm:$0xff] %v8889_v2  ;;  %v8891_v34 = vpop.eup %7957  ;;  %v1140_v12 = vpop.xlane.xlu0 %1139  ;;  %v1309_v39 = vsel %vm559_vm1, %v8889_v2, 0.0  ;;  %v1255_v33 = vmul.f32 1.442695, %v1215_v54 }
 0x26c   : > { %11651 = vst [vmem:[#allocation53_spill] sm:$0xff] %v8891_v34  ;;  %7967 = vpow2.f32 %v1253_v5  ;;  %v1143_v6 = vpop.xlane.xlu1 %1142  ;;  %1310 = vadd.xlane.f32.xlu1 %v1309_v39  ;;  %v1216_v53 = vsub.f32 %v8725_v11, %v1140_v12  ;;  %v1303_v44 = vsel %vm559_vm1, %v8891_v34, 0.0 }
 0x26d   : > { %v1217_v4 = vsub.f32 %v8715_v22, %v1143_v6  ;;  %v8897_v51 = vpop.f32.mrb[88].mxu0  ;;  %7969 = vpow2.f32 %v1249_v26 }
 0x26e   : > { %11652 = vst [vmem:[#allocation54_spill] sm:$0xff] %v8897_v51  ;;  %v8899_v59 = vpop.eup %7959  ;;  %v8902_v8 = vpop.f32.mrb[89].mxu0  ;;  %v1257_v54 = vmul.f32 1.442695, %v1216_v53 }
 0x26f   : > { %11653 = vst [vmem:[#allocation55_spill] sm:$0xff] %v8899_v59  ;;  %11654 = vst [vmem:[#allocation56_spill] sm:$0xff] %v8902_v8  ;;  %v1259_v3 = vmul.f32 1.442695, %v1217_v4  ;;  %v1146_v50 = vpop.xlane.xlu0 %1145  ;;  %v8906_v5 = vpop.f32.mrb[90].mxu0  ;;  %v1312_v22 = vsel %vm559_vm1, %v8899_v59, 0.0 }
 0x270   : > { %11655 = vst [vmem:[#allocation57_spill] sm:$0xff] %v8906_v5  ;;  %v8910_v39 = vpop.eup %7961  ;;  %v1218_v6 = vsub.f32 %v8721_v0, %v1146_v50  ;;  %v1149_v26 = vpop.xlane.xlu1 %1148  ;;  %1304 = vadd.xlane.f32.xlu1 %v1303_v44  ;;  %1313 = vadd.xlane.f32.xlu0 %v1312_v22 }
 0x271   : > { %11656 = vst [vmem:[#allocation58_spill] sm:$0xff] %v8910_v39  ;;  %v8913_v11 = vpop.f32.mrb[91].mxu0  ;;  %7971 = vpow2.f32 %v1259_v3  ;;  %v1219_v34 = vsub.f32 %v8733_v38, %v1149_v26  ;;  %v1306_v50 = vsel %vm559_vm1, %v8910_v39, 0.0 }
 0x272   : > { %11657 = vst [vmem:[#allocation59_spill] sm:$0xff] %v8913_v11  ;;  %v8915_v12 = vpop.eup %7963  ;;  %v1261_v4 = vmul.f32 1.442695, %v1218_v6  ;;  %7973 = vpow2.f32 %v1255_v33 }
 0x273   : > { %11658 = vst [vmem:[#allocation60_spill] sm:$0xff] %v8915_v12  ;;  %v8917_v2 = vpop.eup %7965  ;;  %v1152_v59 = vpop.xlane.xlu0 %1151  ;;  %v1321_v48 = vsel %vm559_vm1, %v8915_v12, 0.0  ;;  %v1263_v6 = vmul.f32 1.442695, %v1219_v34 }
 0x274   : > { %11659 = vst [vmem:[#allocation61_spill] sm:$0xff] %v8917_v2  ;;  %7975 = vpow2.f32 %v1261_v4  ;;  %v1155_v0 = vpop.xlane.xlu1 %1154  ;;  %1322 = vadd.xlane.f32.xlu1 %v1321_v48  ;;  %1307 = vadd.xlane.f32.xlu0 %v1306_v50  ;;  %v1220_v38 = vsub.f32 %v8741_v20, %v1152_v59  ;;  %v1315_v22 = vsel %vm559_vm1, %v8917_v2, 0.0 }
 0x275   : > { %v1221_v44 = vsub.f32 %v8731_v29, %v1155_v0  ;;  %v8925_v53 = vpop.f32.mrb[92].mxu0  ;;  %7977 = vpow2.f32 %v1257_v54 }
 0x276   : > { %v8927_v3 = vpop.eup %7967  ;;  %v8930_v33 = vpop.f32.mrb[93].mxu0  ;;  %v1265_v59 = vmul.f32 1.442695, %v1220_v38 }
 0x277   : > { %11660 = vst [vmem:[#allocation62_spill] sm:$0xff] %v8927_v3  ;;  %11661 = vst [vmem:[#allocation63_spill] sm:$0xff] %v8930_v33  ;;  %v1267_v26 = vmul.f32 1.442695, %v1221_v44  ;;  %v1158_v4 = vpop.xlane.xlu0 %1157  ;;  %v8934_v12 = vpop.f32.mrb[94].mxu0  ;;  %v1324_v29 = vsel %vm559_vm1, %v8927_v3, 0.0 }
 0x278   : > { %v8938_v48 = vpop.eup %7969  ;;  %v1222_v50 = vsub.f32 %v8737_v32, %v1158_v4  ;;  %v1161_v54 = vpop.xlane.xlu1 %1160  ;;  %1316 = vadd.xlane.f32.xlu1 %v1315_v22  ;;  %1325 = vadd.xlane.f32.xlu0 %v1324_v29 }
 0x279   : > { %v8941_v20 = vpop.f32.mrb[95].mxu0  ;;  %7979 = vpow2.f32 %v1267_v26  ;;  %v1223_v44 = vsub.f32 %v8749_v60, %v1161_v54  ;;  %v1318_v3 = vsel %vm559_vm1, %v8938_v48, 0.0 }
 0x27a   : > { %v1269_v0 = vmul.f32 1.442695, %v1222_v50  ;;  %7981 = vpow2.f32 %v1263_v6 }
 0x27b   : > { %v8943_v34 = vpop.eup %7971  ;;  %v1164_v2 = vpop.xlane.xlu0 %1163  ;;  %v1271_v6 = vmul.f32 1.442695, %v1223_v44 }
 0x27c   : > { %7983 = vpow2.f32 %v1269_v0  ;;  %v1167_v39 = vpop.xlane.xlu1 %1166  ;;  %v1333_v32 = vsel %vm559_vm1, %v8943_v34, 0.0  ;;  %1319 = vadd.xlane.f32.xlu0 %v1318_v3  ;;  %v8950_v22 = vpop.eup %7973  ;;  %v1224_v60 = vsub.f32 %v8757_v1, %v1164_v2 }
 0x27d   : > { %v1225_v38 = vsub.f32 %v8747_v10, %v1167_v39  ;;  %1334 = vadd.xlane.f32.xlu1 %v1333_v32  ;;  %7985 = vpow2.f32 %v1265_v59  ;;  %v1327_v10 = vsel %vm559_vm1, %v8950_v22, 0.0 }
 0x27e   : > { %v8953_v26 = vpop.eup %7975  ;;  %v1273_v39 = vmul.f32 1.442695, %v1224_v60 }
 0x27f   : > { %v1275_v4 = vmul.f32 1.442695, %v1225_v38  ;;  %v1170_v29 = vpop.xlane.xlu0 %1169  ;;  %v1336_v50 = vsel %vm559_vm1, %v8953_v26, 0.0  ;;  %v8958_v54 = vpop.eup %7977 }
 0x280   : > { %v1226_v3 = vsub.f32 %v8753_v13, %v1170_v29  ;;  %v1173_v0 = vpop.xlane.xlu1 %1172  ;;  %1337 = vadd.xlane.f32.xlu0 %v1336_v50  ;;  %v1330_v32 = vsel %vm559_vm1, %v8958_v54, 0.0 }
 0x281   : > { %7987 = vpow2.f32 %v1275_v4  ;;  %1328 = vadd.xlane.f32.xlu1 %v1327_v10  ;;  %v1227_v2 = vsub.f32 %v8765_v19, %v1173_v0 }
 0x282   : > { %v1277_v59 = vmul.f32 1.442695, %v1226_v3  ;;  %7989 = vpow2.f32 %v1271_v6 }
 0x283   : > { %v8963_v1 = vpop.eup %7979  ;;  %v1176_v44 = vpop.xlane.xlu0 %1175  ;;  %v1279_v6 = vmul.f32 1.442695, %v1227_v2 }
 0x284   : > { %7991 = vpow2.f32 %v1277_v59  ;;  %v1179_v13 = vpop.xlane.xlu1 %1178  ;;  %v1345_v38 = vsel %vm559_vm1, %v8963_v1, 0.0  ;;  %1331 = vadd.xlane.f32.xlu0 %v1330_v32  ;;  %v8970_v29 = vpop.eup %7981  ;;  %v1228_v19 = vsub.f32 %v8773_v23, %v1176_v44 }
 0x285   : > { %v1229_v60 = vsub.f32 %v8763_v61, %v1179_v13  ;;  %1346 = vadd.xlane.f32.xlu1 %v1345_v38  ;;  %7993 = vpow2.f32 %v1273_v39  ;;  %v1339_v61 = vsel %vm559_vm1, %v8970_v29, 0.0 }
 0x286   : > { %v8973_v4 = vpop.eup %7983  ;;  %v1281_v39 = vmul.f32 1.442695, %v1228_v19 }
 0x287   : > { %v1283_v50 = vmul.f32 1.442695, %v1229_v60  ;;  %v1182_v3 = vpop.xlane.xlu0 %1181  ;;  %v1348_v0 = vsel %vm559_vm1, %v8973_v4, 0.0  ;;  %v8978_v10 = vpop.eup %7985 }
 0x288   : > { %v1230_v59 = vsub.f32 %v8769_v58, %v1182_v3  ;;  %v1185_v32 = vpop.xlane.xlu1 %1184  ;;  %1349 = vadd.xlane.f32.xlu0 %v1348_v0  ;;  %v1342_v38 = vsel %vm559_vm1, %v8978_v10, 0.0 }
 0x289   : > { %7995 = vpow2.f32 %v1283_v50  ;;  %1340 = vadd.xlane.f32.xlu1 %v1339_v61  ;;  %v1231_v2 = vsub.f32 %v8781_v57, %v1185_v32 }
 0x28a   : > { %v1285_v13 = vmul.f32 1.442695, %v1230_v59  ;;  %7997 = vpow2.f32 %v1279_v6  ;;  %v2072_v6 = vld [vmem:[%s11363_s5] sm:$0xf] }
 0x28b   : > { %v8983_v23 = vpop.eup %7987  ;;  %v1188_v44 = vpop.xlane.xlu0 %1187  ;;  %v1287_v0 = vmul.f32 1.442695, %v1231_v2  ;;  %7544 = vmatprep.subr.msk.bf16.mxu1 %vm608_vm0, %v2072_v6  ;;  %7545 = vmatprep.subr.msk.bf16.mxu0 %vm608_vm0, %v2072_v6 }
 0x28c   : > { %7999 = vpow2.f32 %v1285_v13  ;;  %v1191_v58 = vpop.xlane.xlu1 %1190  ;;  %v1357_v60 = vsel %vm559_vm1, %v8983_v23, 0.0  ;;  %1343 = vadd.xlane.f32.xlu0 %v1342_v38  ;;  %v8990_v3 = vpop.eup %7989  ;;  %v1232_v57 = vsub.f32 %v8789_v62, %v1188_v44 }
 0x28d   : > { %v1233_v19 = vsub.f32 %v8779_v41, %v1191_v58  ;;  %1358 = vadd.xlane.f32.xlu1 %v1357_v60  ;;  %8001 = vpow2.f32 %v1281_v39  ;;  %v9003_v41 = vsel %vm608_vm0, %v2072_v6, 0  ;;  %v1351_v2 = vsel %vm559_vm1, %v8990_v3, 0.0 }
 0x28e   : > { %v8993_v50 = vpop.eup %7991  ;;  %11662 = vst [vmem:[#allocation64_spill] sm:$0xff] %v9003_v41  ;;  %7006 = vmatpush3.bf16.msra.mxu1 %v9003_v41  ;;  %7040 = vmatpush3.bf16.msra.mxu0 %v9003_v41  ;;  %v1289_v44 = vmul.f32 1.442695, %v1232_v57 }
 0x28f   : > { %v1291_v59 = vmul.f32 1.442695, %v1233_v19  ;;  %v1194_v32 = vpop.xlane.xlu0 %1193  ;;  %v1360_v61 = vsel %vm559_vm1, %v8993_v50, 0.0  ;;  %v9006_v39 = vpop.eup %7993  ;;  %7546 = vmatprep.subr.msk.bf16.mxu0 %vm608_vm0, %v2072_v6  ;;  %7547 = vmatprep.subr.msk.bf16.mxu1 %vm608_vm0, %v2072_v6 }
 0x290   : > { %v1234_v62 = vsub.f32 %v8785_v40, %v1194_v32  ;;  %v1197_v13 = vpop.xlane.xlu1 %1196  ;;  %1361 = vadd.xlane.f32.xlu0 %v1360_v61  ;;  %v1354_v19 = vsel %vm559_vm1, %v9006_v39, 0.0 }
 0x291   : > { %8003 = vpow2.f32 %v1291_v59  ;;  %1352 = vadd.xlane.f32.xlu1 %v1351_v2  ;;  %v1235_v40 = vsub.f32 %v8797_v28, %v1197_v13 }
 0x292   : > { %v1293_v38 = vmul.f32 1.442695, %v1234_v62  ;;  %8005 = vpow2.f32 %v1287_v0 }
 0x293   : > { %v9015_v58 = vpop.eup %7995  ;;  %v1200_v60 = vpop.xlane.xlu0 %1199  ;;  %v1295_v0 = vmul.f32 1.442695, %v1235_v40 }
 0x294   : > { %11663 = vst [vmem:[#allocation65_spill] sm:$0xff] %v9015_v58  ;;  %8007 = vpow2.f32 %v1293_v38  ;;  %v1203_v59 = vpop.xlane.xlu1 %1202  ;;  %v1369_v32 = vsel %vm559_vm1, %v9015_v58, 0.0  ;;  %1355 = vadd.xlane.f32.xlu0 %v1354_v19  ;;  %v9022_v57 = vpop.eup %7997  ;;  %v1236_v28 = vsub.f32 %v8805_v31, %v1200_v60 }
 0x295   : > { %v1237_v61 = vsub.f32 %v8795_v30, %v1203_v59  ;;  %1370 = vadd.xlane.f32.xlu1 %v1369_v32  ;;  %8009 = vpow2.f32 %v1289_v44  ;;  %v1363_v58 = vsel %vm559_vm1, %v9022_v57, 0.0 }
 0x296   : > { %v9025_v6 = vpop.eup %7999  ;;  %v1297_v30 = vmul.f32 1.442695, %v1236_v28 }
 0x297   : > { %v1299_v62 = vmul.f32 1.442695, %v1237_v61  ;;  %v1206_v13 = vpop.xlane.xlu0 %1205  ;;  %v1372_v2 = vsel %vm559_vm1, %v9025_v6, 0.0  ;;  %v9030_v38 = vpop.eup %8001 }
 0x298   : > { %v1238_v19 = vsub.f32 %v8801_v36, %v1206_v13  ;;  %1373 = vadd.xlane.f32.xlu0 %v1372_v2  ;;  %v1366_v31 = vsel %vm559_vm1, %v9030_v38, 0.0 }
 0x299   : > { %8011 = vpow2.f32 %v1299_v62  ;;  %1364 = vadd.xlane.f32.xlu1 %v1363_v58 }
 0x29a   : > { %v1301_v44 = vmul.f32 1.442695, %v1238_v19  ;;  %8013 = vpow2.f32 %v1295_v0 }
 0x29b   : > { %v9035_v59 = vpop.eup %8003 }
 0x29c   : > { %8015 = vpow2.f32 %v1301_v44  ;;  %v1381_v40 = vsel %vm559_vm1, %v9035_v59, 0.0  ;;  %1367 = vadd.xlane.f32.xlu0 %v1366_v31  ;;  %v9041_v36 = vpop.eup %8005 }
 0x29d   : > { %1382 = vadd.xlane.f32.xlu1 %v1381_v40  ;;  %8017 = vpow2.f32 %v1297_v30  ;;  %v1375_v61 = vsel %vm559_vm1, %v9041_v36, 0.0  ;;  %v1750_v40 = vsel %vm559_vm1, %v8845_v25, -inf }
 0x29e   : > { %v9043_v60 = vpop.eup %8007 }
 0x29f   : > { %v1384_v58 = vsel %vm559_vm1, %v9043_v60, 0.0  ;;  %v9047_v32 = vpop.eup %8009 }
 0x2a0   : > { %1385 = vadd.xlane.f32.xlu0 %v1384_v58  ;;  %v1378_v0 = vsel %vm559_vm1, %v9047_v32, 0.0  ;;  %v1753_v58 = vsel %vm559_vm1, %v8849_v9, -inf }
 0x2a1   : > { %1376 = vadd.xlane.f32.xlu1 %v1375_v61  ;;  %v1756_v61 = vsel %vm559_vm1, %v8859_v27, -inf }
 0x2a3   : > { %v9051_v28 = vpop.eup %8011 }
 0x2a4   : > { %v1393_v62 = vsel %vm559_vm1, %v9051_v28, 0.0  ;;  %1379 = vadd.xlane.f32.xlu0 %v1378_v0  ;;  %v9057_v13 = vpop.eup %8013  ;;  %v1759_v0 = vsel %vm559_vm1, %v8863_v35, -inf }
 0x2a5   : > { %1394 = vadd.xlane.f32.xlu1 %v1393_v62  ;;  %v1387_v44 = vsel %vm559_vm1, %v9057_v13, 0.0  ;;  %v1762_v62 = vsel %vm559_vm1, %v8857_v21, -inf }
 0x2a6   : > { %v9059_v2 = vpop.eup %8015 }
 0x2a7   : > { %v1396_v19 = vsel %vm559_vm1, %v9059_v2, 0.0  ;;  %v9063_v30 = vpop.eup %8017 }
 0x2a8   : > { %1397 = vadd.xlane.f32.xlu0 %v1396_v19  ;;  %v1390_v31 = vsel %vm559_vm1, %v9063_v30, 0.0  ;;  %v1765_v19 = vsel %vm559_vm1, %v8861_v46, -inf }
 0x2a9   : > { %1388 = vadd.xlane.f32.xlu1 %v1387_v44  ;;  %v1768_v44 = vsel %vm559_vm1, %v8870_v55, -inf }
 0x2ac   : > { %1391 = vadd.xlane.f32.xlu0 %v1390_v31  ;;  %v1771_v31 = vsel %vm559_vm1, %v8876_v42, -inf }
 0x2ad   : > { %1751 = vmax.xlane.f32.xlu1 %v1750_v40  ;;  %v1774_v40 = vsel %vm559_vm1, %v8867_v7, -inf }
 0x2b0   : > { %1754 = vmax.xlane.f32.xlu0 %v1753_v58  ;;  %v1777_v58 = vsel %vm559_vm1, %v8873_v37, -inf }
 0x2b1   : > { %1757 = vmax.xlane.f32.xlu1 %v1756_v61  ;;  %v1780_v61 = vsel %vm559_vm1, %v8882_v43, -inf }
 0x2b4   : > { %1760 = vmax.xlane.f32.xlu0 %v1759_v0  ;;  %v1783_v0 = vsel %vm559_vm1, %v8887_v18, -inf }
 0x2b5   : > { %1763 = vmax.xlane.f32.xlu1 %v1762_v62  ;;  %v1786_v62 = vsel %vm559_vm1, %v8879_v49, -inf }
 0x2b8   : > { %1766 = vmax.xlane.f32.xlu0 %v1765_v19  ;;  %v1789_v19 = vsel %vm559_vm1, %v8884_v52, -inf }
 0x2b9   : > { %1769 = vmax.xlane.f32.xlu1 %v1768_v44  ;;  %v1792_v44 = vsel %vm559_vm1, %v8902_v8, -inf }
 0x2bc   : > { %1772 = vmax.xlane.f32.xlu0 %v1771_v31  ;;  %v1795_v31 = vsel %vm559_vm1, %v8913_v11, -inf }
 0x2bd   : > { %1775 = vmax.xlane.f32.xlu1 %v1774_v40 }
 0x2c0   : > { %1778 = vmax.xlane.f32.xlu0 %v1777_v58  ;;  %v1798_v58 = vsel %vm559_vm1, %v8897_v51, -inf }
 0x2c1   : > { %1781 = vmax.xlane.f32.xlu1 %v1780_v61 }
 0x2c4   : > { %1784 = vmax.xlane.f32.xlu0 %v1783_v0 }
 0x2c5   : > { %1787 = vmax.xlane.f32.xlu1 %v1786_v62  ;;  %v1801_v62 = vsel %vm559_vm1, %v8906_v5, -inf  ;;  %v1810_v5 = vsel %vm559_vm1, %v8925_v53, -inf }
 0x2c8   : > { %1790 = vmax.xlane.f32.xlu0 %v1789_v19  ;;  %v1804_v19 = vsel %vm559_vm1, %v8930_v33, -inf }
 0x2c9   : > { %1793 = vmax.xlane.f32.xlu1 %v1792_v44 }
 0x2cc   : > { %v1728_v40 = vpop.xlane.xlu1 %1727  ;;  %1796 = vmax.xlane.f32.xlu0 %v1795_v31 }
 0x2cd   : > { %1799 = vmax.xlane.f32.xlu1 %v1798_v58  ;;  %v1818_v61 = vsub.f32 %v8813_v45, %v1728_v40  ;;  %v1807_v45 = vsel %vm559_vm1, %v8941_v20, -inf }
 0x2ce   : > { %v1731_v0 = vpop.xlane.xlu0 %1730 }
 0x2cf   : > { %v1819_v44 = vsub.f32 %v8819_v56, %v1731_v0  ;;  %v1852_v8 = vmul.f32 1.442695, %v1818_v61 }
 0x2d0   : > { %v1722_v52 = vpop.xlane.xlu1 %1721  ;;  %1802 = vmax.xlane.f32.xlu0 %v1801_v62 }
 0x2d1   : > { %v1816_v11 = vsub.f32 %v8815_v63, %v1722_v52  ;;  %1805 = vmax.xlane.f32.xlu1 %v1804_v19  ;;  %v1854_v33 = vmul.f32 1.442695, %v1819_v44 }
 0x2d2   : > { %v1725_v51 = vpop.xlane.xlu0 %1724 }
 0x2d3   : > { %v1848_v31 = vmul.f32 1.442695, %v1816_v11  ;;  %v1817_v58 = vsub.f32 %v8821_v47, %v1725_v51  ;;  %v1813_v47 = vsel %vm559_vm1, %v8934_v12, -inf }
 0x2d4   : > { %v1740_v40 = vpop.xlane.xlu1 %1739  ;;  %1808 = vmax.xlane.f32.xlu0 %v1807_v45 }
 0x2d5   : > { %8019 = vpow2.f32 %v1848_v31  ;;  %v1850_v62 = vmul.f32 1.442695, %v1817_v58  ;;  %1811 = vmax.xlane.f32.xlu1 %v1810_v5  ;;  %v1822_v56 = vsub.f32 %v8829_v15, %v1740_v40 }
 0x2d6   : > { %8021 = vpow2.f32 %v1852_v8  ;;  %v1743_v63 = vpop.xlane.xlu0 %1742 }
 0x2d7   : > { %8023 = vpow2.f32 %v1850_v62  ;;  %v1823_v51 = vsub.f32 %v8835_v17, %v1743_v63  ;;  %v1860_v61 = vmul.f32 1.442695, %v1822_v56 }
 0x2d8   : > { %v1734_v52 = vpop.xlane.xlu1 %1733  ;;  %1814 = vmax.xlane.f32.xlu0 %v1813_v47  ;;  %8025 = vpow2.f32 %v1854_v33 }
 0x2d9   : > { %v1820_v11 = vsub.f32 %v8831_v14, %v1734_v52  ;;  %v1862_v8 = vmul.f32 1.442695, %v1823_v51  ;;  %v11664_v14 = vld [vmem:[#allocation50_spill] sm:$0xff] }
 0x2da   : > { %v1737_v0 = vpop.xlane.xlu0 %1736 }
 0x2db   : > { %v1856_v19 = vmul.f32 1.442695, %v1820_v11  ;;  %v1821_v5 = vsub.f32 %v8837_v16, %v1737_v0 }
 0x2dd   : > { %8027 = vpow2.f32 %v1856_v19  ;;  %v1858_v15 = vmul.f32 1.442695, %v1821_v5  ;;  %v1746_v44 = vpop.xlane.xlu1 %1745 }
 0x2de   : > { %8029 = vpow2.f32 %v1860_v61  ;;  %v1824_v31 = vsub.f32 %v8847_v24, %v1746_v44 }
 0x2df   : > { %v9122_v58 = vpop.eup %8019  ;;  %8031 = vpow2.f32 %v1858_v15  ;;  %v1749_v33 = vpop.xlane.xlu0 %1748 }
 0x2e0   : > { %v9124_v45 = vpop.eup %8021  ;;  %v1864_v17 = vmul.f32 1.442695, %v1824_v31  ;;  %v1825_v40 = vsub.f32 %v11664_v14, %v1749_v33  ;;  %v1912_v62 = vsel %vm559_vm1, %v9122_v58, 0.0  ;;  %8033 = vpow2.f32 %v1862_v8 }
 0x2e1   : > { %v9129_v16 = vpop.eup %8023  ;;  %1913 = vadd.xlane.f32.xlu1 %v1912_v62  ;;  %v1918_v47 = vsel %vm559_vm1, %v9124_v45, 0.0 }
 0x2e2   : > { %v1866_v56 = vmul.f32 1.442695, %v1825_v40  ;;  %v1915_v24 = vsel %vm559_vm1, %v9129_v16, 0.0  ;;  %v9133_v63 = vpop.eup %8025  ;;  %8035 = vpow2.f32 %v1864_v17 }
 0x2e3   : > { %1916 = vadd.xlane.f32.xlu0 %v1915_v24  ;;  %v1921_v52 = vsel %vm559_vm1, %v9133_v63, 0.0 }
 0x2e4   : > { %8037 = vpow2.f32 %v1866_v56 }
 0x2e5   : > { %1919 = vadd.xlane.f32.xlu1 %v1918_v47  ;;  %v8301_v47 = vmov 6  }
 0x2e6   : > { %7563 = vset.pattern.permute.xlu1 %v8301_v47  ;;  %7569 = vset.pattern.permute.xlu0 %v8301_v47  ;;  %v11675_v47 = vld [vmem:[#allocation58_spill] sm:$0xff] }
 0x2e7   : > { %v9139_v51 = vpop.eup %8027  ;;  %1922 = vadd.xlane.f32.xlu0 %v1921_v52 }
 0x2e8   : > { %11665 = vst [vmem:[#allocation50_spill] sm:$0xff] %v9139_v51  ;;  %v9141_v11 = vpop.eup %8029  ;;  %v1924_v61 = vsel %vm559_vm1, %v9139_v51, 0.0 }
 0x2e9   : > { %11666 = vst [vmem:[#allocation66_spill] sm:$0xff] %v9141_v11  ;;  %v9145_v0 = vpop.eup %8031  ;;  %1925 = vadd.xlane.f32.xlu1 %v1924_v61  ;;  %v1930_v8 = vsel %vm559_vm1, %v9141_v11, 0.0 }
 0x2ea   : > { %11667 = vst [vmem:[#allocation67_spill] sm:$0xff] %v9145_v0  ;;  %v1927_v19 = vsel %vm559_vm1, %v9145_v0, 0.0  ;;  %v9149_v5 = vpop.eup %8033 }
 0x2eb   : > { %11668 = vst [vmem:[#allocation68_spill] sm:$0xff] %v9149_v5  ;;  %1928 = vadd.xlane.f32.xlu0 %v1927_v19  ;;  %v1933_v44 = vsel %vm559_vm1, %v9149_v5, 0.0 }
 0x2ec   : > { %v9153_v15 = vpop.eup %8035 }
 0x2ed   : > { %11669 = vst [vmem:[#allocation69_spill] sm:$0xff] %v9153_v15  ;;  %1931 = vadd.xlane.f32.xlu1 %v1930_v8  ;;  %v1936_v33 = vsel %vm559_vm1, %v9153_v15, 0.0 }
 0x2ee   : > { %v9157_v31 = vpop.eup %8037 }
 0x2ef   : > { %11670 = vst [vmem:[#allocation70_spill] sm:$0xff] %v9157_v31  ;;  %1934 = vadd.xlane.f32.xlu0 %v1933_v44  ;;  %v1939_v17 = vsel %vm559_vm1, %v9157_v31, 0.0  ;;  %v11671_v31 = vld [vmem:[#allocation55_spill] sm:$0xff] }
 0x2f1   : > { %1937 = vadd.xlane.f32.xlu1 %v1936_v33 }
 0x2f3   : > { %1940 = vadd.xlane.f32.xlu0 %v1939_v17 }
 0x2f9   : > { %v1311_v14 = vpop.xlane.xlu1 %1310 }
 0x2fd   : > { %v1305_v40 = vpop.xlane.xlu1 %1304  ;;  %v1314_v62 = vpop.xlane.xlu0 %1313 }
 0x2fe   : > { %8039 = vrcp.f32 %v1314_v62 }
 0x2ff   : > { %8041 = vrcp.f32 %v1305_v40 }
 0x300   : > { %8043 = vrcp.f32 %v1311_v14 }
 0x301   : > { %v1323_v56 = vpop.xlane.xlu1 %1322  ;;  %v1308_v24 = vpop.xlane.xlu0 %1307 }
 0x302   : > { %8045 = vrcp.f32 %v1308_v24  ;;  %v11673_v24 = vld [vmem:[#allocation53_spill] sm:$0xff] }
 0x305   : > { %v1317_v52 = vpop.xlane.xlu1 %1316  ;;  %v1326_v61 = vpop.xlane.xlu0 %1325 }
 0x306   : > { %8047 = vrcp.f32 %v1317_v52 }
 0x307   : > { %8049 = vrcp.f32 %v1326_v61 }
 0x308   : > { %8051 = vrcp.f32 %v1323_v56  ;;  %v8040_v8 = vpop.eup %8039  ;;  %v11677_v56 = vld [vmem:[#allocation52_spill] sm:$0xff] }
 0x309   : > { %v1320_v19 = vpop.xlane.xlu0 %1319  ;;  %v8042_v33 = vpop.eup %8041  ;;  %v9164_v15 = vmul.f32 %v8040_v8, %v11671_v31 }
 0x30a   : > { %v1335_v44 = vpop.xlane.xlu1 %1334  ;;  %8053 = vrcp.f32 %v1320_v19  ;;  %v8044_v17 = vpop.eup %8043  ;;  %v9167_v5 = vmul.f32 %v8042_v33, %v11673_v24 }
 0x30b   : > { %11672 = vst [vmem:[#allocation55_spill] sm:$0xff] %v9164_v15  ;;  %v9173_v52 = vmul.f32 %v8044_v17, %v11677_v56 }
 0x30c   : > { %v8046_v62 = vpop.eup %8045  ;;  %11674 = vst [vmem:[#allocation53_spill] sm:$0xff] %v9167_v5 }
 0x30d   : > { %v1338_v40 = vpop.xlane.xlu0 %1337  ;;  %v9170_v11 = vmul.f32 %v8046_v62, %v11675_v47  ;;  %11678 = vst [vmem:[#allocation52_spill] sm:$0xff] %v9173_v52  ;;  %v2074_v31 = vpack.c.bf16 %v9164_v15, %v9173_v52  ;;  %v11682_v47 = vld [vmem:[#allocation62_spill] sm:$0xff]  ;;  %v8302_v52 = vmov 7  }
 0x30e   : > { %v1329_v14 = vpop.xlane.xlu1 %1328  ;;  %8055 = vrcp.f32 %v1338_v40 }
 0x30f   : > { %11676 = vst [vmem:[#allocation58_spill] sm:$0xff] %v9170_v11  ;;  %8057 = vrcp.f32 %v1329_v14  ;;  %v2073_v61 = vpack.c.bf16 %v9170_v11, %v9167_v5  ;;  %v11679_v14 = vld [vmem:[#allocation61_spill] sm:$0xff] }
 0x310   : > { %v8048_v19 = vpop.eup %8047  ;;  %8059 = vrcp.f32 %v1335_v44 }
 0x311   : > { %v1332_v0 = vpop.xlane.xlu0 %1331  ;;  %v8050_v8 = vpop.eup %8049  ;;  %7007 = vmatprep.mubr.msk.bf16.mxu1 %vm559_vm1, %v2073_v61  ;;  %v9183_v24 = vmul.f32 %v8048_v19, %v11679_v14  ;;  %v11684_v61 = vld [vmem:[#allocation60_spill] sm:$0xff] }
 0x312   : > { %v1347_v33 = vpop.xlane.xlu1 %1346  ;;  %8061 = vrcp.f32 %v1332_v0  ;;  %v8052_v62 = vpop.eup %8051  ;;  %7008 = vmatmul.mubr.msk.bf16.vlgmr.msra.gmra.mrb[0].mxu1 %vm559_vm1, %v2074_v31  ;;  %v9189_v56 = vmul.f32 %v8050_v8, %v11682_v47 }
 0x313   : > { %7414 = vmatpush3.bf16.msra.mxu1 %v9003_v41  ;;  %11680 = vst [vmem:[#allocation61_spill] sm:$0xff] %v9183_v24  ;;  %v9194_v31 = vmul.f32 %v8052_v62, %v11684_v61 }
 0x314   : > { %v8054_v17 = vpop.eup %8053  ;;  %11683 = vst [vmem:[#allocation62_spill] sm:$0xff] %v9189_v56 }
 0x315   : > { %v1350_v40 = vpop.xlane.xlu0 %1349  ;;  %v9186_v44 = vmul.f32 %v8054_v17, %v8938_v48  ;;  %11685 = vst [vmem:[#allocation60_spill] sm:$0xff] %v9194_v31  ;;  %v2076_v48 = vpack.c.bf16 %v9189_v56, %v9194_v31  ;;  %v11721_v31 = vld [vmem:[#allocation68_spill] sm:$0xff] }
 0x316   : > { %v1341_v51 = vpop.xlane.xlu1 %1340  ;;  %8063 = vrcp.f32 %v1350_v40 }
 0x317   : > { %11681 = vst [vmem:[#allocation71_spill] sm:$0xff] %v9186_v44  ;;  %v2075_v0 = vpack.c.bf16 %v9186_v44, %v9183_v24  ;;  %8065 = vrcp.f32 %v1341_v51  ;;  %v8281_v44 = vld [vmem:[%s8389_s23 + $0x50] sm:$0xff]  }
 0x318   : > { %v8056_v41 = vpop.eup %8055  ;;  %8067 = vrcp.f32 %v1347_v33 }
 0x319   : > { %7011 = vmatprep.mubr.msk.bf16.mxu1 %vm559_vm1, %v2075_v0  ;;  %v1344_v19 = vpop.xlane.xlu0 %1343  ;;  %v8058_v17 = vpop.eup %8057  ;;  %v9207_v33 = vmul.f32 %v8056_v41, %v8953_v26 }
 0x31a   : > { %v1359_v8 = vpop.xlane.xlu1 %1358  ;;  %8069 = vrcp.f32 %v1344_v19  ;;  %v8060_v14 = vpop.eup %8059  ;;  %7012 = vmatmul.mubr.msk.bf16.gmra.mrb[4].mxu1 %vm559_vm1, %v2076_v48  ;;  %v9201_v62 = vmul.f32 %v8058_v17, %v8950_v22 }
 0x31b   : > { %8071 = vrcp.f32 %v1359_v8  ;;  %11688 = vst [vmem:[#allocation74_spill] sm:$0xff] %v9207_v33  ;;  %v9212_v19 = vmul.f32 %v8060_v14, %v8943_v34 }
 0x31c   : > { %v8062_v40 = vpop.eup %8061  ;;  %11686 = vst [vmem:[#allocation72_spill] sm:$0xff] %v9201_v62 }
 0x31d   : > { %v1362_v47 = vpop.xlane.xlu0 %1361  ;;  %v9204_v51 = vmul.f32 %v8062_v40, %v8958_v54  ;;  %11689 = vst [vmem:[#allocation75_spill] sm:$0xff] %v9212_v19  ;;  %v2078_v54 = vpack.c.bf16 %v9207_v33, %v9212_v19 }
 0x31e   : > { %v1353_v0 = vpop.xlane.xlu1 %1352  ;;  %8073 = vrcp.f32 %v1362_v47 }
 0x31f   : > { %11687 = vst [vmem:[#allocation73_spill] sm:$0xff] %v9204_v51  ;;  %8075 = vrcp.f32 %v1353_v0  ;;  %v2077_v61 = vpack.c.bf16 %v9204_v51, %v9201_v62  ;;  %v11718_v62 = vld [vmem:[#allocation67_spill] sm:$0xff] }
 0x320   : > { %v8064_v48 = vpop.eup %8063 }
 0x321   : > { %7015 = vmatprep.mubr.msk.bf16.mxu1 %vm559_vm1, %v2077_v61  ;;  %v1356_v22 = vpop.xlane.xlu0 %1355  ;;  %v8066_v17 = vpop.eup %8065  ;;  %v9225_v0 = vmul.f32 %v8064_v48, %v8973_v4 }
 0x322   : > { %v1371_v8 = vpop.xlane.xlu1 %1370  ;;  %8077 = vrcp.f32 %v1356_v22  ;;  %v8068_v26 = vpop.eup %8067  ;;  %7016 = vmatmul.mubr.msk.bf16.gmra.mrb[8].mxu1 %vm559_vm1, %v2078_v54  ;;  %v9219_v34 = vmul.f32 %v8066_v17, %v8970_v29 }
 0x323   : > { %8079 = vrcp.f32 %v1371_v8  ;;  %11692 = vst [vmem:[#allocation78_spill] sm:$0xff] %v9225_v0  ;;  %v9233_v8 = vmul.f32 %v8068_v26, %v8963_v1 }
 0x324   : > { %v8070_v41 = vpop.eup %8069  ;;  %11690 = vst [vmem:[#allocation76_spill] sm:$0xff] %v9219_v34 }
 0x325   : > { %v8072_v40 = vpop.eup %8071  ;;  %v1374_v47 = vpop.xlane.xlu0 %1373  ;;  %v9222_v14 = vmul.f32 %v8070_v41, %v8978_v10  ;;  %11694 = vst [vmem:[#allocation80_spill] sm:$0xff] %v9233_v8  ;;  %v2080_v48 = vpack.c.bf16 %v9225_v0, %v9233_v8 }
 0x326   : > { %v1365_v61 = vpop.xlane.xlu1 %1364  ;;  %8081 = vrcp.f32 %v1374_v47  ;;  %v9228_v22 = vmul.f32 %v8072_v40, %v8983_v23 }
 0x327   : > { %11691 = vst [vmem:[#allocation77_spill] sm:$0xff] %v9222_v14  ;;  %8083 = vrcp.f32 %v1365_v61  ;;  %v2079_v54 = vpack.c.bf16 %v9222_v14, %v9219_v34 }
 0x328   : > { %11693 = vst [vmem:[#allocation79_spill] sm:$0xff] %v9228_v22  ;;  %v8074_v29 = vpop.eup %8073 }
 0x329   : > { %v8076_v17 = vpop.eup %8075  ;;  %7019 = vmatprep.mubr.msk.bf16.mxu1 %vm559_vm1, %v2079_v54  ;;  %v1368_v4 = vpop.xlane.xlu0 %1367  ;;  %v9241_v23 = vmul.f32 %v8074_v29, %v8993_v50 }
 0x32a   : > { %v1383_v41 = vpop.xlane.xlu1 %1382  ;;  %8085 = vrcp.f32 %v1368_v4  ;;  %v9244_v40 = vmul.f32 %v8076_v17, %v8990_v3  ;;  %7020 = vmatmul.mubr.msk.bf16.gmra.mrb[12].mxu1 %vm559_vm1, %v2080_v48  ;;  %v11698_v4 = vld [vmem:[#allocation65_spill] sm:$0xff] }
 0x32b   : > { %11695 = vst [vmem:[#allocation81_spill] sm:$0xff] %v9241_v23  ;;  %8087 = vrcp.f32 %v1383_v41 }
 0x32c   : > { %11696 = vst [vmem:[#allocation82_spill] sm:$0xff] %v9244_v40  ;;  %v8078_v26 = vpop.eup %8077 }
 0x32d   : > { %v8080_v61 = vpop.eup %8079  ;;  %v1386_v54 = vpop.xlane.xlu0 %1385  ;;  %v9252_v50 = vmul.f32 %v8078_v26, %v9006_v39  ;;  %v2082_v26 = vpack.c.bf16 %v9241_v23, %v9228_v22 }
 0x32e   : > { %v1377_v29 = vpop.xlane.xlu1 %1376  ;;  %8089 = vrcp.f32 %v1386_v54  ;;  %v9255_v3 = vmul.f32 %v8080_v61, %v11698_v4 }
 0x32f   : > { %11697 = vst [vmem:[#allocation83_spill] sm:$0xff] %v9252_v50  ;;  %8091 = vrcp.f32 %v1377_v29  ;;  %v2081_v17 = vpack.c.bf16 %v9252_v50, %v9244_v40  ;;  %v11734_v50 = vld [vmem:[#allocation5_spill] sm:$0xff] }
 0x330   : > { %11699 = vst [vmem:[#allocation65_spill] sm:$0xff] %v9255_v3  ;;  %v8082_v41 = vpop.eup %8081 }
 0x331   : > { %v8084_v10 = vpop.eup %8083  ;;  %7023 = vmatprep.mubr.msk.bf16.mxu1 %vm559_vm1, %v2081_v17  ;;  %v1380_v39 = vpop.xlane.xlu0 %1379  ;;  %v9267_v61 = vmul.f32 %v8082_v41, %v9025_v6 }
 0x332   : > { %v1395_v54 = vpop.xlane.xlu1 %1394  ;;  %8093 = vrcp.f32 %v1380_v39  ;;  %v9270_v29 = vmul.f32 %v8084_v10, %v9022_v57  ;;  %7024 = vmatmul.mubr.msk.bf16.gmra.mrb[16].mxu1 %vm559_vm1, %v2082_v26 }
 0x333   : > { %11700 = vst [vmem:[#allocation84_spill] sm:$0xff] %v9267_v61  ;;  %8095 = vrcp.f32 %v1395_v54 }
 0x334   : > { %11701 = vst [vmem:[#allocation85_spill] sm:$0xff] %v9270_v29  ;;  %v8086_v1 = vpop.eup %8085 }
 0x335   : > { %v8088_v48 = vpop.eup %8087  ;;  %v1398_v47 = vpop.xlane.xlu0 %1397  ;;  %v9278_v6 = vmul.f32 %v8086_v1, %v9030_v38  ;;  %v2084_v1 = vpack.c.bf16 %v9267_v61, %v9255_v3  ;;  %v11719_v61 = vld [vmem:[#allocation64_spill] sm:$0xff] }
 0x336   : > { %v1389_v41 = vpop.xlane.xlu1 %1388  ;;  %8097 = vrcp.f32 %v1398_v47  ;;  %v9281_v57 = vmul.f32 %v8088_v48, %v9035_v59 }
 0x337   : > { %11702 = vst [vmem:[#allocation86_spill] sm:$0xff] %v9278_v6  ;;  %8099 = vrcp.f32 %v1389_v41  ;;  %v2083_v10 = vpack.c.bf16 %v9278_v6, %v9270_v29  ;;  %v460_v6 = vunpack.c.h.bf16 %v8281_v44 }
 0x338   : > { %11703 = vst [vmem:[#allocation87_spill] sm:$0xff] %v9281_v57  ;;  %v8090_v26 = vpop.eup %8089 }
 0x339   : > { %v8092_v4 = vpop.eup %8091  ;;  %7027 = vmatprep.mubr.msk.bf16.mxu1 %vm559_vm1, %v2083_v10  ;;  %v1392_v38 = vpop.xlane.xlu0 %1391  ;;  %v9293_v59 = vmul.f32 %v8090_v26, %v9043_v60 }
 0x33a   : > { %v1752_v47 = vpop.xlane.xlu1 %1751  ;;  %8101 = vrcp.f32 %v1392_v38  ;;  %v9296_v48 = vmul.f32 %v8092_v4, %v9041_v36  ;;  %7028 = vmatmul.mubr.msk.bf16.gmra.mrb[20].mxu1 %vm559_vm1, %v2084_v1 }
 0x33b   : > { %11704 = vst [vmem:[#allocation88_spill] sm:$0xff] %v9293_v59  ;;  %v1826_v41 = vsub.f32 %v8845_v25, %v1752_v47 }
 0x33c   : > { %11705 = vst [vmem:[#allocation89_spill] sm:$0xff] %v9296_v48  ;;  %v8094_v10 = vpop.eup %8093 }
 0x33d   : > { %v8096_v17 = vpop.eup %8095  ;;  %v1868_v19 = vmul.f32 1.442695, %v1826_v41  ;;  %v1755_v60 = vpop.xlane.xlu0 %1754  ;;  %v9305_v26 = vmul.f32 %v8094_v10, %v9047_v32  ;;  %v11713_v32 = vld [vmem:[#allocation59_spill] sm:$0xff] }
 0x33e   : > { %v1758_v38 = vpop.xlane.xlu1 %1757  ;;  %v1827_v36 = vsub.f32 %v8849_v9, %v1755_v60  ;;  %v9309_v25 = vmul.f32 %v8096_v17, %v9051_v28  ;;  %v2086_v28 = vpack.c.bf16 %v9293_v59, %v9281_v57 }
 0x33f   : > { %11706 = vst [vmem:[#allocation90_spill] sm:$0xff] %v9305_v26  ;;  %8103 = vpow2.f32 %v1868_v19  ;;  %v1828_v4 = vsub.f32 %v8859_v27, %v1758_v38  ;;  %v2085_v1 = vpack.c.bf16 %v9305_v26, %v9296_v48 }
 0x340   : > { %11707 = vst [vmem:[#allocation91_spill] sm:$0xff] %v9309_v25  ;;  %v8098_v41 = vpop.eup %8097  ;;  %v1870_v54 = vmul.f32 1.442695, %v1827_v36 }
 0x341   : > { %v8100_v10 = vpop.eup %8099  ;;  %v1872_v39 = vmul.f32 1.442695, %v1828_v4  ;;  %7031 = vmatprep.mubr.msk.bf16.mxu1 %vm559_vm1, %v2085_v1  ;;  %v1761_v9 = vpop.xlane.xlu0 %1760  ;;  %v9322_v27 = vmul.f32 %v8098_v41, %v9059_v2 }
 0x342   : > { %8105 = vpow2.f32 %v1870_v54  ;;  %v1764_v19 = vpop.xlane.xlu1 %1763  ;;  %v1829_v17 = vsub.f32 %v8863_v35, %v1761_v9  ;;  %v9326_v60 = vmul.f32 %v8100_v10, %v9057_v13  ;;  %7032 = vmatmul.mubr.msk.bf16.gmra.mrb[24].mxu1 %vm559_vm1, %v2086_v28  ;;  %v9404_v9 = vld [vmem:[%s8403_s28 + $0x70] sm:$0xff]  }
 0x343   : > { %11708 = vst [vmem:[#allocation92_spill] sm:$0xff] %v9322_v27  ;;  %8107 = vpow2.f32 %v1872_v39  ;;  %v1830_v38 = vsub.f32 %v8857_v21, %v1764_v19 }
 0x344   : > { %11709 = vst [vmem:[#allocation93_spill] sm:$0xff] %v9326_v60  ;;  %v8102_v4 = vpop.eup %8101  ;;  %v1874_v1 = vmul.f32 1.442695, %v1829_v17 }
 0x345   : > { %v1876_v54 = vmul.f32 1.442695, %v1830_v38  ;;  %v1767_v41 = vpop.xlane.xlu0 %1766  ;;  %v9335_v35 = vmul.f32 %v8102_v4, %v9063_v30  ;;  %v2088_v38 = vpack.c.bf16 %v9322_v27, %v9309_v25 }
 0x346   : > { %8109 = vpow2.f32 %v1874_v1  ;;  %v1770_v13 = vpop.xlane.xlu1 %1769  ;;  %v1831_v21 = vsub.f32 %v8861_v46, %v1767_v41  ;;  %v9352_v1 = vld [vmem:[%s8403_s28 + $0x60] sm:$0xff]  }
 0x347   : > { %11710 = vst [vmem:[#allocation94_spill] sm:$0xff] %v9335_v35  ;;  %8111 = vpow2.f32 %v1876_v54  ;;  %v1832_v39 = vsub.f32 %v8870_v55, %v1770_v13  ;;  %v2087_v10 = vpack.c.bf16 %v9335_v35, %v9326_v60  ;;  %v8275_v60 = vld [vmem:[%s8389_s23] sm:$0xff]  }
 0x348   : > { %v1878_v28 = vmul.f32 1.442695, %v1831_v21  ;;  %v439_v33 = vunpack.c.l.bf16 %v8275_v60 }
 0x349   : > { %v9343_v19 = vpop.eup %8103  ;;  %v1880_v17 = vmul.f32 1.442695, %v1832_v39  ;;  %7035 = vmatprep.mubr.msk.bf16.mxu1 %vm559_vm1, %v2087_v10  ;;  %v1773_v30 = vpop.xlane.xlu0 %1772 }
 0x34a   : > { %8113 = vpow2.f32 %v1878_v28  ;;  %v1776_v46 = vpop.xlane.xlu1 %1775  ;;  %v1833_v55 = vsub.f32 %v8876_v42, %v1773_v30  ;;  %v1942_v4 = vsel %vm559_vm1, %v9343_v19, 0.0  ;;  %7036 = vmatmul.mubr.msk.bf16.gmra.mrb[28].mxu1 %vm559_vm1, %v2088_v38 }
 0x34b   : > { %8115 = vpow2.f32 %v1880_v17  ;;  %v1834_v54 = vsub.f32 %v8867_v7, %v1776_v46  ;;  %1943 = vadd.xlane.f32.xlu1 %v1942_v4  ;;  %7099 = vmatprep.mubr.msk.bf16.mxu1 %vm559_vm1, %v9352_v1 }
 0x34c   : > { %v9356_v41 = vpop.eup %8105  ;;  %v1882_v13 = vmul.f32 1.442695, %v1833_v55 }
 0x34d   : > { %v9360_v21 = vpop.eup %8107  ;;  %v1884_v42 = vmul.f32 1.442695, %v1834_v54  ;;  %v1779_v39 = vpop.xlane.xlu0 %1778  ;;  %v1945_v10 = vsel %vm559_vm1, %v9356_v41, 0.0 }
 0x34e   : > { %8117 = vpow2.f32 %v1882_v13  ;;  %v1782_v28 = vpop.xlane.xlu1 %1781  ;;  %v1835_v7 = vsub.f32 %v8873_v37, %v1779_v39  ;;  %v1948_v17 = vsel %vm559_vm1, %v9360_v21, 0.0  ;;  %1946 = vadd.xlane.f32.xlu0 %v1945_v10 }
 0x34f   : > { %8119 = vpow2.f32 %v1884_v42  ;;  %v1836_v30 = vsub.f32 %v8882_v43, %v1782_v28  ;;  %1949 = vadd.xlane.f32.xlu1 %v1948_v17 }
 0x350   : > { %v9368_v38 = vpop.eup %8109  ;;  %v1886_v46 = vmul.f32 1.442695, %v1835_v7 }
 0x351   : > { %v9370_v55 = vpop.eup %8111  ;;  %v1888_v4 = vmul.f32 1.442695, %v1836_v30  ;;  %v1785_v54 = vpop.xlane.xlu0 %1784  ;;  %v1951_v13 = vsel %vm559_vm1, %v9368_v38, 0.0 }
 0x352   : > { %8121 = vpow2.f32 %v1886_v46  ;;  %v1788_v37 = vpop.xlane.xlu1 %1787  ;;  %v1837_v39 = vsub.f32 %v8887_v18, %v1785_v54  ;;  %v1954_v42 = vsel %vm559_vm1, %v9370_v55, 0.0  ;;  %1952 = vadd.xlane.f32.xlu0 %v1951_v13  ;;  %v11711_v54 = vld [vmem:[#allocation51_spill] sm:$0xff] }
 0x353   : > { %8123 = vpow2.f32 %v1888_v4  ;;  %v1838_v43 = vsub.f32 %v8879_v49, %v1788_v37  ;;  %1955 = vadd.xlane.f32.xlu1 %v1954_v42  ;;  %v11712_v49 = vld [vmem:[#allocation56_spill] sm:$0xff] }
 0x354   : > { %v9378_v10 = vpop.eup %8113  ;;  %v1890_v28 = vmul.f32 1.442695, %v1837_v39 }
 0x355   : > { %v9380_v7 = vpop.eup %8115  ;;  %v1892_v17 = vmul.f32 1.442695, %v1838_v43  ;;  %v1791_v30 = vpop.xlane.xlu0 %1790  ;;  %v1957_v46 = vsel %vm559_vm1, %v9378_v10, 0.0 }
 0x356   : > { %8125 = vpow2.f32 %v1890_v28  ;;  %v1794_v18 = vpop.xlane.xlu1 %1793  ;;  %v1839_v36 = vsub.f32 %v11711_v54, %v1791_v30  ;;  %v1960_v4 = vsel %vm559_vm1, %v9380_v7, 0.0  ;;  %1958 = vadd.xlane.f32.xlu0 %v1957_v46 }
 0x357   : > { %8127 = vpow2.f32 %v1892_v17  ;;  %v1840_v13 = vsub.f32 %v11712_v49, %v1794_v18  ;;  %1961 = vadd.xlane.f32.xlu1 %v1960_v4  ;;  %v11714_v18 = vld [vmem:[#allocation54_spill] sm:$0xff] }
 0x358   : > { %v9388_v37 = vpop.eup %8117  ;;  %v1894_v39 = vmul.f32 1.442695, %v1839_v36  ;;  %v9399_v36 = vld [vmem:[%s8403_s28 + $0x68] sm:$0xff]  }
 0x359   : > { %v9390_v42 = vpop.eup %8119  ;;  %v1896_v43 = vmul.f32 1.442695, %v1840_v13  ;;  %v1797_v28 = vpop.xlane.xlu0 %1796  ;;  %v1963_v30 = vsel %vm559_vm1, %v9388_v37, 0.0  ;;  %7100 = vmatmul.mubr.msk.bf16.vlgmr.msra.gmra.mrb[32].mxu1 %vm559_vm1, %v9399_v36 }
 0x35a   : > { %8129 = vpow2.f32 %v1894_v39  ;;  %v1800_v54 = vpop.xlane.xlu1 %1799  ;;  %v1841_v46 = vsub.f32 %v11713_v32, %v1797_v28  ;;  %v1966_v17 = vsel %vm559_vm1, %v9390_v42, 0.0  ;;  %1964 = vadd.xlane.f32.xlu0 %v1963_v30  ;;  %v11715_v28 = vld [vmem:[#allocation57_spill] sm:$0xff]  ;;  %7103 = vmatprep.mubr.msk.bf16.mxu1 %vm559_vm1, %v9404_v9 }
 0x35b   : > { %8131 = vpow2.f32 %v1896_v43  ;;  %v1842_v4 = vsub.f32 %v11714_v18, %v1800_v54  ;;  %1967 = vadd.xlane.f32.xlu1 %v1966_v17 }
 0x35c   : > { %v9401_v49 = vpop.eup %8121  ;;  %v1898_v13 = vmul.f32 1.442695, %v1841_v46  ;;  %v11716_v46 = vld [vmem:[#allocation63_spill] sm:$0xff] }
 0x35d   : > { %v9406_v2 = vpop.eup %8123  ;;  %v1900_v39 = vmul.f32 1.442695, %v1842_v4  ;;  %v1803_v47 = vpop.xlane.xlu0 %1802  ;;  %v1969_v32 = vsel %vm559_vm1, %v9401_v49, 0.0 }
 0x35e   : > { %8133 = vpow2.f32 %v1898_v13  ;;  %v1806_v43 = vpop.xlane.xlu1 %1805  ;;  %v1843_v30 = vsub.f32 %v11715_v28, %v1803_v47  ;;  %v1972_v54 = vsel %vm559_vm1, %v9406_v2, 0.0  ;;  %1970 = vadd.xlane.f32.xlu0 %v1969_v32 }
 0x35f   : > { %8135 = vpow2.f32 %v1900_v39  ;;  %v1844_v17 = vsub.f32 %v11716_v46, %v1806_v43  ;;  %1973 = vadd.xlane.f32.xlu1 %v1972_v54 }
 0x360   : > { %v9418_v18 = vpop.eup %8125  ;;  %v1902_v4 = vmul.f32 1.442695, %v1843_v30  ;;  %v9429_v30 = vld [vmem:[%s8403_s28 + $0x78] sm:$0xff]  }
 0x361   : > { %v9420_v0 = vpop.eup %8127  ;;  %v1904_v13 = vmul.f32 1.442695, %v1844_v17  ;;  %v1809_v27 = vpop.xlane.xlu0 %1808  ;;  %v1975_v47 = vsel %vm559_vm1, %v9418_v18, 0.0  ;;  %7104 = vmatmul.mubr.msk.bf16.gmra.mrb[36].mxu1 %vm559_vm1, %v9429_v30 }
 0x362   : > { %8137 = vpow2.f32 %v1902_v4  ;;  %v1812_v32 = vpop.xlane.xlu1 %1811  ;;  %v1845_v28 = vsub.f32 %v8941_v20, %v1809_v27  ;;  %v1978_v39 = vsel %vm559_vm1, %v9420_v0, 0.0  ;;  %1976 = vadd.xlane.f32.xlu0 %v1975_v47 }
 0x363   : > { %8139 = vpow2.f32 %v1904_v13  ;;  %v1846_v43 = vsub.f32 %v8925_v53, %v1812_v32  ;;  %1979 = vadd.xlane.f32.xlu1 %v1978_v39 }
 0x364   : > { %v9431_v54 = vpop.eup %8129  ;;  %v1906_v46 = vmul.f32 1.442695, %v1845_v28 }
 0x365   : > { %v9433_v17 = vpop.eup %8131  ;;  %v1908_v8 = vmul.f32 1.442695, %v1846_v43  ;;  %v1815_v4 = vpop.xlane.xlu0 %1814  ;;  %v1981_v20 = vsel %vm559_vm1, %v9431_v54, 0.0 }
 0x366   : > { %8141 = vpow2.f32 %v1906_v46  ;;  %v1847_v27 = vsub.f32 %v8934_v12, %v1815_v4  ;;  %v1984_v53 = vsel %vm559_vm1, %v9433_v17, 0.0  ;;  %1982 = vadd.xlane.f32.xlu0 %v1981_v20 }
 0x367   : > { %8143 = vpow2.f32 %v1908_v8  ;;  %1985 = vadd.xlane.f32.xlu1 %v1984_v53 }
 0x368   : > { %v9442_v13 = vpop.eup %8133  ;;  %v1910_v47 = vmul.f32 1.442695, %v1847_v27 }
 0x369   : > { %v9444_v32 = vpop.eup %8135  ;;  %v1987_v28 = vsel %vm559_vm1, %v9442_v13, 0.0 }
 0x36a   : > { %8145 = vpow2.f32 %v1910_v47  ;;  %v1990_v39 = vsel %vm559_vm1, %v9444_v32, 0.0  ;;  %1988 = vadd.xlane.f32.xlu0 %v1987_v28 }
 0x36b   : > { %1991 = vadd.xlane.f32.xlu1 %v1990_v39 }
 0x36c   : > { %v9450_v12 = vpop.eup %8137 }
 0x36d   : > { %v9452_v43 = vpop.eup %8139  ;;  %v1993_v8 = vsel %vm559_vm1, %v9450_v12, 0.0 }
 0x36e   : > { %v1996_v46 = vsel %vm559_vm1, %v9452_v43, 0.0  ;;  %v1914_v4 = vpop.xlane.xlu1 %1913  ;;  %1994 = vadd.xlane.f32.xlu0 %v1993_v8 }
 0x36f   : > { %1997 = vadd.xlane.f32.xlu1 %v1996_v46  ;;  %8147 = vrcp.f32 %v1914_v4 }
 0x370   : > { %v9458_v20 = vpop.eup %8141  ;;  %v1917_v27 = vpop.xlane.xlu0 %1916 }
 0x371   : > { %v9460_v53 = vpop.eup %8143  ;;  %8149 = vrcp.f32 %v1917_v27  ;;  %v1999_v47 = vsel %vm559_vm1, %v9458_v20, 0.0 }
 0x372   : > { %v2002_v28 = vsel %vm559_vm1, %v9460_v53, 0.0  ;;  %v1920_v39 = vpop.xlane.xlu1 %1919  ;;  %2000 = vadd.xlane.f32.xlu0 %v1999_v47  ;;  %v440_v47 = vunpack.c.h.bf16 %v8275_v60 }
 0x373   : > { %2003 = vadd.xlane.f32.xlu1 %v2002_v28  ;;  %8151 = vrcp.f32 %v1920_v39 }
 0x374   : > { %v9466_v8 = vpop.eup %8145  ;;  %v1923_v46 = vpop.xlane.xlu0 %1922  ;;  %v9479_v57 = vpack.i.bf16 %v440_v47, %v439_v33  ;;  %v7915_v33 = vld [vmem:[%s11364_s6 + $0x40] sm:$0xff]  }
 0x375   : > { %8153 = vrcp.f32 %v1923_v46  ;;  %v2005_v4 = vsel %vm559_vm1, %v9466_v8, 0.0  ;;  %7141 = vmatprep.subr.bf16.mxu1 %v7915_v33 }
 0x376   : > { %v1926_v25 = vpop.xlane.xlu1 %1925  ;;  %2006 = vadd.xlane.f32.xlu0 %v2005_v4  ;;  %7142 = vmatpush3.bf16.msra.mxu1 %v7915_v33 }
 0x377   : > { %8155 = vrcp.f32 %v1926_v25 }
 0x378   : > { %v1929_v27 = vpop.xlane.xlu0 %1928 }
 0x379   : > { %v8148_v14 = vpop.eup %8147  ;;  %8157 = vrcp.f32 %v1929_v27 }
 0x37a   : > { %v1932_v35 = vpop.xlane.xlu1 %1931  ;;  %v9472_v39 = vmul.f32 %v8148_v14, %v9122_v58 }
 0x37b   : > { %v8150_v34 = vpop.eup %8149  ;;  %8159 = vrcp.f32 %v1932_v35 }
 0x37c   : > { %v1935_v28 = vpop.xlane.xlu0 %1934  ;;  %v9475_v46 = vmul.f32 %v8150_v34, %v9129_v16  ;;  %v8276_v34 = vld [vmem:[%s8389_s23 + $0x10] sm:$0xff]  }
 0x37d   : > { %v8152_v59 = vpop.eup %8151  ;;  %8161 = vrcp.f32 %v1935_v28  ;;  %v443_v14 = vunpack.c.l.bf16 %v8276_v34  ;;  %v444_v35 = vunpack.c.h.bf16 %v8276_v34  ;;  %v11717_v34 = vld [vmem:[#allocation50_spill] sm:$0xff] }
 0x37e   : > { %v1938_v25 = vpop.xlane.xlu1 %1937  ;;  %v2301_v4 = vpack.c.bf16 %v9475_v46, %v9472_v39  ;;  %v9482_v60 = vmul.f32 %v8152_v59, %v9124_v45  ;;  %v8277_v59 = vld [vmem:[%s8389_s23 + $0x18] sm:$0xff]  }
 0x37f   : > { %v8154_v27 = vpop.eup %8153  ;;  %8163 = vrcp.f32 %v1938_v25  ;;  %v445_v25 = vunpack.c.l.bf16 %v8277_v59 }
 0x380   : > { %v9485_v58 = vmul.f32 %v8154_v27, %v9133_v63  ;;  %7041 = vmatprep.mubr.msk.bf16.mxu0 %vm559_vm1, %v2301_v4  ;;  %v1941_v16 = vpop.xlane.xlu0 %1940  ;;  %v446_v63 = vunpack.c.h.bf16 %v8277_v59  ;;  %v8278_v27 = vld [vmem:[%s8389_s23 + $0x8] sm:$0xff]  }
 0x381   : > { %v8156_v28 = vpop.eup %8155  ;;  %8165 = vrcp.f32 %v1941_v16  ;;  %v441_v4 = vunpack.c.l.bf16 %v8278_v27  ;;  %v442_v51 = vunpack.c.h.bf16 %v8278_v27  ;;  %v9498_v16 = vpack.i.bf16 %v444_v35, %v443_v14  ;;  %v7916_v59 = vld [vmem:[%s11364_s6 + $0x48] sm:$0xff]   ;;  %v8279_v14 = vld [vmem:[%s8389_s23 + $0x20] sm:$0xff]  }
 0x382   : > { %v2302_v47 = vpack.c.bf16 %v9485_v58, %v9482_v60  ;;  %v9501_v26 = vmul.f32 %v8156_v28, %v11717_v34  ;;  %v447_v35 = vunpack.c.l.bf16 %v8279_v14  ;;  %v448_v27 = vunpack.c.h.bf16 %v8279_v14  ;;  %7143 = vmatprep.subr.bf16.mxu1 %v7916_v59  ;;  %v11720_v34 = vld [vmem:[#allocation66_spill] sm:$0xff] }
 0x383   : > { %v8158_v45 = vpop.eup %8157  ;;  %v9519_v33 = vpack.i.bf16 %v442_v51, %v441_v4  ;;  %7144 = vmatpush3.bf16.msra.mxu1 %v7916_v59  ;;  %v7917_v51 = vld [vmem:[%s11364_s6 + $0x50] sm:$0xff]   ;;  %v11723_v59 = vld [vmem:[#allocation69_spill] sm:$0xff] }
 0x384   : > { %7565 = vperm.xlu1 %7563, %v9479_v57   ;;  %7042 = vmatmul.mubr.msk.bf16.vlgmr.msra.gmra.mrb[96].mxu0 %vm559_vm1, %v2302_v47  ;;  %v9504_v48 = vmul.f32 %v8158_v45, %v11718_v62  ;;  %v8280_v62 = vld [vmem:[%s11363_s5] sm:$0xf]  ;;  %v9517_v45 = vpack.i.bf16 %v446_v63, %v445_v25  ;;  %v9535_v4 = vpack.i.bf16 %v448_v27, %v447_v35 }
 0x385   : > { %v8160_v56 = vpop.eup %8159  ;;  %7074 = vmatpush3.bf16.msra.mxu0 %v11719_v61  ;;  %7145 = vmatprep.subr.bf16.mxu1 %v7917_v51  ;;  %v11725_v35 = vld [vmem:[#allocation70_spill] sm:$0xff] }
 0x386   : > { %v2303_v47 = vpack.c.bf16 %v9504_v48, %v9501_v26  ;;  %7548 = vmatprep.subr.msk.bf16.mxu0 %vm608_vm0, %v8280_v62  ;;  %v9524_v14 = vmul.f32 %v8160_v56, %v11720_v34  ;;  %v459_v62 = vunpack.c.l.bf16 %v8281_v44  ;;  %v8282_v56 = vld [vmem:[%s8389_s23 + $0x28] sm:$0xff]   ;;  %vm3504_vm0 = vcmask 523264  }
 0x387   : > { %v8162_v28 = vpop.eup %8161  ;;  %v449_v34 = vunpack.c.l.bf16 %v8282_v56  ;;  %v450_v24 = vunpack.c.h.bf16 %v8282_v56  ;;  %7146 = vmatpush3.bf16.msra.mxu1 %v7917_v51  ;;  %v7918_v56 = vld [vmem:[%s11364_s6 + $0x58] sm:$0xff]  }
 0x388   : > { %7576 = vperm.xlu1 %7563, %v9498_v16   ;;  %7045 = vmatprep.mubr.msk.bf16.mxu0 %vm559_vm1, %v2303_v47  ;;  %v9527_v3 = vmul.f32 %v8162_v28, %v11721_v31  ;;  %v8283_v31 = vld [vmem:[%s8389_s23 + $0x60] sm:$0xff]   ;;  %v9541_v44 = vpack.i.bf16 %v460_v6, %v459_v62  ;;  %v8284_v62 = vld [vmem:[%s8389_s23 + $0x30] sm:$0xff]  }
 0x389   : > { %v8164_v25 = vpop.eup %8163  ;;  %v463_v28 = vunpack.c.l.bf16 %v8283_v31  ;;  %v464_v29 = vunpack.c.h.bf16 %v8283_v31  ;;  %v9555_v23 = vpack.i.bf16 %v450_v24, %v449_v34  ;;  %7147 = vmatprep.subr.bf16.mxu1 %v7918_v56  ;;  %v452_v51 = vunpack.c.h.bf16 %v8284_v62  ;;  %v8286_v34 = vld [vmem:[%s8389_s23 + $0x38] sm:$0xff]  }
 0x38a   : > { %11722 = vst [vmem:[#allocation51_spill] sm:$0xff] %v9527_v3  ;;  %v2304_v63 = vpack.c.bf16 %v9527_v3, %v9524_v14  ;;  %v9544_v15 = vmul.f32 %v8164_v25, %v11723_v59  ;;  %v451_v25 = vunpack.c.l.bf16 %v8284_v62 }
 0x38b   : > { %v8166_v47 = vpop.eup %8165  ;;  %v9557_v6 = vpack.i.bf16 %v464_v29, %v463_v28  ;;  %7148 = vmatpush3.bf16.msra.mxu1 %v7918_v56  ;;  %v453_v28 = vunpack.c.l.bf16 %v8286_v34 }
 0x38c   : > { %7581 = vperm.xlu1 %7563, %v9517_v45   ;;  %7571 = vperm.xlu0 %7569, %v9519_v33   ;;  %11724 = vst [vmem:[#allocation56_spill] sm:$0xff] %v9544_v15  ;;  %v9547_v27 = vmul.f32 %v8166_v47, %v11725_v35  ;;  %v9566_v24 = vpack.i.bf16 %v452_v51, %v451_v25  ;;  %v454_v35 = vunpack.c.h.bf16 %v8286_v34  ;;  %v8288_v51 = vld [vmem:[%s8389_s23 + $0x48] sm:$0xff]  }
 0x38d   : > { %7046 = vmatmul.mubr.msk.bf16.gmra.mrb[100].mxu0 %vm559_vm1, %v2304_v63  ;;  %v8285_v63 = vld [vmem:[%s8389_s23 + $0x70] sm:$0xff]  }
 0x38e   : > { %11726 = vst [vmem:[#allocation59_spill] sm:$0xff] %v9547_v27  ;;  %v2305_v31 = vpack.c.bf16 %v9547_v27, %v9544_v15  ;;  %v467_v47 = vunpack.c.l.bf16 %v8285_v63  ;;  %v468_v59 = vunpack.c.h.bf16 %v8285_v63  ;;  %v7600_v62 = vpack.i.bf16 %v454_v35, %v453_v28  ;;  %v8289_v28 = vld [vmem:[%s8389_s23 + $0x58] sm:$0xff]  }
 0x38f   : > { %v461_v35 = vunpack.c.l.bf16 %v8289_v28  ;;  %v462_v22 = vunpack.c.h.bf16 %v8289_v28 }
 0x390   : > { %7586 = vperm.xlu1 %7563, %v9535_v4   ;;  %7616 = vperm.xlu0 %7569, %v9541_v44   ;;  %v9568_v29 = vpack.i.bf16 %v468_v59, %v467_v47  ;;  %v457_v47 = vunpack.c.l.bf16 %v8288_v51  ;;  %v458_v59 = vunpack.c.h.bf16 %v8288_v51 }
 0x391   : > { %7049 = vmatprep.mubr.msk.bf16.mxu0 %vm559_vm1, %v2305_v31  ;;  %v8287_v31 = vld [vmem:[%s8389_s23 + $0x40] sm:$0xff]  }
 0x392   : > { %v455_v56 = vunpack.c.l.bf16 %v8287_v31  ;;  %v456_v63 = vunpack.c.h.bf16 %v8287_v31  ;;  %v7610_v34 = vpack.i.bf16 %v458_v59, %v457_v47  ;;  %v9582_v31 = vld [vmem:[%s8403_s28 + $0x8] sm:$0xff]   ;;  %v8291_v59 = vld [vmem:[%s8389_s23 + $0x78] sm:$0xff]  }
 0x393   : > { %v470_v28 = vunpack.c.h.bf16 %v8291_v59 }
 0x394   : > { %7591 = vperm.xlu1 %7563, %v9555_v23   ;;  %7626 = vperm.xlu0 %7569, %v9557_v6   ;;  %v9574_v25 = vpack.i.bf16 %v456_v63, %v455_v56  ;;  %v7620_v56 = vpack.i.bf16 %v462_v22, %v461_v35  ;;  %v8290_v63 = vld [vmem:[%s8389_s23 + $0x68] sm:$0xff]   ;;  %v9594_v22 = vld [vmem:[%s8403_s28 + $0x20] sm:$0xff]  }
 0x395   : > { %v465_v51 = vunpack.c.l.bf16 %v8290_v63  ;;  %v466_v11 = vunpack.c.h.bf16 %v8290_v63  ;;  %v9599_v63 = vld [vmem:[%s8403_s28 + $0x30] sm:$0xff]  }
 0x397   : > { %v7630_v47 = vpack.i.bf16 %v466_v11, %v465_v51  ;;  %v9606_v11 = vld [vmem:[%s11364_s6] sm:$0xff]   ;;  %v9612_v51 = vld [vmem:[%s8403_s28 + $0x48] sm:$0xff]  }
 0x398   : > { %7596 = vperm.xlu1 %7563, %v9566_v24   ;;  %7636 = vperm.xlu0 %7569, %v9568_v29   ;;  %11727 = vst [vmem:[#allocation54_spill] sm:$0xff] %v9612_v51 }
 0x399   : > { %7181 = vmatprep.subr.bf16.mxu1 %v9606_v11 }
 0x39c   : > { %7601 = vperm.xlu1 %7563, %v7600_v62   ;;  %7645 = vset.pattern.permute.xlu0 %v8302_v52 }
 0x39d   : > { %7647 = vperm.xlu0 %7645, %v9479_v57   ;;  %v9588_v57 = vld [vmem:[%s8403_s28 + $0x18] sm:$0xff]  }
 0x3a0   : > { %7606 = vperm.xlu1 %7563, %v9574_v25  }
 0x3a1   : > { %7663 = vperm.xlu0 %7645, %v9517_v45   ;;  %v469_v45 = vunpack.c.l.bf16 %v8291_v59  ;;  %v9618_v59 = vld [vmem:[%s8403_s28] sm:$0xff]  }
 0x3a3   : > { %v7640_v35 = vpack.i.bf16 %v470_v28, %v469_v45  ;;  %v9621_v45 = vld [vmem:[%s8403_s28 + $0x58] sm:$0xff]  }
 0x3a4   : > { %7611 = vperm.xlu1 %7563, %v7610_v34   ;;  %11728 = vst [vmem:[#allocation57_spill] sm:$0xff] %v9621_v45 }
 0x3a5   : > { %3201 = vrot.lane.b32.xlu0 %v9582_v31, %s8303_s29 }
 0x3a8   : > { %7621 = vperm.xlu1 %7563, %v7620_v56  }
 0x3a9   : > { %3205 = vrot.lane.b32.xlu0 %v9588_v57, %s8303_s29 }
 0x3ac   : > { %7631 = vperm.xlu1 %7563, %v7630_v47  }
 0x3ad   : > { %3207 = vrot.lane.b32.xlu0 %v9594_v22, %s8303_s29 }
 0x3b0   : > { %7641 = vperm.xlu1 %7563, %v7640_v35  }
 0x3b1   : > { %3211 = vrot.lane.b32.xlu0 %v9599_v63, %s8303_s29 }
 0x3b4   : > { %7651 = vset.pattern.permute.xlu1 %v8302_v52  ;;  %v9628_v52 = vld [vmem:[%s8403_s28 + $0x10] sm:$0xff]  }
 0x3b5   : > { %7653 = vperm.xlu1 %7651, %v9519_v33   ;;  %7673 = vperm.xlu0 %7645, %v9555_v23   ;;  %v9638_v23 = vld [vmem:[%s8403_s28 + $0x28] sm:$0xff]   ;;  %v9648_v33 = vld [vmem:[%s8403_s28 + $0x40] sm:$0xff]  }
 0x3b6   : > { %11730 = vst [vmem:[#allocation50_spill] sm:$0xff] %v9648_v33 }
 0x3b9   : > { %7658 = vperm.xlu1 %7651, %v9498_v16   ;;  %3217 = vrot.lane.b32.xlu0 %v9612_v51, %s8303_s29  ;;  %v9643_v16 = vld [vmem:[%s8403_s28 + $0x38] sm:$0xff]  }
 0x3ba   : > { %11729 = vst [vmem:[#allocation63_spill] sm:$0xff] %v9643_v16 }
 0x3bd   : > { %3199 = vrot.lane.b32.xlu1 %v9618_v59, %s8303_s29  ;;  %3221 = vrot.lane.b32.xlu0 %v9621_v45, %s8303_s29 }
 0x3c1   : > { %3203 = vrot.lane.b32.xlu1 %v9628_v52, %s8303_s29  ;;  %3223 = vrot.lane.b32.xlu0 %v9352_v1, %s8303_s29  ;;  %v9653_v1 = vld [vmem:[%s8403_s28 + $0x50] sm:$0xff]  }
 0x3c2   : > { %11731 = vst [vmem:[#allocation67_spill] sm:$0xff] %v9653_v1 }
 0x3c5   : > { %7668 = vperm.xlu1 %7651, %v9535_v4   ;;  %3227 = vrot.lane.b32.xlu0 %v9404_v9, %s8303_s29 }
 0x3c9   : > { %3209 = vrot.lane.b32.xlu1 %v9638_v23, %s8303_s29  ;;  %7683 = vperm.xlu0 %7645, %v7600_v62   ;;  %v11732_v62 = vld [vmem:[#allocation28_spill] sm:$0xff] }
 0x3cd   : > { %3213 = vrot.lane.b32.xlu1 %v9643_v16, %s8303_s29  ;;  %7693 = vperm.xlu0 %7645, %v7610_v34   ;;  %v11733_v34 = vld [vmem:[#allocation29_spill] sm:$0xff] }
 0x3ce   : > { %v7727_v28 = vpack.i.bf16 %v11733_v34, %v11732_v62 }
 0x3d1   : > { %3215 = vrot.lane.b32.xlu1 %v9648_v33, %s8303_s29  ;;  %7703 = vperm.xlu0 %7645, %v7620_v56  }
 0x3d5   : > { %3219 = vrot.lane.b32.xlu1 %v9653_v1, %s8303_s29  ;;  %7713 = vperm.xlu0 %7645, %v7630_v47   ;;  %v11735_v47 = vld [vmem:[#allocation2_spill] sm:$0xff] }
 0x3d6   : > { %v7742_v1 = vpack.i.bf16 %v11735_v47, %v11734_v50 }
 0x3d8   : > { %v1944_v9 = vpop.xlane.xlu1 %1943 }
 0x3d9   : > { %7678 = vperm.xlu1 %7651, %v9566_v24   ;;  %7723 = vperm.xlu0 %7645, %v7640_v35   ;;  %8167 = vrcp.f32 %v1944_v9  ;;  %v11736_v35 = vld [vmem:[#allocation9_spill] sm:$0xff]  ;;  %v11737_v9 = vld [vmem:[#allocation10_spill] sm:$0xff] }
 0x3db   : > { %v1947_v4 = vpop.xlane.xlu0 %1946 }
 0x3dc   : > { %v1950_v45 = vpop.xlane.xlu1 %1949  ;;  %8169 = vrcp.f32 %v1947_v4  ;;  %v7752_v4 = vpack.i.bf16 %v11737_v9, %v11736_v35 }
 0x3dd   : > { %3225 = vrot.lane.b32.xlu1 %v9399_v36, %s8303_s29  ;;  %7728 = vrot.lane.b32.xlu0 %v7727_v28, %s8300_s11  ;;  %8171 = vrcp.f32 %v1950_v45 }
 0x3df   : > { %v1953_v56 = vpop.xlane.xlu0 %1952 }
 0x3e0   : > { %v1956_v51 = vpop.xlane.xlu1 %1955  ;;  %8173 = vrcp.f32 %v1953_v56 }
 0x3e1   : > { %3229 = vrot.lane.b32.xlu1 %v9429_v30, %s8303_s29  ;;  %7743 = vrot.lane.b32.xlu0 %v7742_v1, %s8300_s11  ;;  %8175 = vrcp.f32 %v1956_v51  ;;  %v11740_v1 = vld [vmem:[#allocation11_spill] sm:$0xff]  ;;  %v11741_v51 = vld [vmem:[#allocation8_spill] sm:$0xff]  ;;  %s11257_s29 = scalar_lea.vmem %s11368_s10, %s12048_s14 }
 0x3e2   : > { %v7762_v62 = vpack.i.bf16 %v11741_v51, %v11740_v1 }
 0x3e3   : > { %v1959_v24 = vpop.xlane.xlu0 %1958  ;;  %v8168_v36 = vpop.eup %8167 }
 0x3e4   : > { %v1962_v34 = vpop.xlane.xlu1 %1961  ;;  %8177 = vrcp.f32 %v1959_v24  ;;  %v9679_v47 = vmul.f32 %v8168_v36, %v9343_v19  ;;  %v11747_v36 = vld [vmem:[#allocation17_spill] sm:$0xff] }
 0x3e5   : > { %7688 = vperm.xlu1 %7651, %v9574_v25   ;;  %7753 = vrot.lane.b32.xlu0 %v7752_v4, %s8300_s11  ;;  %8179 = vrcp.f32 %v1962_v34  ;;  %v9672_v28 = vpop.f32.mrb[0].mxu1 }
 0x3e6   : > { %v8170_v45 = vpop.eup %8169  ;;  %11738 = vst [vmem:[#allocation64_spill] sm:$0xff] %v9672_v28  ;;  %v9674_v56 = vpop.f32.mrb[1].mxu1  ;;  %11742 = vst [vmem:[#allocation68_spill] sm:$0xff] %v9679_v47 }
 0x3e7   : > { %11739 = vst [vmem:[#allocation66_spill] sm:$0xff] %v9674_v56  ;;  %v1965_v30 = vpop.xlane.xlu0 %1964  ;;  %v9682_v9 = vmul.f32 %v8170_v45, %v9356_v41  ;;  %v8172_v24 = vpop.eup %8171  ;;  %v11746_v41 = vld [vmem:[#allocation16_spill] sm:$0xff] }
 0x3e8   : > { %v1968_v25 = vpop.xlane.xlu1 %1967  ;;  %v9684_v35 = vpop.f32.mrb[2].mxu1  ;;  %8181 = vrcp.f32 %v1965_v30  ;;  %v7772_v45 = vpack.i.bf16 %v11747_v36, %v11746_v41  ;;  %v9696_v1 = vmul.f32 %v8172_v24, %v9360_v21 }
 0x3e9   : > { %11743 = vst [vmem:[#allocation69_spill] sm:$0xff] %v9682_v9  ;;  %11744 = vst [vmem:[#allocation70_spill] sm:$0xff] %v9684_v35  ;;  %v9686_v34 = vpop.f32.mrb[3].mxu1  ;;  %7698 = vperm.xlu1 %7651, %v9541_v44   ;;  %7763 = vrot.lane.b32.xlu0 %v7762_v62, %s8300_s11  ;;  %v2306_v4 = vpack.c.bf16 %v9682_v9, %v9679_v47  ;;  %8183 = vrcp.f32 %v1968_v25 }
 0x3ea   : > { %11745 = vst [vmem:[#allocation95_spill] sm:$0xff] %v9686_v34  ;;  %v8174_v51 = vpop.eup %8173  ;;  %11748 = vst [vmem:[#allocation96_spill] sm:$0xff] %v9696_v1 }
 0x3eb   : > { %7050 = vmatmul.mubr.msk.bf16.gmra.mrb[104].mxu0 %vm559_vm1, %v2306_v4  ;;  %v1971_v19 = vpop.xlane.xlu0 %1970  ;;  %v9699_v30 = vmul.f32 %v8174_v51, %v9368_v38  ;;  %v8176_v44 = vpop.eup %8175  ;;  %v11751_v38 = vld [vmem:[#allocation14_spill] sm:$0xff]  ;;  %v11752_v51 = vld [vmem:[#allocation15_spill] sm:$0xff] }
 0x3ec   : > { %v1974_v50 = vpop.xlane.xlu1 %1973  ;;  %8185 = vrcp.f32 %v1971_v19  ;;  %v7782_v24 = vpack.i.bf16 %v11752_v51, %v11751_v38  ;;  %v9713_v19 = vmul.f32 %v8176_v44, %v9370_v55  ;;  %v11756_v44 = vld [vmem:[#allocation4_spill] sm:$0xff]  ;;  %v11757_v38 = vld [vmem:[#allocation22_spill] sm:$0xff] }
 0x3ed   : > { %11749 = vst [vmem:[#allocation97_spill] sm:$0xff] %v9699_v30  ;;  %7708 = vperm.xlu1 %7651, %v9557_v6   ;;  %7773 = vrot.lane.b32.xlu0 %v7772_v45, %s8300_s11  ;;  %v2307_v62 = vpack.c.bf16 %v9699_v30, %v9696_v1  ;;  %8187 = vrcp.f32 %v1974_v50  ;;  %v9705_v4 = vpop.f32.mrb[4].mxu1  ;;  %v11758_v1 = vld [vmem:[#allocation23_spill] sm:$0xff] }
 0x3ee   : > { %v8178_v25 = vpop.eup %8177  ;;  %v9707_v36 = vpop.f32.mrb[5].mxu1  ;;  %11753 = vst [vmem:[#allocation99_spill] sm:$0xff] %v9713_v19 }
 0x3ef   : > { %11750 = vst [vmem:[#allocation98_spill] sm:$0xff] %v9707_v36  ;;  %7053 = vmatprep.mubr.msk.bf16.mxu0 %vm559_vm1, %v2307_v62  ;;  %v1977_v21 = vpop.xlane.xlu0 %1976  ;;  %v9716_v6 = vmul.f32 %v8178_v25, %v9378_v10  ;;  %v8180_v45 = vpop.eup %8179  ;;  %v11755_v10 = vld [vmem:[#allocation3_spill] sm:$0xff] }
 0x3f0   : > { %v1980_v41 = vpop.xlane.xlu1 %1979  ;;  %v9718_v30 = vpop.f32.mrb[6].mxu1  ;;  %8189 = vrcp.f32 %v1977_v21  ;;  %v7732_v25 = vpack.i.bf16 %v11756_v44, %v11755_v10  ;;  %v7792_v21 = vpack.i.bf16 %v11758_v1, %v11757_v38  ;;  %v9732_v9 = vmul.f32 %v8180_v45, %v9380_v7  ;;  %v11763_v38 = vld [vmem:[#allocation21_spill] sm:$0xff] }
 0x3f1   : > { %v9720_v50 = vpop.f32.mrb[7].mxu1  ;;  %7718 = vperm.xlu1 %7651, %v9568_v29   ;;  %7783 = vrot.lane.b32.xlu0 %v7782_v24, %s8300_s11  ;;  %v2308_v62 = vpack.c.bf16 %v9716_v6, %v9713_v19  ;;  %8191 = vrcp.f32 %v1980_v41 }
 0x3f2   : > { %11754 = vst [vmem:[#allocation100_spill] sm:$0xff] %v9720_v50  ;;  %v8182_v51 = vpop.eup %8181 }
 0x3f3   : > { %7054 = vmatmul.mubr.msk.bf16.gmra.mrb[108].mxu0 %vm559_vm1, %v2308_v62  ;;  %v1983_v55 = vpop.xlane.xlu0 %1982  ;;  %v9735_v29 = vmul.f32 %v8182_v51, %v9388_v37  ;;  %v8184_v24 = vpop.eup %8183  ;;  %v11760_v37 = vld [vmem:[#allocation26_spill] sm:$0xff]  ;;  %v11761_v51 = vld [vmem:[#allocation27_spill] sm:$0xff] }
 0x3f4   : > { %v1986_v47 = vpop.xlane.xlu1 %1985  ;;  %8193 = vrcp.f32 %v1983_v55  ;;  %v7737_v45 = vpack.i.bf16 %v11761_v51, %v11760_v37  ;;  %v11762_v55 = vld [vmem:[#allocation20_spill] sm:$0xff] }
 0x3f5   : > { %7733 = vrot.lane.b32.xlu1 %v7732_v25, %s8300_s11  ;;  %7793 = vrot.lane.b32.xlu0 %v7792_v21, %s8300_s11  ;;  %v2309_v41 = vpack.c.bf16 %v9735_v29, %v9732_v9  ;;  %8195 = vrcp.f32 %v1986_v47  ;;  %v9741_v44 = vpop.f32.mrb[8].mxu1  ;;  %v7802_v25 = vpack.i.bf16 %v11763_v38, %v11762_v55  ;;  %v9751_v21 = vmul.f32 %v8184_v24, %v9390_v42  ;;  %v11766_v24 = vld [vmem:[#allocation35_spill] sm:$0xff] }
 0x3f6   : > { %v8186_v62 = vpop.eup %8185  ;;  %v9743_v1 = vpop.f32.mrb[9].mxu1 }
 0x3f7   : > { %11759 = vst [vmem:[#allocation101_spill] sm:$0xff] %v9743_v1  ;;  %7057 = vmatprep.mubr.msk.bf16.mxu0 %vm559_vm1, %v2309_v41  ;;  %v1989_v7 = vpop.xlane.xlu0 %1988  ;;  %v9754_v10 = vmul.f32 %v8186_v62, %v9401_v49  ;;  %v8188_v47 = vpop.eup %8187  ;;  %v11765_v49 = vld [vmem:[#allocation34_spill] sm:$0xff] }
 0x3f8   : > { %v1992_v19 = vpop.xlane.xlu1 %1991  ;;  %v9756_v5 = vpop.f32.mrb[10].mxu1  ;;  %8197 = vrcp.f32 %v1989_v7  ;;  %v7747_v62 = vpack.i.bf16 %v11766_v24, %v11765_v49  ;;  %v9768_v37 = vmul.f32 %v8188_v47, %v9406_v2  ;;  %v11768_v47 = vld [vmem:[#allocation32_spill] sm:$0xff] }
 0x3f9   : > { %v9758_v40 = vpop.f32.mrb[11].mxu1  ;;  %7738 = vrot.lane.b32.xlu1 %v7737_v45, %s8300_s11  ;;  %7803 = vrot.lane.b32.xlu0 %v7802_v25, %s8300_s11  ;;  %v2310_v41 = vpack.c.bf16 %v9754_v10, %v9751_v21  ;;  %8199 = vrcp.f32 %v1992_v19 }
 0x3fa   : > { %11764 = vst [vmem:[#allocation102_spill] sm:$0xff] %v9758_v40  ;;  %v8190_v51 = vpop.eup %8189 }
 0x3fb   : > { %7058 = vmatmul.mubr.msk.bf16.gmra.mrb[112].mxu0 %vm559_vm1, %v2310_v41  ;;  %v1995_v42 = vpop.xlane.xlu0 %1994  ;;  %v9771_v7 = vmul.f32 %v8190_v51, %v9418_v18  ;;  %v8192_v45 = vpop.eup %8191  ;;  %v11769_v18 = vld [vmem:[#allocation33_spill] sm:$0xff] }
 0x3fc   : > { %v1998_v38 = vpop.xlane.xlu1 %1997  ;;  %8201 = vrcp.f32 %v1995_v42  ;;  %v7757_v51 = vpack.i.bf16 %v11769_v18, %v11768_v47  ;;  %v9784_v24 = vmul.f32 %v8192_v45, %v9420_v0  ;;  %v11773_v45 = vld [vmem:[#allocation40_spill] sm:$0xff] }
 0x3fd   : > { %7748 = vrot.lane.b32.xlu1 %v7747_v62, %s8300_s11  ;;  %v2311_v19 = vpack.c.bf16 %v9771_v7, %v9768_v37  ;;  %8203 = vrcp.f32 %v1998_v38  ;;  %v9776_v41 = vpop.f32.mrb[12].mxu1 }
 0x3fe   : > { %v8194_v25 = vpop.eup %8193  ;;  %v9778_v55 = vpop.f32.mrb[13].mxu1 }
 0x3ff   : > { %11767 = vst [vmem:[#allocation103_spill] sm:$0xff] %v9778_v55  ;;  %7061 = vmatprep.mubr.msk.bf16.mxu0 %vm559_vm1, %v2311_v19  ;;  %v2001_v2 = vpop.xlane.xlu0 %2000  ;;  %v9787_v42 = vmul.f32 %v8194_v25, %v9431_v54  ;;  %v8196_v62 = vpop.eup %8195  ;;  %v11774_v54 = vld [vmem:[#allocation41_spill] sm:$0xff] }
 0x400   : > { %v2004_v49 = vpop.xlane.xlu1 %2003  ;;  %v9789_v27 = vpop.f32.mrb[14].mxu1  ;;  %8205 = vrcp.f32 %v2001_v2  ;;  %v7767_v25 = vpack.i.bf16 %v11774_v54, %v11773_v45  ;;  %v9800_v18 = vmul.f32 %v8196_v62, %v9433_v17  ;;  %v11778_v54 = vld [vmem:[#allocation38_spill] sm:$0xff]  ;;  %v11779_v45 = vld [vmem:[#allocation39_spill] sm:$0xff] }
 0x401   : > { %11770 = vst [vmem:[#allocation104_spill] sm:$0xff] %v9787_v42  ;;  %11771 = vst [vmem:[#allocation105_spill] sm:$0xff] %v9789_v27  ;;  %v9791_v38 = vpop.f32.mrb[15].mxu1  ;;  %7758 = vrot.lane.b32.xlu1 %v7757_v51, %s8300_s11  ;;  %v2312_v19 = vpack.c.bf16 %v9787_v42, %v9784_v24  ;;  %8207 = vrcp.f32 %v2004_v49  ;;  %v7777_v17 = vpack.i.bf16 %v11779_v45, %v11778_v54 }
 0x402   : > { %11772 = vst [vmem:[#allocation106_spill] sm:$0xff] %v9791_v38  ;;  %v8198_v15 = vpop.eup %8197  ;;  %11775 = vst [vmem:[#allocation107_spill] sm:$0xff] %v9800_v18 }
 0x403   : > { %7062 = vmatmul.mubr.msk.bf16.gmra.mrb[116].mxu0 %vm559_vm1, %v2312_v19  ;;  %v2007_v0 = vpop.xlane.xlu0 %2006  ;;  %v9803_v2 = vmul.f32 %v8198_v15, %v9442_v13  ;;  %v8200_v47 = vpop.eup %8199 }
 0x404   : > { %8209 = vrcp.f32 %v2007_v0  ;;  %v7566_v51 = vpop.permute.xlu1 %7565  ;;  %v9822_v0 = vmul.f32 %v8200_v47, %v9444_v32 }
 0x405   : > { %11776 = vst [vmem:[#allocation108_spill] sm:$0xff] %v9803_v2  ;;  %v7568_v33 = vunpack.i.h.bf16 %v7566_v51  ;;  %v7567_v16 = vunpack.i.l.bf16 %v7566_v51  ;;  %7768 = vrot.lane.b32.xlu1 %v7767_v25, %s8300_s11  ;;  %v2313_v49 = vpack.c.bf16 %v9803_v2, %v9800_v18  ;;  %v9808_v42 = vpop.f32.mrb[16].mxu1 }
 0x406   : > { %v8202_v19 = vpop.eup %8201  ;;  %11777 = vst [vmem:[#allocation109_spill] sm:$0xff] %v9808_v42  ;;  %v9818_v13 = vpop.f32.mrb[17].mxu1 }
 0x407   : > { %v9813_v62 = vmul.f32 %v7568_v33, %v9686_v34  ;;  %v9816_v15 = vmul.f32 %v7567_v16, %v9674_v56  ;;  %11782 = vst [vmem:[#allocation112_spill] sm:$0xff] %v9818_v13  ;;  %7065 = vmatprep.mubr.msk.bf16.mxu0 %vm559_vm1, %v2313_v49  ;;  %v9825_v25 = vmul.f32 %v8202_v19, %v9450_v12  ;;  %v8204_v51 = vpop.eup %8203  ;;  %v9827_v2 = vpop.f32.mrb[18].mxu1  ;;  %v11786_v49 = vld [vmem:[#allocation46_spill] sm:$0xff]  ;;  %v11787_v19 = vld [vmem:[#allocation47_spill] sm:$0xff] }
 0x408   : > { %11784 = vst [vmem:[#allocation114_spill] sm:$0xff] %v9827_v2  ;;  %v7577_v45 = vpop.permute.xlu1 %7576  ;;  %v9829_v34 = vpop.f32.mrb[19].mxu1  ;;  %v7787_v56 = vpack.i.bf16 %v11787_v19, %v11786_v49 }
 0x409   : > { %11780 = vst [vmem:[#allocation110_spill] sm:$0xff] %v9813_v62  ;;  %11781 = vst [vmem:[#allocation111_spill] sm:$0xff] %v9816_v15  ;;  %v7579_v33 = vunpack.i.h.bf16 %v7577_v45  ;;  %v7578_v54 = vunpack.i.l.bf16 %v7577_v45  ;;  %7778 = vrot.lane.b32.xlu1 %v7777_v17, %s8300_s11  ;;  %v3456_v16 = vpack.c.bf16 %v9813_v62, %v9816_v15  ;;  %v2314_v32 = vpack.c.bf16 %v9825_v25, %v9822_v0 }
 0x40a   : > { %11783 = vst [vmem:[#allocation113_spill] sm:$0xff] %v9825_v25  ;;  %11785 = vst [vmem:[#allocation115_spill] sm:$0xff] %v9829_v34  ;;  %v8206_v47 = vpop.eup %8205  ;;  %v9841_v45 = vmul.f32 %v8204_v51, %v9452_v43 }
 0x40b   : > { %7149 = vmatprep.mubr.msk.bf16.mxu1 %vm3504_vm0, %v3456_v16  ;;  %7066 = vmatmul.mubr.msk.bf16.gmra.mrb[120].mxu0 %vm559_vm1, %v2314_v32  ;;  %v7572_v12 = vpop.permute.xlu0 %7571  ;;  %v9844_v17 = vmul.f32 %v8206_v47, %v9458_v20  ;;  %v8208_v18 = vpop.eup %8207  ;;  %v9847_v25 = vmul.f32 %v7579_v33, %v9720_v50  ;;  %v9850_v16 = vmul.f32 %v7578_v54, %v9707_v36  ;;  %v11793_v33 = vld [vmem:[#allocation44_spill] sm:$0xff] }
 0x40c   : > { %v7574_v62 = vunpack.i.h.bf16 %v7572_v12  ;;  %v7573_v15 = vunpack.i.l.bf16 %v7572_v12  ;;  %v7582_v3 = vpop.permute.xlu1 %7581  ;;  %v9871_v49 = vmul.f32 %v8208_v18, %v9460_v53 }
 0x40d   : > { %11788 = vst [vmem:[#allocation116_spill] sm:$0xff] %v9847_v25  ;;  %11789 = vst [vmem:[#allocation117_spill] sm:$0xff] %v9850_v16  ;;  %7788 = vrot.lane.b32.xlu1 %v7787_v56, %s8300_s11  ;;  %v2315_v32 = vpack.c.bf16 %v9844_v17, %v9841_v45  ;;  %v9861_v47 = vpop.f32.mrb[20].mxu1  ;;  %v11794_v56 = vld [vmem:[#allocation45_spill] sm:$0xff]  ;;  %v7584_v36 = vunpack.i.h.bf16 %v7582_v3  ;;  %v7583_v50 = vunpack.i.l.bf16 %v7582_v3  ;;  %v3458_v53 = vpack.c.bf16 %v9847_v25, %v9850_v16 }
 0x40e   : > { %v8210_v43 = vpop.eup %8209  ;;  %v9856_v51 = vmul.f32 %v7574_v62, %v9684_v35  ;;  %v9859_v20 = vmul.f32 %v7573_v15, %v9672_v28  ;;  %11791 = vst [vmem:[#allocation119_spill] sm:$0xff] %v9861_v47  ;;  %v9863_v12 = vpop.f32.mrb[21].mxu1  ;;  %v7797_v19 = vpack.i.bf16 %v11794_v56, %v11793_v33 }
 0x40f   : > { %11792 = vst [vmem:[#allocation120_spill] sm:$0xff] %v9863_v12  ;;  %7069 = vmatprep.mubr.msk.bf16.mxu0 %vm559_vm1, %v2315_v32  ;;  %v9866_v54 = vpop.permute.xlu0 %7616  ;;  %v9874_v62 = vmul.f32 %v8210_v43, %v9466_v8  ;;  %v9878_v28 = vpop.f32.mrb[22].mxu1  ;;  %v7920_v8 = vld [vmem:[%s11364_s6 + $0x8] sm:$0xff]   ;;  %v9898_v33 = vmul.f32 %v7584_v36, %v9718_v30  ;;  %v9901_v25 = vmul.f32 %v7583_v50, %v9705_v4 }
 0x410   : > { %11790 = vst [vmem:[#allocation118_spill] sm:$0xff] %v9856_v51  ;;  %v3457_v15 = vpack.c.bf16 %v9856_v51, %v9859_v20  ;;  %11795 = vst [vmem:[#allocation121_spill] sm:$0xff] %v9878_v28  ;;  %v7587_v35 = vpop.permute.xlu1 %7586  ;;  %v9880_v32 = vpop.f32.mrb[23].mxu1 }
 0x411   : > { %11796 = vst [vmem:[#allocation122_spill] sm:$0xff] %v9880_v32  ;;  %7798 = vrot.lane.b32.xlu1 %v7797_v19, %s8300_s11  ;;  %v2316_v56 = vpack.c.bf16 %v9874_v62, %v9871_v49  ;;  %v7589_v18 = vunpack.i.h.bf16 %v7587_v35  ;;  %v7588_v43 = vunpack.i.l.bf16 %v7587_v35  ;;  %v7844_v35 = vpack.i.bf16 %v9732_v9, %v9472_v39 }
 0x412   : > { %7150 = vmatmul.mubr.msk.bf16.vlgmr.msra.gmra.mrb[40].mxu1 %vm3504_vm0, %v3457_v15  ;;  %v3459_v16 = vpack.c.bf16 %v9898_v33, %v9901_v25 }
 0x413   : > { %7070 = vmatmul.mubr.msk.bf16.gmra.mrb[124].mxu0 %vm559_vm1, %v2316_v56  ;;  %7153 = vmatprep.mubr.msk.bf16.mxu1 %vm3504_vm0, %v3458_v53  ;;  %v9895_v19 = vpop.permute.xlu0 %7626  ;;  %v7921_v56 = vld [vmem:[%s11364_s6 + $0x10] sm:$0xff]   ;;  %v9912_v36 = vmul.f32 %v7589_v18, %v9758_v40  ;;  %v9915_v50 = vmul.f32 %v7588_v43, %v9743_v1  ;;  %v7846_v43 = vpack.i.bf16 %v9735_v29, %v9475_v46 }
 0x414   : > { %v7592_v51 = vpop.permute.xlu1 %7591  ;;  %7075 = vmatprep.mubr.msk.bf16.mxu0 %vm559_vm1, %v9618_v59  ;;  %7182 = vmatpush3.bf16.msra.mxu1 %v9606_v11 }
 0x415   : > { %7183 = vmatprep.subr.bf16.mxu1 %v7920_v8  ;;  %11797 = vst [vmem:[#allocation123_spill] sm:$0xff] %v9912_v36  ;;  %11798 = vst [vmem:[#allocation124_spill] sm:$0xff] %v9915_v50  ;;  %v9917_v15 = vpop.f32.mrb[24].mxu1  ;;  %v7594_v59 = vunpack.i.h.bf16 %v7592_v51  ;;  %v7593_v39 = vunpack.i.l.bf16 %v7592_v51  ;;  %v3460_v51 = vpack.c.bf16 %v9912_v36, %v9915_v50 }
 0x416   : > { %11799 = vst [vmem:[#allocation125_spill] sm:$0xff] %v9917_v15  ;;  %v9919_v53 = vpop.f32.mrb[25].mxu1 }
 0x417   : > { %11800 = vst [vmem:[#allocation126_spill] sm:$0xff] %v9919_v53  ;;  %7845 = vxpose.xlu0.b32.start [1/16] (narrow) %v7844_v35, 8  ;;  %v9921_v11 = vpop.permute.xlu0 %7636  ;;  %v9923_v9 = vpop.f32.mrb[26].mxu1  ;;  %v9940_v35 = vmul.f32 %v7594_v59, %v9756_v5  ;;  %v9943_v46 = vmul.f32 %v7593_v39, %v9741_v44 }
 0x418   : > { %11801 = vst [vmem:[#allocation127_spill] sm:$0xff] %v9923_v9  ;;  %v7597_v3 = vpop.permute.xlu1 %7596  ;;  %7184 = vmatpush3.bf16.msra.mxu1 %v7920_v8  ;;  %v9927_v18 = vpop.f32.mrb[27].mxu1  ;;  %v7922_v8 = vld [vmem:[%s11364_s6 + $0x18] sm:$0xff]  }
 0x419   : > { %11802 = vst [vmem:[#allocation128_spill] sm:$0xff] %v9927_v18  ;;  %7185 = vmatprep.subr.bf16.mxu1 %v7921_v56  ;;  %v7599_v40 = vunpack.i.h.bf16 %v7597_v3  ;;  %v7598_v1 = vunpack.i.l.bf16 %v7597_v3  ;;  %v11803_v3 = vld [vmem:[#allocation31_spill] sm:$0xff] }
 0x41a   : > { %7154 = vmatmul.mubr.msk.bf16.gmra.mrb[44].mxu1 %vm3504_vm0, %v3459_v16 }
 0x41b   : > { %7076 = vmatmul.mubr.msk.bf16.vlgmr.msra.gmra.mrb[128].mxu0 %vm559_vm1, %v9582_v31  ;;  %7847 = vxpose.xlu0.b32.cont [2/16] (narrow) %v7846_v43, 8  ;;  %v7848_v31 = vpack.i.bf16 %v9751_v21, %v9482_v60  ;;  %v9955_v59 = vmul.f32 %v7599_v40, %v9791_v38  ;;  %v9958_v39 = vmul.f32 %v7598_v1, %v9778_v55 }
 0x41c   : > { %7108 = vmatpush3.bf16.msra.mxu0 %v11719_v61  ;;  %v7602_v29 = vpop.permute.xlu1 %7601  ;;  %7157 = vmatprep.mubr.msk.bf16.mxu1 %vm3504_vm0, %v3460_v51  ;;  %v9947_v16 = vpop.permute.xlu0 %7647  ;;  %v7850_v1 = vpack.i.bf16 %v9754_v10, %v9485_v58 }
 0x41d   : > { %7350 = vmatprep.subr.bf16.mxu0 %v11803_v3  ;;  %7079 = vmatprep.mubr.msk.bf16.mxu0 %vm559_vm1, %v9628_v52  ;;  %11804 = vst [vmem:[#allocation31_spill] sm:$0xff] %v9958_v39  ;;  %v9960_v61 = vpop.f32.mrb[28].mxu1  ;;  %v7604_v51 = vunpack.i.h.bf16 %v7602_v29  ;;  %v7603_v36 = vunpack.i.l.bf16 %v7602_v29  ;;  %v3461_v52 = vpack.c.bf16 %v9940_v35, %v9943_v46  ;;  %v3462_v29 = vpack.c.bf16 %v9955_v59, %v9958_v39 }
 0x41e   : > { %11805 = vst [vmem:[#allocation129_spill] sm:$0xff] %v9960_v61  ;;  %7186 = vmatpush3.bf16.msra.mxu1 %v7921_v56  ;;  %v9962_v43 = vpop.f32.mrb[29].mxu1 }
 0x41f   : > { %11806 = vst [vmem:[#allocation130_spill] sm:$0xff] %v9962_v43  ;;  %7849 = vxpose.xlu0.b32.cont [3/16] (narrow) %v7848_v31, 8  ;;  %7187 = vmatprep.subr.bf16.mxu1 %v7922_v8  ;;  %v9964_v50 = vpop.f32.mrb[30].mxu1  ;;  %v7923_v31 = vld [vmem:[%s11364_s6 + $0x20] sm:$0xff]   ;;  %v9983_v55 = vmul.f32 %v7604_v51, %v9789_v27  ;;  %v9986_v58 = vmul.f32 %v7603_v36, %v9776_v41  ;;  %v7924_v36 = vld [vmem:[%s11364_s6 + $0x28] sm:$0xff]  }
 0x420   : > { %11807 = vst [vmem:[#allocation131_spill] sm:$0xff] %v9964_v50  ;;  %v7607_v60 = vpop.permute.xlu1 %7606  ;;  %v9968_v40 = vpop.f32.mrb[31].mxu1 }
 0x421   : > { %11808 = vst [vmem:[#allocation132_spill] sm:$0xff] %v9968_v40  ;;  %v9970_v21 = vpop.permute.xlu0 %7663  ;;  %v7609_v56 = vunpack.i.h.bf16 %v7607_v60  ;;  %v7608_v38 = vunpack.i.l.bf16 %v7607_v60  ;;  %11809 = vst [vmem:[#allocation133_spill] sm:$0xff] %v9986_v58  ;;  %v3463_v39 = vpack.c.bf16 %v9983_v55, %v9986_v58 }
 0x422   : > { %7158 = vmatmul.mubr.msk.bf16.gmra.mrb[48].mxu1 %vm3504_vm0, %v3461_v52  ;;  %v7852_v52 = vpack.i.bf16 %v9768_v37, %v9501_v26  ;;  %v7854_v37 = vpack.i.bf16 %v9771_v7, %v9504_v48 }
 0x423   : > { %7080 = vmatmul.mubr.msk.bf16.gmra.mrb[132].mxu0 %vm559_vm1, %v9588_v57  ;;  %7851 = vxpose.xlu0.b32.cont [4/16] (narrow) %v7850_v1, 8  ;;  %v9996_v57 = vmul.f32 %v7609_v56, %v9829_v34  ;;  %v9999_v51 = vmul.f32 %v7608_v38, %v9818_v13  ;;  %v7619_v38 = vunpack.i.h.bf16 %v9866_v54 }
 0x424   : > { %v7612_v10 = vpop.permute.xlu1 %7611  ;;  %7161 = vmatprep.mubr.msk.bf16.mxu1 %vm3504_vm0, %v3462_v29  ;;  %7083 = vmatprep.mubr.msk.bf16.mxu0 %vm559_vm1, %v9594_v22 }
 0x425   : > { %v9991_v60 = vpop.permute.xlu0 %3201  ;;  %7188 = vmatpush3.bf16.msra.mxu1 %v7922_v8  ;;  %11810 = vst [vmem:[#allocation134_spill] sm:$0xff] %v9996_v57  ;;  %11811 = vst [vmem:[#allocation135_spill] sm:$0xff] %v9999_v51  ;;  %v7614_v1 = vunpack.i.h.bf16 %v7612_v10  ;;  %v7613_v22 = vunpack.i.l.bf16 %v7612_v10  ;;  %v7618_v8 = vunpack.i.l.bf16 %v9866_v54  ;;  %v3464_v56 = vpack.c.bf16 %v9996_v57, %v9999_v51  ;;  %v7925_v10 = vld [vmem:[%s11364_s6 + $0x30] sm:$0xff]   ;;  %v11901_v57 = vld [vmem:[#allocation10_spill] sm:$0xff] }
 0x426   : > { %7189 = vmatprep.subr.bf16.mxu1 %v7923_v31 }
 0x427   : > { %7853 = vxpose.xlu0.b32.cont [5/16] (narrow) %v7852_v52, 8  ;;  %v10021_v48 = vmul.f32 %v7614_v1, %v9827_v2  ;;  %v10024_v7 = vmul.f32 %v7613_v22, %v9808_v42  ;;  %v10037_v52 = vmul.f32 %v7619_v38, %v9880_v32  ;;  %v7926_v1 = vld [vmem:[%s11364_s6 + $0x38] sm:$0xff]   ;;  %v7629_v32 = vunpack.i.h.bf16 %v9895_v19  ;;  %v11822_v42 = vld [vmem:[#allocation56_spill] sm:$0xff] }
 0x428   : > { %v7622_v29 = vpop.permute.xlu1 %7621 }
 0x429   : > { %v10006_v26 = vpop.permute.xlu0 %3205  ;;  %7190 = vmatpush3.bf16.msra.mxu1 %v7923_v31  ;;  %11812 = vst [vmem:[#allocation136_spill] sm:$0xff] %v10021_v48  ;;  %11813 = vst [vmem:[#allocation137_spill] sm:$0xff] %v10024_v7  ;;  %v7856_v31 = vpack.i.bf16 %v9784_v24, %v9524_v14  ;;  %v7624_v22 = vunpack.i.h.bf16 %v7622_v29  ;;  %v11816_v24 = vld [vmem:[#allocation51_spill] sm:$0xff] }
 0x42a   : > { %7162 = vmatmul.mubr.msk.bf16.gmra.mrb[52].mxu1 %vm3504_vm0, %v3463_v39  ;;  %7191 = vmatprep.subr.bf16.mxu1 %v7924_v36  ;;  %11815 = vst [vmem:[#allocation139_spill] sm:$0xff] %v10037_v52 }
 0x42b   : > { %7084 = vmatmul.mubr.msk.bf16.gmra.mrb[136].mxu0 %vm559_vm1, %v9638_v23  ;;  %7855 = vxpose.xlu0.b32.cont [6/16] (narrow) %v7854_v37, 8  ;;  %v10034_v23 = vmul.f32 %v7618_v8, %v9863_v12 }
 0x42c   : > { %v7632_v54 = vpop.permute.xlu1 %7631  ;;  %7165 = vmatprep.mubr.msk.bf16.mxu1 %vm3504_vm0, %v3464_v56  ;;  %7087 = vmatprep.mubr.msk.bf16.mxu0 %vm559_vm1, %v9599_v63  ;;  %v7623_v63 = vunpack.i.l.bf16 %v7622_v29  ;;  %v3465_v56 = vpack.c.bf16 %v10021_v48, %v10024_v7  ;;  %v10055_v29 = vld [vmem:[%s11364_s6 + $0x60] sm:$0xff]   ;;  %v11906_v48 = vld [vmem:[#allocation24_spill] sm:$0xff] }
 0x42d   : > { %v10029_v39 = vpop.permute.xlu0 %3207  ;;  %7192 = vmatpush3.bf16.msra.mxu1 %v7924_v36  ;;  %11814 = vst [vmem:[#allocation138_spill] sm:$0xff] %v10034_v23  ;;  %v11817_v36 = vld [vmem:[#allocation104_spill] sm:$0xff]  ;;  %v3466_v38 = vpack.c.bf16 %v10037_v52, %v10034_v23  ;;  %v7638_v23 = vunpack.i.l.bf16 %v9921_v11 }
 0x42e   : > { %7193 = vmatprep.subr.bf16.mxu1 %v7925_v10  ;;  %v7858_v8 = vpack.i.bf16 %v11817_v36, %v11816_v24  ;;  %v7628_v24 = vunpack.i.l.bf16 %v9895_v19  ;;  %v10064_v36 = vmul.f32 %v7623_v63, %v9861_v47  ;;  %v10076_v19 = vmul.f32 %v7629_v32, %v9927_v18  ;;  %v11828_v18 = vld [vmem:[#allocation82_spill] sm:$0xff] }
 0x42f   : > { %7857 = vxpose.xlu0.b32.cont [7/16] (narrow) %v7856_v31, 8  ;;  %v11818_v31 = vld [vmem:[#allocation63_spill] sm:$0xff]  ;;  %v7634_v63 = vunpack.i.h.bf16 %v7632_v54 }
 0x430   : > { %v7642_v37 = vpop.permute.xlu1 %7641  ;;  %11820 = vst [vmem:[#allocation104_spill] sm:$0xff] %v10064_v36  ;;  %11824 = vst [vmem:[#allocation63_spill] sm:$0xff] %v10076_v19 }
 0x431   : > { %v10044_v14 = vpop.permute.xlu0 %3211  ;;  %7194 = vmatpush3.bf16.msra.mxu1 %v7925_v10  ;;  %v10061_v10 = vmul.f32 %v7624_v22, %v9878_v28  ;;  %v10080_v22 = vmul.f32 %v7628_v24, %v9919_v53  ;;  %v11829_v24 = vld [vmem:[#allocation53_spill] sm:$0xff] }
 0x432   : > { %7166 = vmatmul.mubr.msk.bf16.gmra.mrb[56].mxu1 %vm3504_vm0, %v3465_v56  ;;  %7195 = vmatprep.subr.bf16.mxu1 %v7926_v1  ;;  %v11821_v56 = vld [vmem:[#allocation50_spill] sm:$0xff]  ;;  %v11830_v53 = vpack.i.bf16 %v11828_v18, %v11829_v24  ;;  %v11835_v18 = vld [vmem:[#allocation68_spill] sm:$0xff] }
 0x433   : > { %7088 = vmatmul.mubr.msk.bf16.gmra.mrb[140].mxu0 %vm559_vm1, %v11818_v31  ;;  %7859 = vxpose.xlu0.b32.cont [8/16] (narrow) %v7858_v8, 8  ;;  %11819 = vst [vmem:[#allocation51_spill] sm:$0xff] %v10061_v10  ;;  %v11823_v31 = vld [vmem:[#allocation107_spill] sm:$0xff]  ;;  %11825 = vst [vmem:[#allocation50_spill] sm:$0xff] %v10080_v22  ;;  %v3468_v32 = vpack.c.bf16 %v10076_v19, %v10080_v22 }
 0x434   : > { %v10066_v12 = vpop.permute.xlu1 %7653  ;;  %7169 = vmatprep.mubr.msk.bf16.mxu1 %vm3504_vm0, %v3466_v38  ;;  %7091 = vmatprep.mubr.msk.bf16.mxu0 %vm559_vm1, %v11821_v56  ;;  %v7860_v8 = vpack.i.bf16 %v11823_v31, %v11822_v42  ;;  %v7633_v38 = vunpack.i.l.bf16 %v7632_v54  ;;  %v3467_v56 = vpack.c.bf16 %v10061_v10, %v10064_v36  ;;  %v11826_v42 = vld [vmem:[#allocation59_spill] sm:$0xff]  ;;  %v11831_v54 = vld [vmem:[#allocation54_spill] sm:$0xff]  ;;  %v10101_v36 = vmul.f32 %v7634_v63, %v9923_v9 }
 0x435   : > { %v10071_v2 = vpop.permute.xlu0 %7673  ;;  %7196 = vmatpush3.bf16.msra.mxu1 %v7926_v1  ;;  %v11827_v1 = vld [vmem:[#allocation108_spill] sm:$0xff]  ;;  %v11834_v22 = vld [vmem:[#allocation67_spill] sm:$0xff]  ;;  %v11838_v63 = vld [vmem:[#allocation58_spill] sm:$0xff] }
 0x436   : > { %7229 = vmatprep.subr.bf16.mxu1 %v10055_v29  ;;  %v7862_v31 = vpack.i.bf16 %v11827_v1, %v11826_v42  ;;  %11832 = vst [vmem:[#allocation56_spill] sm:$0xff] %v10101_v36  ;;  %v10104_v42 = vmul.f32 %v7633_v38, %v9917_v15  ;;  %v10120_v38 = vmul.f32 %v7638_v23, %v9962_v43  ;;  %v11846_v23 = vld [vmem:[#allocation57_spill] sm:$0xff]  ;;  %v11897_v19 = vld [vmem:[#allocation75_spill] sm:$0xff] }
 0x437   : > { %7861 = vxpose.xlu0.b32.cont [9/16] (narrow) %v7860_v8, 8  ;;  %v7639_v8 = vunpack.i.h.bf16 %v9921_v11  ;;  %v11837_v11 = vld [vmem:[#allocation83_spill] sm:$0xff] }
 0x438   : > { %v10082_v28 = vpop.permute.xlu1 %7658  ;;  %11833 = vst [vmem:[#allocation107_spill] sm:$0xff] %v10104_v42  ;;  %v11839_v24 = vpack.i.bf16 %v11837_v11, %v11838_v63  ;;  %11840 = vst [vmem:[#allocation108_spill] sm:$0xff] %v10120_v38  ;;  %v11843_v11 = vld [vmem:[#allocation79_spill] sm:$0xff]  ;;  %v11844_v63 = vld [vmem:[#allocation52_spill] sm:$0xff] }
 0x439   : > { %v10086_v47 = vpop.permute.xlu0 %3217 }
 0x43a   : > { %7808 = vxpose.xlu1.b32.start [1/16] (narrow) %v11830_v53, 8  ;;  %7170 = vmatmul.mubr.msk.bf16.gmra.mrb[60].mxu1 %vm3504_vm0, %v3467_v56  ;;  %v7864_v56 = vpack.i.bf16 %v9822_v0, %v11835_v18  ;;  %v11841_v0 = vld [vmem:[#allocation69_spill] sm:$0xff] }
 0x43b   : > { %7092 = vmatmul.mubr.msk.bf16.gmra.mrb[144].mxu0 %vm559_vm1, %v11831_v54  ;;  %7863 = vxpose.xlu0.b32.cont [10/16] (narrow) %v7862_v31, 8  ;;  %v10114_v31 = vmul.f32 %v7639_v8, %v9968_v40  ;;  %v7643_v54 = vunpack.i.l.bf16 %v7642_v37  ;;  %v11842_v18 = vld [vmem:[#allocation113_spill] sm:$0xff] }
 0x43c   : > { %v3200_v1 = vpop.permute.xlu1 %3199  ;;  %7173 = vmatprep.mubr.msk.bf16.mxu1 %vm3504_vm0, %v3468_v32  ;;  %7095 = vmatprep.mubr.msk.bf16.mxu0 %vm559_vm1, %v11834_v22  ;;  %v7644_v32 = vunpack.i.h.bf16 %v7642_v37  ;;  %v3469_v22 = vpack.c.bf16 %v10101_v36, %v10104_v42  ;;  %v7866_v8 = vpack.i.bf16 %v11842_v18, %v11841_v0 }
 0x43d   : > { %v10109_v53 = vpop.permute.xlu0 %3221  ;;  %11836 = vst [vmem:[#allocation59_spill] sm:$0xff] %v10114_v31  ;;  %v3470_v40 = vpack.c.bf16 %v10114_v31, %v10120_v38  ;;  %v11879_v38 = vld [vmem:[#allocation43_spill] sm:$0xff] }
 0x43e   : > { %7810 = vxpose.xlu1.b32.cont [2/16] (narrow) %v11839_v24, 8  ;;  %v10137_v37 = vmul.f32 %v7644_v32, %v9964_v50  ;;  %v10140_v24 = vmul.f32 %v7643_v54, %v9960_v61  ;;  %v11855_v61 = vld [vmem:[#allocation61_spill] sm:$0xff]  ;;  %v11886_v31 = vld [vmem:[#allocation19_spill] sm:$0xff] }
 0x43f   : > { %7865 = vxpose.xlu0.b32.cont [11/16] (narrow) %v7864_v56, 8  ;;  %v11845_v56 = vpack.i.bf16 %v11843_v11, %v11844_v63  ;;  %v11849_v11 = vld [vmem:[#allocation96_spill] sm:$0xff]  ;;  %v11850_v63 = vld [vmem:[#allocation81_spill] sm:$0xff] }
 0x440   : > { %v3204_v9 = vpop.permute.xlu1 %3203  ;;  %11847 = vst [vmem:[#allocation82_spill] sm:$0xff] %v10137_v37  ;;  %11848 = vst [vmem:[#allocation53_spill] sm:$0xff] %v10140_v24  ;;  %v3471_v32 = vpack.c.bf16 %v10137_v37, %v10140_v24 }
 0x441   : > { %v10124_v15 = vpop.permute.xlu0 %3223 }
 0x442   : > { %7812 = vxpose.xlu1.b32.cont [3/16] (narrow) %v11845_v56, 8  ;;  %7174 = vmatmul.mubr.msk.bf16.gmra.mrb[64].mxu1 %vm3504_vm0, %v3469_v22  ;;  %v7868_v22 = vpack.i.bf16 %v9841_v45, %v11849_v11  ;;  %v11851_v56 = vld [vmem:[#allocation55_spill] sm:$0xff]  ;;  %v11857_v45 = vld [vmem:[#allocation6_spill] sm:$0xff] }
 0x443   : > { %7096 = vmatmul.mubr.msk.bf16.gmra.mrb[148].mxu0 %vm559_vm1, %v11846_v23  ;;  %7867 = vxpose.xlu0.b32.cont [12/16] (narrow) %v7866_v8, 8  ;;  %v11852_v8 = vpack.i.bf16 %v11850_v63, %v11851_v56  ;;  %v11853_v23 = vld [vmem:[#allocation97_spill] sm:$0xff] }
 0x444   : > { %v10142_v0 = vpop.permute.xlu1 %7668  ;;  %7177 = vmatprep.mubr.msk.bf16.mxu1 %vm3504_vm0, %v3470_v40  ;;  %7109 = vmatprep.mubr.msk.bf16.mxu0 %vm559_vm1, %v3200_v1  ;;  %v7870_v40 = vpack.i.bf16 %v9844_v17, %v11853_v23  ;;  %v11854_v1 = vld [vmem:[#allocation85_spill] sm:$0xff]  ;;  %v11859_v17 = vld [vmem:[#allocation99_spill] sm:$0xff] }
 0x445   : > { %v10146_v18 = vpop.permute.xlu0 %3227  ;;  %v11856_v43 = vpack.i.bf16 %v11854_v1, %v11855_v61  ;;  %v7872_v63 = vpack.i.bf16 %v9871_v49, %v11859_v17  ;;  %v11860_v61 = vld [vmem:[#allocation86_spill] sm:$0xff]  ;;  %v11865_v23 = vld [vmem:[#allocation37_spill] sm:$0xff]  ;;  %v11867_v1 = vld [vmem:[#allocation60_spill] sm:$0xff]  ;;  %v11869_v49 = vpack.i.bf16 %v9874_v62, %v9716_v6 }
 0x446   : > { %7814 = vxpose.xlu1.b32.cont [4/16] (narrow) %v11852_v8, 8  ;;  %v7928_v17 = vld [vmem:[%s11364_s6 + $0x68] sm:$0xff]   ;;  %v7929_v6 = vld [vmem:[%s11364_s6 + $0x70] sm:$0xff]  }
 0x447   : > { %7869 = vxpose.xlu0.b32.cont [13/16] (narrow) %v7868_v22, 8  ;;  %v11858_v22 = vld [vmem:[#allocation30_spill] sm:$0xff] }
 0x448   : > { %v3210_v50 = vpop.permute.xlu1 %3209 }
 0x449   : > { %v10155_v54 = vpop.permute.xlu0 %7683 }
 0x44a   : > { %7816 = vxpose.xlu1.b32.cont [5/16] (narrow) %v11856_v43, 8  ;;  %7178 = vmatmul.mubr.msk.bf16.gmra.mrb[68].mxu1 %vm3504_vm0, %v3471_v32  ;;  %v11861_v43 = vld [vmem:[#allocation71_spill] sm:$0xff] }
 0x44b   : > { %7871 = vxpose.xlu0.b32.cont [14/16] (narrow) %v7870_v40, 8  ;;  %7110 = vmatmul.mubr.msk.bf16.vlgmr.msra.gmra.mrb[152].mxu0 %vm559_vm1, %v9991_v60  ;;  %v11862_v56 = vpack.i.bf16 %v11860_v61, %v11861_v43  ;;  %v11863_v60 = vld [vmem:[#allocation7_spill] sm:$0xff]  ;;  %v11866_v40 = vld [vmem:[#allocation65_spill] sm:$0xff]  ;;  %v11872_v61 = vld [vmem:[#allocation36_spill] sm:$0xff] }
 0x44c   : > { %7352 = vmatpush3.bf16.msra.mxu0 %v11857_v45  ;;  %7197 = vmatprep.mubr.bf16.mxu1 %v11857_v45  ;;  %v10176_v8 = vpop.permute.xlu1 %3213  ;;  %v11868_v45 = vpack.i.bf16 %v11866_v40, %v11867_v1  ;;  %v11873_v43 = vld [vmem:[#allocation84_spill] sm:$0xff]  ;;  %v11876_v40 = vld [vmem:[#allocation13_spill] sm:$0xff] }
 0x44d   : > { %v10167_v11 = vpop.permute.xlu0 %7693  ;;  %7354 = vmatprep.subr.bf16.mxu0 %v11858_v22  ;;  %7113 = vmatprep.mubr.msk.bf16.mxu0 %vm559_vm1, %v3204_v9  ;;  %v11870_v9 = vld [vmem:[#allocation12_spill] sm:$0xff] }
 0x44e   : > { %7818 = vxpose.xlu1.b32.cont [6/16] (narrow) %v11862_v56, 8  ;;  %v11874_v56 = vld [vmem:[#allocation62_spill] sm:$0xff] }
 0x44f   : > { %7873 = vxpose.xlu0.b32.cont [15/16] (narrow) %v7872_v63, 8 }
 0x450   : > { %7356 = vmatpush3.bf16.msra.mxu0 %v11863_v60  ;;  %v10203_v62 = vpop.permute.xlu1 %3215 }
 0x451   : > { %v10179_v32 = vpop.permute.xlu0 %7703  ;;  %7358 = vmatprep.subr.bf16.mxu0 %v11865_v23 }
 0x452   : > { %11864 = vst [vmem:[#allocation54_spill] sm:$0xff] %v10179_v32  ;;  %7820 = vxpose.xlu1.b32.cont [7/16] (narrow) %v11868_v45, 8  ;;  %7198 = vmatmul.mubr.bf16.vlgmr.msra.gmra.mrb[40].mxu1 %v11863_v60  ;;  %v11875_v60 = vpack.i.bf16 %v11873_v43, %v11874_v56  ;;  %v11881_v56 = vld [vmem:[#allocation89_spill] sm:$0xff]  ;;  %v11891_v32 = vld [vmem:[#allocation18_spill] sm:$0xff] }
 0x453   : > { %7875 = vxpose.xlu0.b32.end [16/16] (narrow) %v11869_v49, 8  ;;  %7201 = vmatprep.mubr.bf16.mxu1 %v11870_v9  ;;  %v11878_v49 = vld [vmem:[#allocation3_spill] sm:$0xff] }
 0x454   : > { %7360 = vmatpush3.bf16.msra.mxu0 %v11870_v9  ;;  %7230 = vmatpush3.bf16.msra.mxu1 %v10055_v29  ;;  %v10238_v51 = vpop.permute.xlu1 %3219 }
 0x455   : > { %v10195_v63 = vpop.permute.xlu0 %7713  ;;  %7362 = vmatprep.subr.bf16.mxu0 %v11872_v61  ;;  %7114 = vmatmul.mubr.msk.bf16.gmra.mrb[156].mxu0 %vm559_vm1, %v10006_v26  ;;  %v11877_v26 = vld [vmem:[#allocation5_spill] sm:$0xff] }
 0x456   : > { %11871 = vst [vmem:[#allocation67_spill] sm:$0xff] %v10195_v63  ;;  %7822 = vxpose.xlu1.b32.cont [8/16] (narrow) %v11875_v60, 8  ;;  %7117 = vmatprep.mubr.msk.bf16.mxu0 %vm559_vm1, %v10029_v39  ;;  %v11882_v60 = vld [vmem:[#allocation72_spill] sm:$0xff] }
 0x457   : > { %v10210_v29 = vpop.f32.mrb[96].mxu0  ;;  %7231 = vmatprep.subr.bf16.mxu1 %v7928_v17  ;;  %v11883_v24 = vpack.i.bf16 %v11881_v56, %v11882_v60  ;;  %v10246_v56 = vld [vmem:[%s11364_s6 + $0x80] sm:$0xff]  }
 0x458   : > { %7364 = vmatpush3.bf16.msra.mxu0 %v11876_v40  ;;  %v10213_v1 = vpop.f32.mrb[97].mxu0  ;;  %7232 = vmatpush3.bf16.msra.mxu1 %v7928_v17  ;;  %v5556_v45 = vsub.f32 %v11877_v26, %v10210_v29  ;;  %v11884_v26 = vld [vmem:[#allocation2_spill] sm:$0xff] }
 0x459   : > { %v5554_v9 = vsub.f32 %v11878_v49, %v10213_v1  ;;  %7366 = vmatprep.subr.bf16.mxu0 %v11879_v38  ;;  %v10220_v43 = vpop.f32.mrb[98].mxu0  ;;  %7233 = vmatprep.subr.bf16.mxu1 %v7929_v6  ;;  %v10222_v39 = vpop.permute.xlu0 %7723  ;;  %v11885_v49 = vld [vmem:[#allocation4_spill] sm:$0xff]  ;;  %v11888_v60 = vld [vmem:[#allocation90_spill] sm:$0xff] }
 0x45a   : > { %11880 = vst [vmem:[#allocation68_spill] sm:$0xff] %v10222_v39  ;;  %7824 = vxpose.xlu1.b32.cont [9/16] (narrow) %v11883_v24, 8  ;;  %v10227_v42 = vpop.f32.mrb[99].mxu0  ;;  %7202 = vmatmul.mubr.bf16.gmra.mrb[44].mxu1 %v11876_v40  ;;  %v5557_v63 = vsub.f32 %v11884_v26, %v10220_v43  ;;  %v7930_v39 = vld [vmem:[%s11364_s6 + $0x78] sm:$0xff]   ;;  %v5588_v24 = vmul.f32 %v5556_v45, %v5556_v45 }
 0x45b   : > { %v5586_v17 = vmul.f32 %v5554_v9, %v5554_v9  ;;  %v5555_v34 = vsub.f32 %v11885_v49, %v10227_v42  ;;  %7205 = vmatprep.mubr.bf16.mxu1 %v11886_v31  ;;  %v11887_v9 = vld [vmem:[#allocation42_spill] sm:$0xff]  ;;  %v11889_v26 = vld [vmem:[#allocation73_spill] sm:$0xff] }
 0x45c   : > { %7368 = vmatpush3.bf16.msra.mxu0 %v11886_v31  ;;  %7234 = vmatpush3.bf16.msra.mxu1 %v7929_v6  ;;  %v11890_v49 = vpack.i.bf16 %v11888_v60, %v11889_v26  ;;  %v5589_v6 = vmul.f32 %v5557_v63, %v5557_v63  ;;  %v5622_v7 = vsel %vm5618_vm9, %v5588_v24, 0.0  ;;  %v11895_v60 = vld [vmem:[#allocation9_spill] sm:$0xff] }
 0x45d   : > { %v5587_v40 = vmul.f32 %v5555_v34, %v5555_v34  ;;  %7370 = vmatprep.subr.bf16.mxu0 %v11887_v9  ;;  %7118 = vmatmul.mubr.msk.bf16.gmra.mrb[160].mxu0 %vm559_vm1, %v3210_v50  ;;  %v5619_v31 = vsel %vm5618_vm9, %v5586_v17, 0.0  ;;  %v7729_v50 = vpop.permute.xlu0 %7728  ;;  %v11894_v17 = vld [vmem:[#allocation11_spill] sm:$0xff] }
 0x45e   : > { %7826 = vxpose.xlu1.b32.cont [10/16] (narrow) %v11890_v49, 8  ;;  %7121 = vmatprep.mubr.msk.bf16.mxu0 %vm559_vm1, %v10044_v14  ;;  %v11892_v49 = vld [vmem:[#allocation49_spill] sm:$0xff]  ;;  %v10263_v14 = vpop.permute.xlu1 %7678  ;;  %v5624_v13 = vsel %vm5618_vm9, %v5589_v6, 0.0  ;;  %v7731_v36 = vunpack.i.h.bf16 %v7729_v50  ;;  %v7730_v52 = vunpack.i.l.bf16 %v7729_v50 }
 0x45f   : > { %v5620_v34 = vsel %vm5618_vm9, %v5587_v40, 0.0  ;;  %7235 = vmatprep.subr.bf16.mxu1 %v7930_v39  ;;  %11893 = vst [vmem:[#allocation83_spill] sm:$0xff] %v10263_v14 }
 0x460   : > { %v5621_v45 = vadd.f32 %v5620_v34, %v5619_v31  ;;  %v10255_v37 = vpop.f32.mrb[100].mxu0  ;;  %7372 = vmatpush3.bf16.msra.mxu0 %v11891_v32  ;;  %7236 = vmatpush3.bf16.msra.mxu1 %v7930_v39  ;;  %v11896_v39 = vld [vmem:[#allocation87_spill] sm:$0xff] }
 0x461   : > { %v10259_v26 = vpop.f32.mrb[101].mxu0  ;;  %7374 = vmatprep.subr.bf16.mxu0 %v11892_v49  ;;  %7269 = vmatprep.subr.bf16.mxu1 %v10246_v56  ;;  %v5560_v40 = vsub.f32 %v11894_v17, %v10255_v37  ;;  %v11898_v24 = vpack.i.bf16 %v11896_v39, %v11897_v19  ;;  %v11902_v19 = vld [vmem:[#allocation48_spill] sm:$0xff] }
 0x462   : > { %v5623_v63 = vadd.f32 %v5622_v7, %v5621_v45  ;;  %v5558_v31 = vsub.f32 %v11895_v60, %v10259_v26  ;;  %v10269_v34 = vpop.f32.mrb[102].mxu0  ;;  %7206 = vmatmul.mubr.bf16.gmra.mrb[48].mxu1 %v11891_v32  ;;  %v11899_v7 = vld [vmem:[#allocation25_spill] sm:$0xff]  ;;  %v11900_v60 = vld [vmem:[#allocation8_spill] sm:$0xff] }
 0x463   : > { %7828 = vxpose.xlu1.b32.cont [11/16] (narrow) %v11898_v24, 8  ;;  %v10276_v10 = vpop.f32.mrb[103].mxu0  ;;  %7209 = vmatprep.mubr.bf16.mxu1 %v11899_v7  ;;  %v5561_v27 = vsub.f32 %v11900_v60, %v10269_v34  ;;  %v5592_v32 = vmul.f32 %v5560_v40, %v5560_v40  ;;  %v11903_v39 = vld [vmem:[#allocation88_spill] sm:$0xff]  ;;  %v7381_v24 = vpack.c.bf16 %v7731_v36, %v7730_v52  ;;  %v3226_v60 = vpop.permute.xlu1 %3225  ;;  %v11910_v36 = vld [vmem:[#allocation94_spill] sm:$0xff] }
 0x464   : > { %v5590_v45 = vmul.f32 %v5558_v31, %v5558_v31  ;;  %v5625_v17 = vadd.f32 %v5624_v13, %v5623_v63  ;;  %v5559_v58 = vsub.f32 %v11901_v57, %v10276_v10  ;;  %7376 = vmatpush3.bf16.msra.mxu0 %v11899_v7  ;;  %v11904_v31 = vld [vmem:[#allocation74_spill] sm:$0xff] }
 0x465   : > { %7378 = vmatprep.subr.bf16.mxu0 %v11902_v19  ;;  %7122 = vmatmul.mubr.msk.bf16.gmra.mrb[164].mxu0 %vm559_vm1, %v10176_v8  ;;  %v11905_v13 = vpack.i.bf16 %v11903_v39, %v11904_v31  ;;  %v5593_v7 = vmul.f32 %v5561_v27, %v5561_v27  ;;  %v5630_v40 = vsel %vm5618_vm9, %v5592_v32, 0.0  ;;  %v11914_v32 = vld [vmem:[#allocation80_spill] sm:$0xff]  ;;  %v11917_v31 = vld [vmem:[#allocation78_spill] sm:$0xff] }
 0x466   : > { %v5626_v6 = vsel %vm5618_vm9, %v5590_v45, 0.0  ;;  %v5591_v50 = vmul.f32 %v5559_v58, %v5559_v58  ;;  %7125 = vmatprep.mubr.msk.bf16.mxu0 %vm559_vm1, %v10203_v62  ;;  %v11907_v58 = vld [vmem:[#allocation93_spill] sm:$0xff]  ;;  %v11908_v45 = vld [vmem:[#allocation76_spill] sm:$0xff] }
 0x467   : > { %7830 = vxpose.xlu1.b32.cont [12/16] (narrow) %v11905_v13, 8  ;;  %v5627_v63 = vadd.f32 %v5626_v6, %v5625_v17  ;;  %v11909_v14 = vpack.i.bf16 %v11907_v58, %v11908_v45  ;;  %v5632_v52 = vsel %vm5618_vm9, %v5593_v7, 0.0  ;;  %v11911_v62 = vld [vmem:[#allocation77_spill] sm:$0xff]  ;;  %v11922_v58 = vld [vmem:[#allocation95_spill] sm:$0xff] }
 0x468   : > { %v5628_v57 = vsel %vm5618_vm9, %v5591_v50, 0.0  ;;  %7380 = vmatpush3.bf16.msra.mxu0 %v11906_v48  ;;  %v11912_v17 = vpack.i.bf16 %v11910_v36, %v11911_v62  ;;  %v11916_v50 = vld [vmem:[#allocation92_spill] sm:$0xff] }
 0x469   : > { %v5629_v8 = vadd.f32 %v5628_v57, %v5627_v63  ;;  %7382 = vmatprep.subr.bf16.mxu0 %v7381_v24  ;;  %v3230_v57 = vpop.permute.xlu1 %3229 }
 0x46a   : > { %7210 = vmatmul.mubr.bf16.gmra.mrb[52].mxu1 %v11906_v48  ;;  %v11913_v48 = vld [vmem:[#allocation91_spill] sm:$0xff] }
 0x46b   : > { %7832 = vxpose.xlu1.b32.cont [13/16] (narrow) %v11909_v14, 8  ;;  %v5631_v39 = vadd.f32 %v5630_v40, %v5629_v8  ;;  %7213 = vmatprep.mubr.bf16.mxu1 %v11803_v3  ;;  %v10311_v14 = vpop.permute.xlu0 %7743  ;;  %v11915_v3 = vpack.i.bf16 %v11913_v48, %v11914_v32  ;;  %v7650_v40 = vunpack.i.h.bf16 %v9947_v16  ;;  %v7661_v48 = vunpack.i.h.bf16 %v10082_v28 }
 0x46c   : > { %v7655_v32 = vunpack.i.l.bf16 %v10066_v12 }
 0x46d   : > { %7126 = vmatmul.mubr.msk.bf16.gmra.mrb[168].mxu0 %vm559_vm1, %v10086_v47  ;;  %v10304_v27 = vadd.f32 %v5632_v52, %v5631_v39  ;;  %v10318_v47 = vpop.permute.xlu1 %7688  ;;  %v7649_v39 = vunpack.i.l.bf16 %v9947_v16  ;;  %v11925_v16 = vld [vmem:[#allocation111_spill] sm:$0xff] }
 0x46e   : > { %7129 = vmatprep.mubr.msk.bf16.mxu0 %vm559_vm1, %v10238_v51  ;;  %v11918_v51 = vpack.i.bf16 %v11916_v50, %v11917_v31  ;;  %v7660_v50 = vunpack.i.l.bf16 %v10082_v28  ;;  %v10405_v31 = vmul.f32 %v7661_v48, %v10276_v10  ;;  %v7666_v10 = vunpack.i.h.bf16 %v9970_v21  ;;  %v10467_v48 = vld [vmem:[%s11364_s6 + $0xa0] sm:$0xff]  }
 0x46f   : > { %7834 = vxpose.xlu1.b32.cont [14/16] (narrow) %v11912_v17, 8  ;;  %v10320_v6 = vpop.permute.xlu0 %7753  ;;  %v10383_v62 = vmul.f32 %v7649_v39, %v10213_v1 }
 0x471   : > { %v10329_v13 = vpop.permute.xlu1 %7698 }
 0x472   : > { %7214 = vmatmul.mubr.bf16.gmra.mrb[56].mxu1 %v11858_v22  ;;  %v10332_v22 = vpop.f32.mrb[32].mxu1 }
 0x473   : > { %7836 = vxpose.xlu1.b32.cont [15/16] (narrow) %v11915_v3, 8  ;;  %7217 = vmatprep.mubr.bf16.mxu1 %v11865_v23  ;;  %v10334_v23 = vpop.permute.xlu0 %7763  ;;  %v10337_v63 = vpop.f32.mrb[33].mxu1 }
 0x474   : > { %v10341_v24 = vpop.f32.mrb[34].mxu1 }
 0x475   : > { %7130 = vmatmul.mubr.msk.bf16.gmra.mrb[172].mxu0 %vm559_vm1, %v10109_v53  ;;  %v11919_v53 = vld [vmem:[#allocation70_spill] sm:$0xff]  ;;  %v10346_v7 = vpop.f32.mrb[35].mxu1 }
 0x476   : > { %7133 = vmatprep.mubr.msk.bf16.mxu0 %vm559_vm1, %v10124_v15 }
 0x477   : > { %7838 = vxpose.xlu1.b32.end [16/16] (narrow) %v11918_v51, 8  ;;  %v10356_v8 = vpop.permute.xlu0 %7773  ;;  %v10410_v51 = vmul.f32 %v7655_v32, %v10210_v29 }
 0x47a   : > { %7218 = vmatmul.mubr.bf16.gmra.mrb[60].mxu1 %v11872_v61  ;;  %v10352_v61 = vpop.permute.xlu1 %7708 }
 0x47b   : > { %7221 = vmatprep.mubr.bf16.mxu1 %v11879_v38  ;;  %v10385_v17 = vpop.permute.xlu0 %7783 }
 0x47c   : > { %5329 = vrot.lane.b32.xlu0 %v11919_v53, %s8300_s11  ;;  %v10434_v53 = vmul.f32 %v7666_v10, %v10269_v34 }
 0x47d   : > { %7134 = vmatmul.mubr.msk.bf16.gmra.mrb[176].mxu0 %vm559_vm1, %v3226_v60  ;;  %v10359_v60 = vpop.f32.mrb[36].mxu1 }
 0x47e   : > { %7137 = vmatprep.mubr.msk.bf16.mxu0 %vm559_vm1, %v10146_v18  ;;  %11920 = vst [vmem:[#allocation58_spill] sm:$0xff] %v10359_v60  ;;  %v10363_v18 = vpop.f32.mrb[37].mxu1 }
 0x47f   : > { %11921 = vst [vmem:[#allocation69_spill] sm:$0xff] %v10363_v18  ;;  %v10367_v45 = vpop.f32.mrb[38].mxu1 }
 0x480   : > { %5730 = vrot.lane.b32.xlu0 %v9859_v20, %s8304_s22  ;;  %11923 = vst [vmem:[#allocation113_spill] sm:$0xff] %v10367_v45  ;;  %v10371_v20 = vmul.f32 %v7650_v40, %v10227_v42  ;;  %v10376_v52 = vpop.f32.mrb[39].mxu1  ;;  %v11926_v40 = vld [vmem:[#allocation64_spill] sm:$0xff] }
 0x481   : > { %11924 = vst [vmem:[#allocation79_spill] sm:$0xff] %v10376_v52 }
 0x482   : > { %7222 = vmatmul.mubr.bf16.gmra.mrb[64].mxu1 %v11887_v9  ;;  %v3923_v42 = vpack.c.bf16 %v10371_v20, %v10383_v62 }
 0x483   : > { %7225 = vmatprep.mubr.bf16.mxu1 %v11892_v49  ;;  %v10378_v49 = vpop.permute.xlu1 %7718 }
 0x484   : > { %5325 = vrot.lane.b32.xlu0 %v11922_v58, %s8300_s11  ;;  %v7933_v58 = vld [vmem:[%s11364_s6 + $0x90] sm:$0xff]  }
 0x485   : > { %7138 = vmatmul.mubr.msk.bf16.gmra.mrb[180].mxu0 %vm559_vm1, %v3230_v57  ;;  %v7656_v57 = vunpack.i.h.bf16 %v10066_v12  ;;  %v10413_v12 = vmul.f32 %v7660_v50, %v10259_v26  ;;  %v11931_v50 = vld [vmem:[#allocation110_spill] sm:$0xff]  ;;  %vm5886_vm1 = vcmask 523520  }
 0x487   : > { %v10397_v1 = vmul.f32 %v7656_v57, %v10220_v43  ;;  %v10399_v3 = vpop.permute.xlu1 %7733  ;;  %v3925_v28 = vpack.c.bf16 %v10405_v31, %v10413_v12  ;;  %v11930_v57 = vld [vmem:[#allocation100_spill] sm:$0xff] }
 0x488   : > { %5726 = vrot.lane.b32.xlu0 %v11925_v16, %s8304_s22  ;;  %v11927_v16 = vld [vmem:[#allocation66_spill] sm:$0xff] }
 0x489   : > { %v3924_v43 = vpack.c.bf16 %v10397_v1, %v10410_v51 }
 0x48a   : > { %7226 = vmatmul.mubr.bf16.gmra.mrb[68].mxu1 %v11902_v19  ;;  %v10407_v19 = vpop.permute.xlu0 %7793 }
 0x48b   : > { %7237 = vmatprep.mubr.msk.bf16.mxu1 %vm3504_vm0, %v3923_v42  ;;  %v10425_v29 = vpop.permute.xlu1 %7738  ;;  %v11929_v42 = vld [vmem:[#allocation118_spill] sm:$0xff] }
 0x48c   : > { %5335 = vrot.lane.b32.xlu0 %v9705_v4, %s8300_s11  ;;  %v7932_v4 = vld [vmem:[%s11364_s6 + $0x88] sm:$0xff]  }
 0x48e   : > { %v10428_v26 = vpop.permute.xlu0 %7803 }
 0x48f   : > { %v10450_v34 = vpop.permute.xlu1 %7748 }
 0x490   : > { %5738 = vrot.lane.b32.xlu0 %v9901_v25, %s8304_s22  ;;  %v7665_v25 = vunpack.i.l.bf16 %v9970_v21 }
 0x492   : > { %7238 = vmatmul.mubr.msk.bf16.vlgmr.msra.gmra.mrb[40].mxu1 %vm3504_vm0, %v3924_v43  ;;  %v10444_v39 = vmul.f32 %v7665_v25, %v10255_v37  ;;  %v7934_v37 = vld [vmem:[%s11364_s6 + $0x98] sm:$0xff]  }
 0x493   : > { %7241 = vmatprep.mubr.msk.bf16.mxu1 %vm3504_vm0, %v3925_v28  ;;  %7270 = vmatpush3.bf16.msra.mxu1 %v10246_v56  ;;  %v10469_v32 = vpop.permute.xlu1 %7758  ;;  %v11932_v28 = vld [vmem:[#allocation98_spill] sm:$0xff] }
 0x494   : > { %5337 = vrot.lane.b32.xlu0 %v9718_v30, %s8300_s11  ;;  %7271 = vmatprep.subr.bf16.mxu1 %v7932_v4  ;;  %v3926_v21 = vpack.c.bf16 %v10434_v53, %v10444_v39  ;;  %v11928_v30 = vld [vmem:[#allocation117_spill] sm:$0xff] }
 0x495   : > { %5327 = vrot.lane.b32.xlu1 %v11926_v40, %s8300_s11  ;;  %v11935_v40 = vld [vmem:[#allocation124_spill] sm:$0xff] }
 0x497   : > { %7272 = vmatpush3.bf16.msra.mxu1 %v7932_v4  ;;  %v10446_v56 = vpop.trf.xlu0  ;;  %v10476_v43 = vpop.permute.xlu1 %7768  ;;  %v11933_v4 = vld [vmem:[#allocation101_spill] sm:$0xff] }
 0x498   : > { %5734 = vrot.lane.b32.xlu0 %v11928_v30, %s8304_s22  ;;  %7273 = vmatprep.subr.bf16.mxu1 %v7933_v58  ;;  %v7670_v30 = vunpack.i.l.bf16 %v10142_v0 }
 0x499   : > { %5323 = vrot.lane.b32.xlu1 %v11927_v16, %s8300_s11  ;;  %v7671_v16 = vunpack.i.h.bf16 %v10142_v0  ;;  %v7741_v0 = vunpack.i.h.bf16 %v10425_v29 }
 0x49a   : > { %7242 = vmatmul.mubr.msk.bf16.gmra.mrb[44].mxu1 %vm3504_vm0, %v3926_v21  ;;  %v7676_v21 = vunpack.i.h.bf16 %v10071_v2 }
 0x49b   : > { %7274 = vmatpush3.bf16.msra.mxu1 %v7933_v58  ;;  %v10486_v10 = vpop.permute.xlu1 %7778 }
 0x49c   : > { %5333 = vrot.lane.b32.xlu0 %v11930_v57, %s8300_s11  ;;  %7275 = vmatprep.subr.bf16.mxu1 %v7934_v37  ;;  %v7735_v57 = vunpack.i.l.bf16 %v10399_v3 }
 0x49d   : > { %5732 = vrot.lane.b32.xlu1 %v11929_v42, %s8304_s22  ;;  %v7736_v42 = vunpack.i.h.bf16 %v10399_v3  ;;  %v7765_v3 = vunpack.i.l.bf16 %v10334_v23 }
 0x49f   : > { %7276 = vmatpush3.bf16.msra.mxu1 %v7934_v37  ;;  %v10492_v25 = vpop.permute.xlu1 %7788  ;;  %v7745_v37 = vunpack.i.l.bf16 %v10311_v14  ;;  %v7383_v9 = vpack.c.bf16 %v7736_v42, %v7735_v57  ;;  %v7761_v42 = vunpack.i.h.bf16 %v10469_v32  ;;  %v11940_v57 = vld [vmem:[#allocation14_spill] sm:$0xff] }
 0x4a0   : > { %5343 = vrot.lane.b32.xlu0 %v9741_v44, %s8300_s11  ;;  %7309 = vmatprep.subr.bf16.mxu1 %v10467_v48  ;;  %v11934_v44 = vld [vmem:[#allocation116_spill] sm:$0xff] }
 0x4a1   : > { %5728 = vrot.lane.b32.xlu1 %v11931_v50, %s8304_s22  ;;  %v7755_v50 = vunpack.i.l.bf16 %v10320_v6 }
 0x4a3   : > { %v10502_v58 = vpop.permute.xlu1 %7798 }
 0x4a4   : > { %5339 = vrot.lane.b32.xlu0 %v11933_v4, %s8300_s11 }
 0x4a5   : > { %5331 = vrot.lane.b32.xlu1 %v11932_v28, %s8300_s11  ;;  %v7740_v28 = vunpack.i.l.bf16 %v10425_v29 }
 0x4a8   : > { %5746 = vrot.lane.b32.xlu0 %v9943_v46, %s8304_s22  ;;  %v11937_v46 = vld [vmem:[#allocation102_spill] sm:$0xff] }
 0x4a9   : > { %5740 = vrot.lane.b32.xlu1 %v9898_v33, %s8304_s22  ;;  %v11936_v33 = vld [vmem:[#allocation123_spill] sm:$0xff] }
 0x4ac   : > { %5345 = vrot.lane.b32.xlu0 %v9756_v5, %s8300_s11  ;;  %v7675_v5 = vunpack.i.l.bf16 %v10071_v2  ;;  %v7756_v2 = vunpack.i.h.bf16 %v10320_v6  ;;  %v11938_v6 = vld [vmem:[#allocation103_spill] sm:$0xff] }
 0x4ad   : > { %5736 = vrot.lane.b32.xlu1 %v11934_v44, %s8304_s22 }
 0x4b0   : > { %5742 = vrot.lane.b32.xlu0 %v11935_v40, %s8304_s22  ;;  %v7385_v40 = vpack.c.bf16 %v7741_v0, %v7740_v28 }
 0x4b1   : > { %5748 = vrot.lane.b32.xlu1 %v9940_v35, %s8304_s22  ;;  %v7746_v35 = vunpack.i.h.bf16 %v10311_v14  ;;  %v7751_v14 = vunpack.i.h.bf16 %v10450_v34 }
 0x4b3   : > { %v7387_v15 = vpack.c.bf16 %v7746_v35, %v7745_v37  ;;  %v11941_v35 = vld [vmem:[#allocation16_spill] sm:$0xff] }
 0x4b4   : > { %5341 = vrot.lane.b32.xlu0 %v11937_v46, %s8300_s11  ;;  %v11939_v46 = vld [vmem:[#allocation83_spill] sm:$0xff] }
 0x4b5   : > { %5744 = vrot.lane.b32.xlu1 %v11936_v33, %s8304_s22  ;;  %v7750_v33 = vunpack.i.l.bf16 %v10450_v34 }
 0x4b7   : > { %v7389_v28 = vpack.c.bf16 %v7751_v14, %v7750_v33 }
 0x4b8   : > { %5351 = vrot.lane.b32.xlu0 %v9776_v41, %s8300_s11  ;;  %v7391_v41 = vpack.c.bf16 %v7756_v2, %v7755_v50  ;;  %v7760_v2 = vunpack.i.l.bf16 %v10469_v32  ;;  %v7771_v32 = vunpack.i.h.bf16 %v10476_v43 }
 0x4b9   : > { %5756 = vrot.lane.b32.xlu1 %v9983_v55, %s8304_s22 }
 0x4bb   : > { %v7839_v55 = vpop.trf.xlu1 }
 0x4bc   : > { %v7840_v4 = vunpack.i.l.bf16 %v7839_v55  ;;  %v7843_v44 = vunpack.i.h.bf16 %v7839_v55  ;;  %5347 = vrot.lane.b32.xlu0 %v11938_v6, %s8300_s11  ;;  %v7766_v6 = vunpack.i.h.bf16 %v10334_v23  ;;  %v11943_v23 = vld [vmem:[#allocation15_spill] sm:$0xff] }
 0x4bd   : > { %5752 = vrot.lane.b32.xlu1 %v9955_v59, %s8304_s22  ;;  %v11944_v59 = vld [vmem:[#allocation133_spill] sm:$0xff] }
 0x4be   : > { %5021 = vmatprep.mubr.f32.mxu0 %v7843_v44  ;;  %v7051_v34 = vpop.f32.mrb[104].mxu0  ;;  %v7395_v14 = vpack.c.bf16 %v7766_v6, %v7765_v3  ;;  %v7776_v3 = vunpack.i.h.bf16 %v10356_v8  ;;  %v7785_v6 = vunpack.i.l.bf16 %v10385_v17 }
 0x4bf   : > { %5022 = vmatmul.mubr.f32.vlgmr.msra.gmra.mrb[184].mxu0 %v7840_v4  ;;  %v2431_v29 = vpop.f32.mrb[105].mxu0  ;;  %v5564_v44 = vsub.f32 %v11940_v57, %v7051_v34  ;;  %v11942_v4 = vld [vmem:[#allocation136_spill] sm:$0xff]  ;;  %v10542_v50 = vmul.f32 %v7675_v5, %v7051_v34  ;;  %v7770_v5 = vunpack.i.l.bf16 %v10476_v43 }
 0x4c0   : > { %7384 = vmatpush3.bf16.msra.mxu0 %v7383_v9  ;;  %v5562_v37 = vsub.f32 %v11941_v35, %v2431_v29  ;;  %v7052_v0 = vpop.f32.mrb[106].mxu0  ;;  %5754 = vrot.lane.b32.xlu0 %v11944_v59, %s8304_s22 }
 0x4c1   : > { %7386 = vmatprep.subr.bf16.mxu0 %v7385_v40  ;;  %5764 = vrot.lane.b32.xlu1 %v11942_v4, %s8304_s22  ;;  %v10544_v38 = vmul.f32 %v7676_v21, %v7052_v0  ;;  %v5565_v9 = vsub.f32 %v11943_v23, %v7052_v0  ;;  %v2434_v55 = vpop.f32.mrb[107].mxu0  ;;  %v10549_v40 = vmul.f32 %v7670_v30, %v2431_v29  ;;  %v11945_v4 = vld [vmem:[#allocation17_spill] sm:$0xff]  ;;  %v7781_v0 = vunpack.i.h.bf16 %v10486_v10 }
 0x4c2   : > { %v5594_v36 = vmul.f32 %v5562_v37, %v5562_v37  ;;  %v10551_v60 = vmul.f32 %v7671_v16, %v2434_v55  ;;  %v5563_v45 = vsub.f32 %v11945_v4, %v2434_v55  ;;  %v5596_v33 = vmul.f32 %v5564_v44, %v5564_v44  ;;  %v11946_v16 = vld [vmem:[#allocation134_spill] sm:$0xff] }
 0x4c3   : > { %v3928_v21 = vpack.c.bf16 %v10544_v38, %v10542_v50  ;;  %v7775_v55 = vunpack.i.l.bf16 %v10356_v8  ;;  %v5597_v59 = vmul.f32 %v5565_v9, %v5565_v9  ;;  %v7393_v37 = vpack.c.bf16 %v7761_v42, %v7760_v2  ;;  %v11948_v8 = vld [vmem:[#allocation20_spill] sm:$0xff]  ;;  %v11950_v42 = vld [vmem:[#allocation51_spill] sm:$0xff] }
 0x4c4   : > { %7388 = vmatpush3.bf16.msra.mxu0 %v7387_v15  ;;  %v5634_v34 = vsel %vm5618_vm9, %v5594_v36, 0.0  ;;  %v3927_v30 = vpack.c.bf16 %v10551_v60, %v10549_v40  ;;  %v5595_v29 = vmul.f32 %v5563_v45, %v5563_v45  ;;  %v11947_v15 = vld [vmem:[#allocation105_spill] sm:$0xff]  ;;  %v7786_v36 = vunpack.i.h.bf16 %v10385_v17 }
 0x4c5   : > { %7390 = vmatprep.subr.bf16.mxu0 %v7389_v28  ;;  %5760 = vrot.lane.b32.xlu1 %v11946_v16, %s8304_s22  ;;  %v5635_v43 = vadd.f32 %v5634_v34, %v10304_v27  ;;  %v7397_v34 = vpack.c.bf16 %v7771_v32, %v7770_v5  ;;  %v7780_v16 = vunpack.i.l.bf16 %v10486_v10  ;;  %v7791_v17 = vunpack.i.h.bf16 %v10492_v25  ;;  %v11952_v32 = vld [vmem:[#allocation21_spill] sm:$0xff]  ;;  %v11953_v5 = vld [vmem:[#allocation31_spill] sm:$0xff] }
 0x4c6   : > { %5353 = vrot.lane.b32.xlu0 %v11947_v15, %s8300_s11  ;;  %v5636_v45 = vsel %vm5618_vm9, %v5595_v29, 0.0  ;;  %v7055_v44 = vpop.f32.mrb[108].mxu0  ;;  %7245 = vmatprep.mubr.msk.bf16.mxu1 %vm3504_vm0, %v3927_v30  ;;  %v5638_v29 = vsel %vm5618_vm9, %v5596_v33, 0.0  ;;  %v11949_v15 = vld [vmem:[#allocation22_spill] sm:$0xff] }
 0x4c7   : > { %v5637_v28 = vadd.f32 %v5636_v45, %v5635_v43  ;;  %v5568_v27 = vsub.f32 %v11948_v8, %v7055_v44  ;;  %v2447_v9 = vpop.f32.mrb[109].mxu0  ;;  %7246 = vmatmul.mubr.msk.bf16.gmra.mrb[48].mxu1 %vm3504_vm0, %v3928_v21  ;;  %v11951_v45 = vunpack.i.h.bf16 %v10155_v54 }
 0x4c8   : > { %7392 = vmatpush3.bf16.msra.mxu0 %v7391_v41  ;;  %v5566_v30 = vsub.f32 %v11949_v15, %v2447_v9  ;;  %v7056_v2 = vpop.f32.mrb[110].mxu0  ;;  %v5640_v41 = vsel %vm5618_vm9, %v5597_v59, 0.0  ;;  %v11956_v59 = vld [vmem:[#allocation23_spill] sm:$0xff] }
 0x4c9   : > { %7394 = vmatprep.subr.bf16.mxu0 %v7393_v37  ;;  %5772 = vrot.lane.b32.xlu1 %v11950_v42, %s8304_s22  ;;  %v5639_v43 = vadd.f32 %v5638_v29, %v5637_v28  ;;  %v10584_v21 = vmul.f32 %v11951_v45, %v7056_v2  ;;  %v5569_v10 = vsub.f32 %v11952_v32, %v7056_v2  ;;  %v2450_v33 = vpop.f32.mrb[111].mxu0  ;;  %v11954_v37 = vunpack.i.l.bf16 %v11939_v46 }
 0x4ca   : > { %5750 = vrot.lane.b32.xlu0 %v11953_v5, %s8304_s22  ;;  %v5598_v15 = vmul.f32 %v5566_v30, %v5566_v30  ;;  %v11955_v42 = vunpack.i.h.bf16 %v11939_v46  ;;  %v5567_v28 = vsub.f32 %v11956_v59, %v2450_v33  ;;  %v7790_v29 = vunpack.i.l.bf16 %v10492_v25  ;;  %v11958_v46 = vld [vmem:[#allocation139_spill] sm:$0xff] }
 0x4cb   : > { %v10591_v8 = vmul.f32 %v11954_v37, %v2447_v9  ;;  %v11957_v45 = vunpack.i.l.bf16 %v10155_v54  ;;  %v5600_v32 = vmul.f32 %v5568_v27, %v5568_v27  ;;  %v5641_v5 = vadd.f32 %v5640_v41, %v5639_v43 }
 0x4cc   : > { %v10595_v18 = vmul.f32 %v11955_v42, %v2450_v33  ;;  %7396 = vmatpush3.bf16.msra.mxu0 %v7395_v14  ;;  %v5642_v52 = vsel %vm5618_vm9, %v5598_v15, 0.0  ;;  %v5599_v30 = vmul.f32 %v5567_v28, %v5567_v28  ;;  %v7880_v33 = vunpack.i.h.bf16 %v10446_v56  ;;  %v11959_v14 = vld [vmem:[#allocation106_spill] sm:$0xff] }
 0x4cd   : > { %v10601_v2 = vmul.f32 %v11957_v45, %v7055_v44  ;;  %7398 = vmatprep.subr.bf16.mxu0 %v7397_v34  ;;  %5768 = vrot.lane.b32.xlu1 %v11958_v46, %s8304_s22  ;;  %v7399_v25 = vpack.c.bf16 %v7776_v3, %v7775_v55  ;;  %v5643_v37 = vadd.f32 %v5642_v52, %v5641_v5  ;;  %v7796_v15 = vunpack.i.h.bf16 %v10407_v19  ;;  %v11960_v28 = vld [vmem:[#allocation26_spill] sm:$0xff]  ;;  %v11961_v5 = vld [vmem:[#allocation28_spill] sm:$0xff] }
 0x4ce   : > { %v3929_v9 = vpack.c.bf16 %v10595_v18, %v10591_v8  ;;  %v5601_v44 = vmul.f32 %v5569_v10, %v5569_v10  ;;  %5349 = vrot.lane.b32.xlu0 %v11959_v14, %s8300_s11  ;;  %v7403_v27 = vpack.c.bf16 %v7786_v36, %v7785_v6  ;;  %v5644_v41 = vsel %vm5618_vm9, %v5599_v30, 0.0  ;;  %v7059_v34 = vpop.f32.mrb[112].mxu0  ;;  %5283 = vmatprep.mubr.f32.mxu0 %v7880_v33 }
 0x4cf   : > { %v3930_v54 = vpack.c.bf16 %v10584_v21, %v10601_v2  ;;  %v7401_v43 = vpack.c.bf16 %v7781_v0, %v7780_v16  ;;  %v7795_v3 = vunpack.i.l.bf16 %v10407_v19  ;;  %v7801_v52 = vunpack.i.h.bf16 %v10502_v58  ;;  %v2463_v10 = vpop.f32.mrb[113].mxu0  ;;  %v11962_v16 = vld [vmem:[#allocation56_spill] sm:$0xff] }
 0x4d0   : > { %7249 = vmatprep.mubr.msk.bf16.mxu1 %vm3504_vm0, %v3929_v9  ;;  %v5645_v55 = vadd.f32 %v5644_v41, %v5643_v37  ;;  %7400 = vmatpush3.bf16.msra.mxu0 %v7399_v25  ;;  %v7405_v42 = vpack.c.bf16 %v7791_v17, %v7790_v29  ;;  %v7800_v36 = vunpack.i.l.bf16 %v10502_v58  ;;  %v5646_v6 = vsel %vm5618_vm9, %v5600_v32, 0.0  ;;  %v7060_v19 = vpop.f32.mrb[114].mxu0  ;;  %v11964_v17 = vld [vmem:[#allocation27_spill] sm:$0xff]  ;;  %v11965_v32 = vld [vmem:[#allocation112_spill] sm:$0xff] }
 0x4d1   : > { %7250 = vmatmul.mubr.msk.bf16.gmra.mrb[52].mxu1 %vm3504_vm0, %v3930_v54  ;;  %v5572_v45 = vsub.f32 %v11960_v28, %v7059_v34  ;;  %7402 = vmatprep.subr.bf16.mxu0 %v7401_v43  ;;  %v5570_v0 = vsub.f32 %v11961_v5, %v2463_v10  ;;  %v5648_v9 = vsel %vm5618_vm9, %v5601_v44, 0.0  ;;  %v11963_v46 = vunpack.i.h.bf16 %v10167_v11  ;;  %v2466_v29 = vpop.f32.mrb[115].mxu0  ;;  %v11968_v44 = vld [vmem:[#allocation29_spill] sm:$0xff] }
 0x4d2   : > { %5780 = vrot.lane.b32.xlu1 %v11962_v16, %s8304_s22  ;;  %v5647_v30 = vadd.f32 %v5646_v6, %v5645_v55  ;;  %v5573_v58 = vsub.f32 %v11964_v17, %v7060_v19  ;;  %5355 = vrot.lane.b32.xlu0 %v11965_v32, %s8300_s11  ;;  %v11966_v25 = vunpack.i.l.bf16 %v10318_v47  ;;  %v11967_v14 = vunpack.i.h.bf16 %v10318_v47 }
 0x4d3   : > { %v10628_v33 = vmul.f32 %v11963_v46, %v7060_v19  ;;  %v5602_v54 = vmul.f32 %v5570_v0, %v5570_v0  ;;  %v5571_v43 = vsub.f32 %v11968_v44, %v2466_v29  ;;  %v7806_v55 = vunpack.i.h.bf16 %v10428_v26 }
 0x4d4   : > { %v10635_v37 = vmul.f32 %v11966_v25, %v2463_v10  ;;  %v10639_v41 = vmul.f32 %v11967_v14, %v2466_v29  ;;  %v7805_v6 = vunpack.i.l.bf16 %v10428_v26  ;;  %v11969_v16 = vunpack.i.l.bf16 %v10167_v11  ;;  %7404 = vmatpush3.bf16.msra.mxu0 %v7403_v27  ;;  %v11970_v29 = vld [vmem:[#allocation63_spill] sm:$0xff]  ;;  %v11972_v27 = vld [vmem:[#allocation54_spill] sm:$0xff] }
 0x4d5   : > { %v5649_v46 = vadd.f32 %v5648_v9, %v5647_v30  ;;  %v5604_v32 = vmul.f32 %v5572_v45, %v5572_v45  ;;  %v5650_v10 = vsel %vm5618_vm9, %v5602_v54, 0.0  ;;  %v5603_v0 = vmul.f32 %v5571_v43, %v5571_v43  ;;  %7406 = vmatprep.subr.bf16.mxu0 %v7405_v42 }
 0x4d6   : > { %v10646_v19 = vmul.f32 %v11969_v16, %v7059_v34  ;;  %v3931_v47 = vpack.c.bf16 %v10639_v41, %v10635_v37  ;;  %5776 = vrot.lane.b32.xlu1 %v11970_v29, %s8304_s22  ;;  %v7407_v25 = vpack.c.bf16 %v7796_v15, %v7795_v3  ;;  %v5605_v26 = vmul.f32 %v5573_v58, %v5573_v58  ;;  %v11971_v34 = vld [vmem:[#allocation137_spill] sm:$0xff]  ;;  %v7063_v54 = vpop.f32.mrb[116].mxu0 }
 0x4d7   : > { %v5651_v14 = vadd.f32 %v5650_v10, %v5649_v46  ;;  %5762 = vrot.lane.b32.xlu0 %v11971_v34, %s8304_s22  ;;  %v7706_v45 = vunpack.i.h.bf16 %v11972_v27  ;;  %v7705_v9 = vunpack.i.l.bf16 %v11972_v27  ;;  %v5652_v30 = vsel %vm5618_vm9, %v5603_v0, 0.0  ;;  %v2479_v58 = vpop.f32.mrb[117].mxu0  ;;  %v11973_v10 = vld [vmem:[#allocation32_spill] sm:$0xff]  ;;  %v11974_v0 = vld [vmem:[#allocation34_spill] sm:$0xff] }
 0x4d8   : > { %v3932_v11 = vpack.c.bf16 %v10628_v33, %v10646_v19  ;;  %7253 = vmatprep.mubr.msk.bf16.mxu1 %vm3504_vm0, %v3931_v47  ;;  %v7409_v42 = vpack.c.bf16 %v7801_v52, %v7800_v36  ;;  %v7701_v15 = vunpack.i.h.bf16 %v10329_v13  ;;  %v7700_v3 = vunpack.i.l.bf16 %v10329_v13  ;;  %7408 = vmatpush3.bf16.msra.mxu0 %v7407_v25  ;;  %v11975_v47 = vld [vmem:[#allocation82_spill] sm:$0xff]  ;;  %v7064_v52 = vpop.f32.mrb[118].mxu0  ;;  %v11976_v25 = vld [vmem:[#allocation33_spill] sm:$0xff] }
 0x4d9   : > { %v7411_v43 = vpack.c.bf16 %v7806_v55, %v7805_v6  ;;  %v5653_v16 = vadd.f32 %v5652_v30, %v5651_v14  ;;  %v5654_v46 = vsel %vm5618_vm9, %v5604_v32, 0.0  ;;  %v5576_v29 = vsub.f32 %v11973_v10, %v7063_v54  ;;  %v11977_v32 = vld [vmem:[#allocation135_spill] sm:$0xff] }
 0x4da   : > { %7254 = vmatmul.mubr.msk.bf16.gmra.mrb[56].mxu1 %vm3504_vm0, %v3932_v11  ;;  %7410 = vmatprep.subr.bf16.mxu0 %v7409_v42  ;;  %v5574_v34 = vsub.f32 %v11974_v0, %v2479_v58  ;;  %v7877_v36 = vunpack.i.l.bf16 %v10446_v56  ;;  %v5656_v13 = vsel %vm5618_vm9, %v5605_v26, 0.0  ;;  %v10671_v6 = vmul.f32 %v7706_v45, %v7064_v52  ;;  %v2482_v11 = vpop.f32.mrb[119].mxu0 }
 0x4db   : > { %5788 = vrot.lane.b32.xlu1 %v11975_v47, %s8304_s22  ;;  %v5655_v55 = vadd.f32 %v5654_v46, %v5653_v16  ;;  %v5577_v14 = vsub.f32 %v11976_v25, %v7064_v52  ;;  %5758 = vrot.lane.b32.xlu0 %v11977_v32, %s8304_s22  ;;  %v10676_v27 = vmul.f32 %v7700_v3, %v2479_v58  ;;  %v11978_v47 = vld [vmem:[#allocation35_spill] sm:$0xff] }
 0x4dc   : > { %v5606_v30 = vmul.f32 %v5574_v34, %v5574_v34  ;;  %v10678_v42 = vmul.f32 %v7701_v15, %v2482_v11  ;;  %v5575_v0 = vsub.f32 %v11978_v47, %v2482_v11  ;;  %v10681_v10 = vmul.f32 %v7705_v9, %v7063_v54  ;;  %7412 = vmatpush3.bf16.msra.mxu0 %v7411_v43  ;;  %v11979_v52 = vld [vmem:[#allocation59_spill] sm:$0xff] }
 0x4dd   : > { %v5657_v56 = vadd.f32 %v5656_v13, %v5655_v55  ;;  %v5608_v26 = vmul.f32 %v5576_v29, %v5576_v29  ;;  %v5609_v58 = vmul.f32 %v5577_v14, %v5577_v14  ;;  %v11980_v9 = vld [vmem:[#allocation115_spill] sm:$0xff]  ;;  %v7711_v13 = vunpack.i.h.bf16 %v10352_v61 }
 0x4de   : > { %v5658_v45 = vsel %vm5618_vm9, %v5606_v30, 0.0  ;;  %v3933_v16 = vpack.c.bf16 %v10678_v42, %v10676_v27  ;;  %v5607_v46 = vmul.f32 %v5575_v0, %v5575_v0  ;;  %v3934_v15 = vpack.c.bf16 %v10671_v6, %v10681_v10  ;;  %v7067_v43 = vpop.f32.mrb[120].mxu0  ;;  %v11981_v29 = vld [vmem:[#allocation67_spill] sm:$0xff]  ;;  %v11982_v30 = vld [vmem:[#allocation38_spill] sm:$0xff] }
 0x4df   : > { %5784 = vrot.lane.b32.xlu1 %v11979_v52, %s8304_s22  ;;  %v5659_v3 = vadd.f32 %v5658_v45, %v5657_v56  ;;  %5357 = vrot.lane.b32.xlu0 %v11980_v9, %s8300_s11  ;;  %v7716_v34 = vunpack.i.h.bf16 %v11981_v29  ;;  %v7715_v0 = vunpack.i.l.bf16 %v11981_v29  ;;  %v2495_v32 = vpop.f32.mrb[121].mxu0  ;;  %v7710_v14 = vunpack.i.l.bf16 %v10352_v61  ;;  %v11983_v45 = vld [vmem:[#allocation40_spill] sm:$0xff] }
 0x4e0   : > { %v5660_v54 = vsel %vm5618_vm9, %v5607_v46, 0.0  ;;  %7257 = vmatprep.mubr.msk.bf16.mxu1 %vm3504_vm0, %v3933_v16  ;;  %5284 = vmatmul.mubr.f32.vlgmr.msra.gmra.mrb[186].mxu0 %v7877_v36  ;;  %v5662_v11 = vsel %vm5618_vm9, %v5608_v26, 0.0  ;;  %v5580_v56 = vsub.f32 %v11982_v30, %v7067_v43  ;;  %v5578_v46 = vsub.f32 %v11983_v45, %v2495_v32  ;;  %v7068_v36 = vpop.f32.mrb[122].mxu0  ;;  %v11986_v45 = vld [vmem:[#allocation41_spill] sm:$0xff] }
 0x4e1   : > { %v5661_v55 = vadd.f32 %v5660_v54, %v5659_v3  ;;  %v5664_v16 = vsel %vm5618_vm9, %v5609_v58, 0.0  ;;  %v10705_v9 = vmul.f32 %v7716_v34, %v7068_v36  ;;  %v11984_v3 = vld [vmem:[#allocation39_spill] sm:$0xff]  ;;  %v2498_v61 = vpop.f32.mrb[123].mxu0  ;;  %v10710_v26 = vmul.f32 %v7710_v14, %v2495_v32 }
 0x4e2   : > { %7258 = vmatmul.mubr.msk.bf16.gmra.mrb[60].mxu1 %vm3504_vm0, %v3934_v15  ;;  %v5581_v54 = vsub.f32 %v11984_v3, %v7068_v36  ;;  %v11985_v15 = vld [vmem:[#allocation104_spill] sm:$0xff]  ;;  %v5610_v29 = vmul.f32 %v5578_v46, %v5578_v46  ;;  %v10712_v30 = vmul.f32 %v7711_v13, %v2498_v61  ;;  %v5579_v25 = vsub.f32 %v11986_v45, %v2498_v61  ;;  %v11987_v46 = vld [vmem:[#allocation138_spill] sm:$0xff] }
 0x4e3   : > { %5994 = vrot.lane.b32.xlu1 %v10383_v62, %s8300_s11  ;;  %v5663_v52 = vadd.f32 %v5662_v11, %v5661_v55  ;;  %5770 = vrot.lane.b32.xlu0 %v11985_v15, %s8304_s22  ;;  %v10715_v62 = vmul.f32 %v7715_v0, %v7067_v43  ;;  %v5612_v58 = vmul.f32 %v5580_v56, %v5580_v56  ;;  %v11988_v56 = vld [vmem:[#allocation68_spill] sm:$0xff] }
 0x4e4   : > { %v5666_v34 = vsel %vm5618_vm9, %v5610_v29, 0.0  ;;  %v3935_v55 = vpack.c.bf16 %v10712_v30, %v10710_v26  ;;  %v5611_v11 = vmul.f32 %v5579_v25, %v5579_v25  ;;  %v5613_v14 = vmul.f32 %v5581_v54, %v5581_v54  ;;  %v11989_v15 = vld [vmem:[#allocation44_spill] sm:$0xff]  ;;  %v11990_v29 = vld [vmem:[#allocation46_spill] sm:$0xff] }
 0x4e5   : > { %v5665_v47 = vadd.f32 %v5664_v16, %v5663_v52  ;;  %v3936_v13 = vpack.c.bf16 %v10705_v9, %v10715_v62  ;;  %v7726_v36 = vunpack.i.h.bf16 %v11988_v56  ;;  %v7725_v25 = vunpack.i.l.bf16 %v11988_v56 }
 0x4e6   : > { %v5668_v43 = vsel %vm5618_vm9, %v5611_v11, 0.0  ;;  %v7071_v0 = vpop.f32.mrb[124].mxu0  ;;  %7261 = vmatprep.mubr.msk.bf16.mxu1 %vm3504_vm0, %v3935_v55  ;;  %v7720_v16 = vunpack.i.l.bf16 %v10378_v49  ;;  %v7721_v52 = vunpack.i.h.bf16 %v10378_v49  ;;  %v5670_v54 = vsel %vm5618_vm9, %v5612_v58, 0.0 }
 0x4e7   : > { %6000 = vrot.lane.b32.xlu1 %v10397_v1, %s8300_s11  ;;  %v5667_v32 = vadd.f32 %v5666_v34, %v5665_v47  ;;  %5766 = vrot.lane.b32.xlu0 %v11987_v46, %s8304_s22  ;;  %v2511_v47 = vpop.f32.mrb[125].mxu0  ;;  %v5584_v61 = vsub.f32 %v11989_v15, %v7071_v0  ;;  %v5672_v11 = vsel %vm5618_vm9, %v5613_v14, 0.0 }
 0x4e8   : > { %v5582_v34 = vsub.f32 %v11990_v29, %v2511_v47  ;;  %v7072_v55 = vpop.f32.mrb[126].mxu0  ;;  %v10739_v56 = vmul.f32 %v7720_v16, %v2511_v47  ;;  %v11993_v29 = vld [vmem:[#allocation47_spill] sm:$0xff] }
 0x4e9   : > { %v5669_v1 = vadd.f32 %v5668_v43, %v5667_v32  ;;  %v10741_v32 = vmul.f32 %v7726_v36, %v7072_v55  ;;  %v2514_v49 = vpop.f32.mrb[127].mxu0  ;;  %v11992_v43 = vld [vmem:[#allocation45_spill] sm:$0xff]  ;;  %v5616_v14 = vmul.f32 %v5584_v61, %v5584_v61 }
 0x4ea   : > { %7262 = vmatmul.mubr.msk.bf16.gmra.mrb[64].mxu1 %vm3504_vm0, %v3936_v13  ;;  %v11991_v13 = vld [vmem:[#allocation107_spill] sm:$0xff]  ;;  %v5614_v58 = vmul.f32 %v5582_v34, %v5582_v34  ;;  %v5585_v15 = vsub.f32 %v11992_v43, %v7072_v55  ;;  %v10746_v3 = vmul.f32 %v7721_v52, %v2514_v49  ;;  %v5583_v45 = vsub.f32 %v11993_v29, %v2514_v49 }
 0x4eb   : > { %6006 = vrot.lane.b32.xlu1 %v10444_v39, %s8300_s11  ;;  %v5671_v46 = vadd.f32 %v5670_v54, %v5669_v1  ;;  %5778 = vrot.lane.b32.xlu0 %v11991_v13, %s8304_s22  ;;  %v10749_v39 = vmul.f32 %v7725_v25, %v7071_v0  ;;  %v11994_v54 = vld [vmem:[#allocation50_spill] sm:$0xff] }
 0x4ec   : > { %v5674_v16 = vsel %vm5618_vm9, %v5614_v58, 0.0  ;;  %v3937_v36 = vpack.c.bf16 %v10746_v3, %v10739_v56  ;;  %v5615_v1 = vmul.f32 %v5583_v45, %v5583_v45  ;;  %v5617_v0 = vmul.f32 %v5585_v15, %v5585_v15  ;;  %v11995_v15 = vld [vmem:[#allocation53_spill] sm:$0xff] }
 0x4ed   : > { %v5673_v17 = vadd.f32 %v5672_v11, %v5671_v46  ;;  %v3938_v52 = vpack.c.bf16 %v10741_v32, %v10749_v39 }
 0x4ee   : > { %v5676_v25 = vsel %vm5618_vm9, %v5615_v1, 0.0  ;;  %v7077_v61 = vpop.f32.mrb[128].mxu0  ;;  %v10761_v34 = vpop.permute.xlu0 %5329  ;;  %7265 = vmatprep.mubr.msk.bf16.mxu1 %vm3504_vm0, %v3937_v36  ;;  %v5680_v49 = vsel %vm5618_vm9, %v5617_v0, 0.0 }
 0x4ef   : > { %6002 = vrot.lane.b32.xlu1 %v10413_v12, %s8300_s11  ;;  %v5675_v47 = vadd.f32 %v5674_v16, %v5673_v17  ;;  %5774 = vrot.lane.b32.xlu0 %v11994_v54, %s8304_s22  ;;  %v3072_v45 = vpop.f32.mrb[129].mxu0  ;;  %v5678_v12 = vsel %vm5618_vm9, %v5616_v14, 0.0  ;;  %v7936_v14 = vld [vmem:[%s11364_s6 + $0xa8] sm:$0xff]  }
 0x4f0   : > { %v7078_v17 = vpop.f32.mrb[130].mxu0 }
 0x4f1   : > { %v5677_v55 = vadd.f32 %v5676_v25, %v5675_v47  ;;  %v4213_v46 = vpack.c.bf16 %v7078_v17, %v7077_v61  ;;  %v3075_v13 = vpop.f32.mrb[131].mxu0  ;;  %v11997_v17 = vld [vmem:[#allocation109_spill] sm:$0xff] }
 0x4f2   : > { %7266 = vmatmul.mubr.msk.bf16.gmra.mrb[68].mxu1 %vm3504_vm0, %v3938_v52  ;;  %v4212_v58 = vpack.c.bf16 %v3075_v13, %v3072_v45  ;;  %v10771_v16 = vpop.permute.xlu0 %5730 }
 0x4f3   : > { %6008 = vrot.lane.b32.xlu1 %v10434_v53, %s8300_s11  ;;  %v5679_v11 = vadd.f32 %v5678_v12, %v5677_v55  ;;  %5786 = vrot.lane.b32.xlu0 %v11995_v15, %s8304_s22  ;;  %v11996_v53 = vld [vmem:[#allocation108_spill] sm:$0xff]  ;;  %v11998_v15 = vld [vmem:[#allocation114_spill] sm:$0xff] }
 0x4f4   : > { %7277 = vmatprep.mubr.msk.bf16.mxu1 %vm3504_vm0, %v4212_v58  ;;  %v7937_v55 = vld [vmem:[%s11364_s6 + $0xb0] sm:$0xff]  }
 0x4f5   : > { %v10773_v36 = vadd.f32 %v5680_v49, %v5679_v11  ;;  %v11999_v49 = vld [vmem:[#allocation4_spill] sm:$0xff] }
 0x4f6   : > { %v7081_v1 = vpop.f32.mrb[132].mxu0  ;;  %v5326_v47 = vpop.permute.xlu0 %5325 }
 0x4f7   : > { %6004 = vrot.lane.b32.xlu1 %v10405_v31, %s8300_s11  ;;  %5782 = vrot.lane.b32.xlu0 %v11996_v53, %s8304_s22  ;;  %v3088_v52 = vpop.f32.mrb[133].mxu0  ;;  %v5420_v58 = vsub.f32 %v11999_v49, %v5326_v47 }
 0x4f8   : > { %v7082_v31 = vpop.f32.mrb[134].mxu0 }
 0x4f9   : > { %v4215_v54 = vpack.c.bf16 %v7082_v31, %v7081_v1  ;;  %v3091_v0 = vpop.f32.mrb[135].mxu0 }
 0x4fa   : > { %7278 = vmatmul.mubr.msk.bf16.vlgmr.msra.gmra.mrb[40].mxu1 %vm3504_vm0, %v4213_v46  ;;  %v4214_v25 = vpack.c.bf16 %v3091_v0, %v3088_v52  ;;  %v10789_v61 = vpop.permute.xlu0 %5726  ;;  %v12000_v52 = vld [vmem:[#allocation5_spill] sm:$0xff] }
 0x4fb   : > { %6014 = vrot.lane.b32.xlu1 %v10542_v50, %s8300_s11  ;;  %7310 = vmatpush3.bf16.msra.mxu1 %v10467_v48  ;;  %v7938_v50 = vld [vmem:[%s11364_s6 + $0xb8] sm:$0xff]  }
 0x4fc   : > { %5998 = vrot.lane.b32.xlu0 %v10410_v51, %s8300_s11  ;;  %7311 = vmatprep.subr.bf16.mxu1 %v7936_v14 }
 0x4fd   : > { %7281 = vmatprep.mubr.msk.bf16.mxu1 %vm3504_vm0, %v4214_v25 }
 0x4fe   : > { %v7085_v48 = vpop.f32.mrb[136].mxu0  ;;  %v10799_v51 = vpop.permute.xlu0 %5335 }
 0x4ff   : > { %6010 = vrot.lane.b32.xlu1 %v10549_v40, %s8300_s11  ;;  %7312 = vmatpush3.bf16.msra.mxu1 %v7936_v14  ;;  %v3104_v45 = vpop.f32.mrb[137].mxu0 }
 0x500   : > { %5996 = vrot.lane.b32.xlu0 %v10371_v20, %s8300_s11  ;;  %7313 = vmatprep.subr.bf16.mxu1 %v7937_v55  ;;  %v7086_v40 = vpop.f32.mrb[138].mxu0 }
 0x501   : > { %v4217_v12 = vpack.c.bf16 %v7086_v40, %v7085_v48  ;;  %v3107_v20 = vpop.f32.mrb[139].mxu0  ;;  %v12002_v48 = vld [vmem:[#allocation2_spill] sm:$0xff] }
 0x502   : > { %7282 = vmatmul.mubr.msk.bf16.gmra.mrb[44].mxu1 %vm3504_vm0, %v4215_v54  ;;  %v4216_v11 = vpack.c.bf16 %v3107_v20, %v3104_v45  ;;  %v10809_v46 = vpop.permute.xlu0 %5738  ;;  %v12001_v54 = vld [vmem:[#allocation120_spill] sm:$0xff]  ;;  %v5422_v47 = vsub.f32 %v12002_v48, %v10761_v34  ;;  %v12003_v45 = vld [vmem:[#allocation3_spill] sm:$0xff]  ;;  %v12004_v20 = vld [vmem:[#allocation122_spill] sm:$0xff] }
 0x503   : > { %6016 = vrot.lane.b32.xlu1 %v10544_v38, %s8300_s11  ;;  %7314 = vmatpush3.bf16.msra.mxu1 %v7937_v55 }
 0x504   : > { %5359 = vrot.lane.b32.xlu0 %v11997_v17, %s8300_s11  ;;  %7315 = vmatprep.subr.bf16.mxu1 %v7938_v50 }
 0x505   : > { %7285 = vmatprep.mubr.msk.bf16.mxu1 %vm3504_vm0, %v4216_v11 }
 0x506   : > { %v7089_v13 = vpop.f32.mrb[140].mxu0  ;;  %v5338_v53 = vpop.permute.xlu0 %5337 }
 0x507   : > { %6012 = vrot.lane.b32.xlu1 %v10551_v60, %s8300_s11  ;;  %7316 = vmatpush3.bf16.msra.mxu1 %v7938_v50  ;;  %v5328_v38 = vpop.permute.xlu1 %5327  ;;  %v3120_v14 = vpop.f32.mrb[141].mxu0  ;;  %v5452_v50 = vmul.f32 %v5420_v58, %v5420_v58 }
 0x508   : > { %5361 = vrot.lane.b32.xlu0 %v11998_v15, %s8300_s11  ;;  %v7090_v1 = vpop.f32.mrb[142].mxu0  ;;  %v5421_v60 = vsub.f32 %v12000_v52, %v5328_v38  ;;  %v5454_v38 = vmul.f32 %v5422_v47, %v5422_v47 }
 0x509   : > { %v4219_v31 = vpack.c.bf16 %v7090_v1, %v7089_v13  ;;  %v3123_v0 = vpop.f32.mrb[143].mxu0  ;;  %v5484_v34 = vsel %vm901_vm6, %v5452_v50, 0.0 }
 0x50a   : > { %7286 = vmatmul.mubr.msk.bf16.gmra.mrb[48].mxu1 %vm3504_vm0, %v4217_v12  ;;  %v4218_v25 = vpack.c.bf16 %v3123_v0, %v3120_v14  ;;  %v10826_v12 = vpop.permute.xlu0 %5734  ;;  %v12005_v0 = vld [vmem:[#allocation119_spill] sm:$0xff] }
 0x50b   : > { %6022 = vrot.lane.b32.xlu1 %v10601_v2, %s8300_s11  ;;  %v5324_v55 = vpop.permute.xlu1 %5323  ;;  %v5453_v2 = vmul.f32 %v5421_v60, %v5421_v60 }
 0x50c   : > { %5363 = vrot.lane.b32.xlu0 %v12001_v54, %s8300_s11  ;;  %v5419_v40 = vsub.f32 %v12003_v45, %v5324_v55  ;;  %7289 = vmatprep.mubr.msk.bf16.mxu1 %vm3504_vm0, %v4218_v25  ;;  %v5822_v55 = vsub.f32 %v12003_v45, %v10789_v61  ;;  %v12007_v61 = vld [vmem:[#allocation121_spill] sm:$0xff] }
 0x50d   : > { %v5486_v60 = vsel %vm901_vm6, %v5453_v2, 0.0  ;;  %v12006_v2 = vld [vmem:[#allocation10_spill] sm:$0xff] }
 0x50e   : > { %v5451_v17 = vmul.f32 %v5419_v40, %v5419_v40  ;;  %v7093_v15 = vpop.f32.mrb[144].mxu0  ;;  %v5334_v58 = vpop.permute.xlu0 %5333 }
 0x50f   : > { %6018 = vrot.lane.b32.xlu1 %v10591_v8, %s8300_s11  ;;  %v5733_v11 = vpop.permute.xlu1 %5732  ;;  %v3136_v14 = vpop.f32.mrb[145].mxu0 }
 0x510   : > { %5365 = vrot.lane.b32.xlu0 %v12004_v20, %s8300_s11  ;;  %v5483_v13 = vsel %vm901_vm6, %v5451_v17, 0.0  ;;  %v7094_v8 = vpop.f32.mrb[146].mxu0 }
 0x511   : > { %v5485_v1 = vadd.f32 %v5484_v34, %v5483_v13  ;;  %v4221_v54 = vpack.c.bf16 %v7094_v8, %v7093_v15  ;;  %v3139_v25 = vpop.f32.mrb[147].mxu0  ;;  %v5424_v15 = vsub.f32 %v12006_v2, %v5334_v58  ;;  %v5824_v13 = vsub.f32 %v12000_v52, %v10771_v16  ;;  %v12008_v8 = vld [vmem:[#allocation11_spill] sm:$0xff]  ;;  %v12010_v16 = vld [vmem:[#allocation8_spill] sm:$0xff] }
 0x512   : > { %7290 = vmatmul.mubr.msk.bf16.gmra.mrb[52].mxu1 %vm3504_vm0, %v4219_v31  ;;  %v4220_v50 = vpack.c.bf16 %v3139_v25, %v3136_v14  ;;  %v5488_v31 = vsel %vm901_vm6, %v5454_v38, 0.0  ;;  %v10845_v20 = vpop.permute.xlu0 %5343  ;;  %v5854_v38 = vmul.f32 %v5822_v55, %v5822_v55  ;;  %v5426_v55 = vsub.f32 %v12010_v16, %v5338_v53 }
 0x513   : > { %6024 = vrot.lane.b32.xlu1 %v10584_v21, %s8300_s11  ;;  %v5487_v47 = vadd.f32 %v5486_v60, %v5485_v1  ;;  %v5729_v40 = vpop.permute.xlu1 %5728  ;;  %v5425_v60 = vsub.f32 %v12008_v8, %v10799_v51 }
 0x514   : > { %5367 = vrot.lane.b32.xlu0 %v12005_v0, %s8300_s11  ;;  %v5823_v17 = vsub.f32 %v11999_v49, %v5729_v40  ;;  %7293 = vmatprep.mubr.msk.bf16.mxu1 %vm3504_vm0, %v4220_v50  ;;  %v5456_v40 = vmul.f32 %v5424_v15, %v5424_v15  ;;  %v5887_v49 = vsel %vm5886_vm1, %v5854_v38, 0.0 }
 0x515   : > { %v5489_v21 = vadd.f32 %v5488_v31, %v5487_v47  ;;  %v5457_v45 = vmul.f32 %v5425_v60, %v5425_v60 }
 0x516   : > { %v5855_v34 = vmul.f32 %v5823_v17, %v5823_v17  ;;  %v7097_v1 = vpop.f32.mrb[148].mxu0  ;;  %v5340_v25 = vpop.permute.xlu0 %5339  ;;  %v5492_v38 = vsel %vm901_vm6, %v5456_v40, 0.0 }
 0x517   : > { %6020 = vrot.lane.b32.xlu1 %v10595_v18, %s8300_s11  ;;  %v5332_v14 = vpop.permute.xlu1 %5331  ;;  %v12009_v18 = vld [vmem:[#allocation9_spill] sm:$0xff]  ;;  %v3152_v47 = vpop.f32.mrb[149].mxu0  ;;  %v5427_v53 = vsub.f32 %v11941_v35, %v5340_v25 }
 0x518   : > { %5369 = vrot.lane.b32.xlu0 %v12007_v61, %s8300_s11  ;;  %v5423_v0 = vsub.f32 %v12009_v18, %v5332_v14  ;;  %v5888_v58 = vsel %vm5886_vm1, %v5855_v34, 0.0  ;;  %v7098_v50 = vpop.f32.mrb[150].mxu0  ;;  %v12011_v61 = vld [vmem:[#allocation126_spill] sm:$0xff]  ;;  %v5856_v14 = vmul.f32 %v5824_v13, %v5824_v13  ;;  %v5458_v13 = vmul.f32 %v5426_v55, %v5426_v55 }
 0x519   : > { %v4223_v17 = vpack.c.bf16 %v7098_v50, %v7097_v1  ;;  %v3155_v51 = vpop.f32.mrb[151].mxu0  ;;  %v5889_v43 = vadd.f32 %v5888_v58, %v5887_v49  ;;  %v12012_v49 = vld [vmem:[#allocation128_spill] sm:$0xff] }
 0x51a   : > { %7294 = vmatmul.mubr.msk.bf16.gmra.mrb[56].mxu1 %vm3504_vm0, %v4221_v54  ;;  %v5455_v31 = vmul.f32 %v5423_v0, %v5423_v0  ;;  %v5825_v54 = vsub.f32 %v12002_v48, %v5733_v11  ;;  %v4222_v52 = vpack.c.bf16 %v3155_v51, %v3152_v47  ;;  %v10869_v15 = vpop.permute.xlu0 %5746  ;;  %v5826_v11 = vsub.f32 %v12009_v18, %v10826_v12  ;;  %v12014_v51 = vld [vmem:[#allocation125_spill] sm:$0xff] }
 0x51b   : > { %6030 = vrot.lane.b32.xlu1 %v10646_v19, %s8300_s11  ;;  %v5741_v34 = vpop.permute.xlu1 %5740  ;;  %v5890_v60 = vsel %vm5886_vm1, %v5856_v14, 0.0 }
 0x51c   : > { %5371 = vrot.lane.b32.xlu0 %v12011_v61, %s8300_s11  ;;  %v5490_v19 = vsel %vm901_vm6, %v5455_v31, 0.0  ;;  %7297 = vmatprep.mubr.msk.bf16.mxu1 %vm3504_vm0, %v4222_v52  ;;  %v5857_v0 = vmul.f32 %v5825_v54, %v5825_v54  ;;  %v5891_v58 = vadd.f32 %v5890_v60, %v5889_v43  ;;  %v5459_v52 = vmul.f32 %v5427_v53, %v5427_v53 }
 0x51d   : > { %v5491_v1 = vadd.f32 %v5490_v19, %v5489_v21  ;;  %v12013_v31 = vpack.c.bf16 %v10346_v7, %v10337_v63  ;;  %v5496_v43 = vsel %vm901_vm6, %v5458_v13, 0.0  ;;  %v5828_v7 = vsub.f32 %v12008_v8, %v10809_v46 }
 0x51e   : > { %v10880_v21 = vpop.f32.mrb[152].mxu0  ;;  %v5346_v55 = vpop.permute.xlu0 %5345  ;;  %v5892_v54 = vsel %vm5886_vm1, %v5857_v0, 0.0  ;;  %v5429_v0 = vsub.f32 %v11940_v57, %v10845_v20  ;;  %v12017_v20 = vld [vmem:[#allocation79_spill] sm:$0xff] }
 0x51f   : > { %6026 = vrot.lane.b32.xlu1 %v10635_v37, %s8300_s11  ;;  %v5493_v25 = vadd.f32 %v5492_v38, %v5491_v1  ;;  %v5737_v47 = vpop.permute.xlu1 %5736  ;;  %v5494_v37 = vsel %vm901_vm6, %v5457_v45, 0.0  ;;  %v10885_v12 = vpop.f32.mrb[153].mxu0  ;;  %v5858_v45 = vmul.f32 %v5826_v11, %v5826_v11  ;;  %v5498_v1 = vsel %vm901_vm6, %v5459_v52, 0.0 }
 0x520   : > { %5373 = vrot.lane.b32.xlu0 %v12012_v49, %s8300_s11  ;;  %v5827_v50 = vsub.f32 %v12006_v2, %v5737_v47  ;;  %v10893_v61 = vpop.f32.mrb[154].mxu0  ;;  %v5893_v13 = vadd.f32 %v5892_v54, %v5891_v58  ;;  %v12015_v49 = vld [vmem:[#allocation127_spill] sm:$0xff]  ;;  %v5860_v46 = vmul.f32 %v5828_v7, %v5828_v7  ;;  %v12016_v58 = vpack.c.bf16 %v10341_v24, %v10332_v22  ;;  %v12020_v22 = vld [vmem:[#allocation130_spill] sm:$0xff] }
 0x521   : > { %v5495_v40 = vadd.f32 %v5494_v37, %v5493_v25  ;;  %v3316_v14 = vpop.f32.mrb[155].mxu0  ;;  %v5894_v60 = vsel %vm5886_vm1, %v5858_v45, 0.0 }
 0x522   : > { %7298 = vmatmul.mubr.msk.bf16.gmra.mrb[60].mxu1 %vm3504_vm0, %v4223_v17  ;;  %v4502_v17 = vpack.c.bf16 %v10893_v61, %v10880_v21  ;;  %v5859_v19 = vmul.f32 %v5827_v50, %v5827_v50  ;;  %v4501_v63 = vpack.c.bf16 %v3316_v14, %v10885_v12  ;;  %v5743_v11 = vpop.permute.xlu0 %5742  ;;  %v5895_v37 = vadd.f32 %v5894_v60, %v5893_v13 }
 0x523   : > { %6032 = vrot.lane.b32.xlu1 %v10628_v33, %s8300_s11  ;;  %7301 = vmatprep.mubr.msk.bf16.mxu1 %vm3504_vm0, %v12013_v31  ;;  %v5497_v33 = vadd.f32 %v5496_v43, %v5495_v40  ;;  %v10901_v53 = vpop.permute.xlu1 %5748  ;;  %v5430_v50 = vsub.f32 %v11943_v23, %v5346_v55  ;;  %v12018_v40 = vld [vmem:[#allocation69_spill] sm:$0xff]  ;;  %v5830_v55 = vsub.f32 %v11941_v35, %v5743_v11 }
 0x524   : > { %5375 = vrot.lane.b32.xlu0 %v12014_v51, %s8300_s11  ;;  %v5896_v25 = vsel %vm5886_vm1, %v5859_v19, 0.0  ;;  %v12019_v31 = vpack.c.bf16 %v12017_v20, %v12018_v40  ;;  %v12023_v20 = vld [vmem:[#allocation58_spill] sm:$0xff] }
 0x525   : > { %v5499_v38 = vadd.f32 %v5498_v1, %v5497_v33  ;;  %v5897_v45 = vadd.f32 %v5896_v25, %v5895_v37  ;;  %v5462_v13 = vmul.f32 %v5430_v50, %v5430_v50  ;;  %v12021_v25 = vld [vmem:[#allocation132_spill] sm:$0xff]  ;;  %v5862_v37 = vmul.f32 %v5830_v55, %v5830_v55  ;;  %v12022_v50 = vld [vmem:[#allocation113_spill] sm:$0xff] }
 0x526   : > { %v5342_v52 = vpop.permute.xlu0 %5341  ;;  %v12024_v40 = vpack.c.bf16 %v12022_v50, %v12023_v20 }
 0x527   : > { %6028 = vrot.lane.b32.xlu1 %v10639_v41, %s8300_s11  ;;  %v5745_v47 = vpop.permute.xlu1 %5744  ;;  %v5829_v41 = vsub.f32 %v12010_v16, %v5741_v34  ;;  %v5428_v12 = vsub.f32 %v11945_v4, %v5342_v52  ;;  %v5461_v34 = vmul.f32 %v5429_v0, %v5429_v0 }
 0x528   : > { %5377 = vrot.lane.b32.xlu0 %v12015_v49, %s8300_s11  ;;  %v10928_v43 = vpop.f32.mrb[156].mxu0  ;;  %v5831_v52 = vsub.f32 %v11945_v4, %v5745_v47 }
 0x529   : > { %v3329_v24 = vpop.f32.mrb[157].mxu0  ;;  %v5460_v51 = vmul.f32 %v5428_v12, %v5428_v12  ;;  %v5861_v1 = vmul.f32 %v5829_v41, %v5829_v41 }
 0x52a   : > { %7302 = vmatmul.mubr.msk.bf16.gmra.mrb[64].mxu1 %vm3504_vm0, %v12016_v58  ;;  %v10935_v54 = vpop.f32.mrb[158].mxu0  ;;  %v10938_v33 = vpop.permute.xlu0 %5351 }
 0x52b   : > { %6038 = vrot.lane.b32.xlu1 %v10681_v10, %s8300_s11  ;;  %7305 = vmatprep.mubr.msk.bf16.mxu1 %vm3504_vm0, %v12019_v31  ;;  %v10933_v14 = vpop.permute.xlu1 %5756  ;;  %v5898_v10 = vsel %vm5886_vm1, %v5860_v46, 0.0  ;;  %v4504_v19 = vpack.c.bf16 %v10935_v54, %v10928_v43  ;;  %v3332_v7 = vpop.f32.mrb[159].mxu0  ;;  %v5500_v49 = vsel %vm901_vm6, %v5460_v51, 0.0  ;;  %v5502_v46 = vsel %vm901_vm6, %v5461_v34, 0.0  ;;  %v12025_v31 = vld [vmem:[#allocation22_spill] sm:$0xff]  ;;  %v12026_v34 = vld [vmem:[#allocation129_spill] sm:$0xff] }
 0x52c   : > { %5379 = vrot.lane.b32.xlu0 %v12020_v22, %s8300_s11  ;;  %v4503_v11 = vpack.c.bf16 %v3332_v7, %v3329_v24  ;;  %v5899_v60 = vadd.f32 %v5898_v10, %v5897_v45  ;;  %v5501_v0 = vadd.f32 %v5500_v49, %v5499_v38  ;;  %v5504_v38 = vsel %vm901_vm6, %v5462_v13, 0.0 }
 0x52d   : > { %v5902_v51 = vsel %vm5886_vm1, %v5862_v37, 0.0  ;;  %v5863_v10 = vmul.f32 %v5831_v52, %v5831_v52  ;;  %v12027_v52 = vld [vmem:[#allocation131_spill] sm:$0xff] }
 0x52e   : > { %v5503_v12 = vadd.f32 %v5502_v46, %v5501_v0  ;;  %v5348_v41 = vpop.permute.xlu0 %5347 }
 0x52f   : > { %6034 = vrot.lane.b32.xlu1 %v10676_v27, %s8300_s11  ;;  %v5753_v58 = vpop.permute.xlu1 %5752  ;;  %v5900_v27 = vsel %vm5886_vm1, %v5861_v1, 0.0  ;;  %v5431_v45 = vsub.f32 %v12025_v31, %v5348_v41 }
 0x530   : > { %5381 = vrot.lane.b32.xlu0 %v12021_v25, %s8300_s11  ;;  %v10959_v47 = vpop.f32.mrb[160].mxu0  ;;  %v5901_v22 = vadd.f32 %v5900_v27, %v5899_v60  ;;  %v5505_v24 = vadd.f32 %v5504_v38, %v5503_v12  ;;  %v5832_v60 = vsub.f32 %v11940_v57, %v10869_v15  ;;  %v5904_v12 = vsel %vm5886_vm1, %v5863_v10, 0.0 }
 0x531   : > { %v3345_v55 = vpop.f32.mrb[161].mxu0  ;;  %v5463_v7 = vmul.f32 %v5431_v45, %v5431_v45 }
 0x532   : > { %7306 = vmatmul.mubr.msk.bf16.gmra.mrb[68].mxu1 %vm3504_vm0, %v12024_v40  ;;  %v10966_v13 = vpop.f32.mrb[162].mxu0  ;;  %v5755_v49 = vpop.permute.xlu0 %5754  ;;  %v5903_v46 = vadd.f32 %v5902_v51, %v5901_v22  ;;  %v5864_v15 = vmul.f32 %v5832_v60, %v5832_v60  ;;  %v5835_v51 = vsub.f32 %v11956_v59, %v5753_v58  ;;  %v12029_v60 = vld [vmem:[#allocation21_spill] sm:$0xff] }
 0x533   : > { %6040 = vrot.lane.b32.xlu1 %v10671_v6, %s8300_s11  ;;  %7317 = vmatprep.mubr.msk.bf16.mxu1 %vm3504_vm0, %v4501_v63  ;;  %v10964_v1 = vpop.permute.xlu1 %5764  ;;  %v4506_v6 = vpack.c.bf16 %v10966_v13, %v10959_v47  ;;  %v3348_v63 = vpop.f32.mrb[163].mxu0  ;;  %v5506_v0 = vsel %vm901_vm6, %v5463_v7, 0.0 }
 0x534   : > { %5383 = vrot.lane.b32.xlu0 %v12026_v34, %s8300_s11  ;;  %v4505_v25 = vpack.c.bf16 %v3348_v63, %v3345_v55  ;;  %v5507_v37 = vadd.f32 %v5506_v0, %v5505_v24  ;;  %v5905_v40 = vadd.f32 %v5904_v12, %v5903_v46  ;;  %v12028_v34 = vld [vmem:[#allocation20_spill] sm:$0xff]  ;;  %v5867_v12 = vmul.f32 %v5835_v51, %v5835_v51 }
 0x535   : > { %v5433_v55 = vsub.f32 %v12028_v34, %v10938_v33 }
 0x537   : > { %6036 = vrot.lane.b32.xlu1 %v10678_v42, %s8300_s11  ;;  %v10978_v41 = vpop.permute.xlu1 %5760  ;;  %v5833_v42 = vsub.f32 %v11943_v23, %v10901_v53 }
 0x538   : > { %5385 = vrot.lane.b32.xlu0 %v12027_v52, %s8300_s11  ;;  %v5354_v50 = vpop.permute.xlu0 %5353  ;;  %v10989_v20 = vpop.f32.mrb[164].mxu0  ;;  %v5839_v47 = vsub.f32 %v11968_v44, %v10978_v41 }
 0x539   : > { %v3361_v27 = vpop.f32.mrb[165].mxu0  ;;  %v5865_v45 = vmul.f32 %v5833_v42, %v5833_v42  ;;  %v5434_v0 = vsub.f32 %v12029_v60, %v5354_v50 }
 0x53a   : > { %7318 = vmatmul.mubr.msk.bf16.vlgmr.msra.gmra.mrb[40].mxu1 %vm3504_vm0, %v4502_v17  ;;  %v10995_v21 = vpop.f32.mrb[166].mxu0 }
 0x53b   : > { %6046 = vrot.lane.b32.xlu1 %v10715_v62, %s8300_s11  ;;  %7321 = vmatprep.mubr.msk.bf16.mxu1 %vm3504_vm0, %v4503_v11  ;;  %v10993_v38 = vpop.permute.xlu1 %5772  ;;  %v4508_v17 = vpack.c.bf16 %v10995_v21, %v10989_v20  ;;  %v3364_v53 = vpop.f32.mrb[167].mxu0  ;;  %v5906_v62 = vsel %vm5886_vm1, %v5864_v15, 0.0  ;;  %v5836_v15 = vsub.f32 %v12028_v34, %v5755_v49 }
 0x53c   : > { %6056 = vrot.lane.b32.xlu0 %v10741_v32, %s8300_s11  ;;  %v5751_v61 = vpop.permute.xlu0 %5750  ;;  %v4507_v22 = vpack.c.bf16 %v3364_v53, %v3361_v27  ;;  %v5682_v32 = vrot.slane %v10773_v36, 4  ;;  %v5907_v24 = vadd.f32 %v5906_v62, %v5905_v40  ;;  %v5466_v53 = vmul.f32 %v5434_v0, %v5434_v0 }
 0x53d   : > { %v5834_v11 = vsub.f32 %v12025_v31, %v5751_v61  ;;  %v5868_v51 = vmul.f32 %v5836_v15, %v5836_v15 }
 0x53e   : > { %v5683_v58 = vadd.f32 %v5682_v32, %v10773_v36 }
 0x53f   : > { %6042 = vrot.lane.b32.xlu1 %v10710_v26, %s8300_s11  ;;  %v5866_v10 = vmul.f32 %v5834_v11, %v5834_v11  ;;  %v11007_v7 = vpop.permute.xlu1 %5768  ;;  %v5908_v26 = vsel %vm5886_vm1, %v5865_v45, 0.0  ;;  %v5837_v45 = vsub.f32 %v12029_v60, %v10933_v14 }
 0x540   : > { %v5350_v63 = vpop.permute.xlu0 %5349  ;;  %v11020_v33 = vpop.f32.mrb[168].mxu0  ;;  %v5909_v43 = vadd.f32 %v5908_v26, %v5907_v24  ;;  %v5684_v32 = vrot.slane %v5683_v58, 2 }
 0x541   : > { %v5910_v46 = vsel %vm5886_vm1, %v5866_v10, 0.0  ;;  %v5432_v52 = vsub.f32 %v11956_v59, %v5350_v63  ;;  %v3377_v54 = vpop.f32.mrb[169].mxu0 }
 0x542   : > { %7322 = vmatmul.mubr.msk.bf16.gmra.mrb[44].mxu1 %vm3504_vm0, %v4504_v19  ;;  %v5465_v19 = vmul.f32 %v5433_v55, %v5433_v55  ;;  %v11026_v40 = vpop.f32.mrb[170].mxu0  ;;  %v5911_v27 = vadd.f32 %v5910_v46, %v5909_v43  ;;  %v5912_v55 = vsel %vm5886_vm1, %v5867_v12, 0.0 }
 0x543   : > { %6048 = vrot.lane.b32.xlu1 %v10705_v9, %s8300_s11  ;;  %7325 = vmatprep.mubr.msk.bf16.mxu1 %vm3504_vm0, %v4505_v25  ;;  %v5464_v50 = vmul.f32 %v5432_v52, %v5432_v52  ;;  %v4510_v9 = vpack.c.bf16 %v11026_v40, %v11020_v33  ;;  %v3380_v25 = vpop.f32.mrb[171].mxu0  ;;  %v5685_v52 = vadd.f32 %v5684_v32, %v5683_v58 }
 0x544   : > { %v11024_v42 = vpop.permute.xlu1 %5780  ;;  %v5356_v61 = vpop.permute.xlu0 %5355  ;;  %v4509_v49 = vpack.c.bf16 %v3380_v25, %v3377_v54  ;;  %v5510_v24 = vsel %vm901_vm6, %v5465_v19, 0.0  ;;  %v5913_v26 = vadd.f32 %v5912_v55, %v5911_v27  ;;  %v5869_v54 = vmul.f32 %v5837_v45, %v5837_v45 }
 0x545   : > { %v5508_v36 = vsel %vm901_vm6, %v5464_v50, 0.0  ;;  %v5435_v62 = vsub.f32 %v11961_v5, %v5356_v61  ;;  %v5914_v19 = vsel %vm5886_vm1, %v5868_v51, 0.0  ;;  %v5686_v61 = vrot.slane %v5685_v52, 1 }
 0x546   : > { %v5509_v11 = vadd.f32 %v5508_v36, %v5507_v37  ;;  %v5916_v25 = vsel %vm5886_vm1, %v5869_v54, 0.0 }
 0x547   : > { %6044 = vrot.lane.b32.xlu1 %v10712_v30, %s8300_s11  ;;  %v5467_v10 = vmul.f32 %v5435_v62, %v5435_v62  ;;  %v5512_v30 = vsel %vm901_vm6, %v5466_v53, 0.0  ;;  %v5871_v53 = vmul.f32 %v5839_v47, %v5839_v47  ;;  %v5687_v21 = vadd.f32 %v5686_v61, %v5685_v52 }
 0x548   : > { %v11038_v63 = vpop.permute.xlu1 %5776  ;;  %v5511_v0 = vadd.f32 %v5510_v24, %v5509_v11  ;;  %v11048_v14 = vpop.f32.mrb[172].mxu0 }
 0x549   : > { %v5763_v46 = vpop.permute.xlu0 %5762  ;;  %v3393_v43 = vpop.f32.mrb[173].mxu0  ;;  %v5514_v13 = vsel %vm901_vm6, %v5467_v10, 0.0  ;;  %v12030_v10 = vld [vmem:[#allocation27_spill] sm:$0xff] }
 0x54a   : > { %7326 = vmatmul.mubr.msk.bf16.gmra.mrb[48].mxu1 %vm3504_vm0, %v4506_v6  ;;  %v5513_v37 = vadd.f32 %v5512_v30, %v5511_v0  ;;  %v11056_v12 = vpop.f32.mrb[174].mxu0  ;;  %v5840_v36 = vsub.f32 %v11960_v28, %v5763_v46  ;;  %v5920_v0 = vsel %vm5886_vm1, %v5871_v53, 0.0 }
 0x54b   : > { %6050 = vrot.lane.b32.xlu1 %v10739_v56, %s8300_s11  ;;  %7329 = vmatprep.mubr.msk.bf16.mxu1 %vm3504_vm0, %v4507_v22  ;;  %v5915_v22 = vadd.f32 %v5914_v19, %v5913_v26  ;;  %v4512_v58 = vpack.c.bf16 %v11056_v12, %v11048_v14  ;;  %v3396_v50 = vpop.f32.mrb[175].mxu0  ;;  %v5841_v26 = vsub.f32 %v12030_v10, %v10964_v1  ;;  %v12031_v1 = vld [vmem:[#allocation35_spill] sm:$0xff] }
 0x54c   : > { %v11058_v56 = vadd.f32 %v5514_v13, %v5513_v37  ;;  %v4511_v41 = vpack.c.bf16 %v3396_v50, %v3393_v43  ;;  %v5872_v46 = vmul.f32 %v5840_v36, %v5840_v36  ;;  %v5843_v19 = vsub.f32 %v12031_v1, %v11007_v7  ;;  %v12034_v36 = vld [vmem:[#allocation33_spill] sm:$0xff] }
 0x54d   : > { %v11054_v6 = vpop.permute.xlu1 %5788  ;;  %v5759_v15 = vpop.permute.xlu0 %5758  ;;  %v5917_v11 = vadd.f32 %v5916_v25, %v5915_v22  ;;  %v5873_v54 = vmul.f32 %v5841_v26, %v5841_v26 }
 0x54e   : > { %v5838_v27 = vsub.f32 %v11961_v5, %v5759_v15  ;;  %v5922_v47 = vsel %vm5886_vm1, %v5872_v46, 0.0  ;;  %v12032_v15 = vld [vmem:[#allocation32_spill] sm:$0xff] }
 0x54f   : > { %6052 = vrot.lane.b32.xlu1 %v10746_v3, %s8300_s11  ;;  %v5924_v53 = vsel %vm5886_vm1, %v5873_v54, 0.0 }
 0x550   : > { %v5870_v62 = vmul.f32 %v5838_v27, %v5838_v27  ;;  %v11079_v24 = vpop.f32.mrb[176].mxu0  ;;  %v12033_v27 = vld [vmem:[#allocation34_spill] sm:$0xff] }
 0x551   : > { %v11067_v45 = vpop.permute.xlu1 %5784  ;;  %v11069_v32 = vpop.permute.xlu0 %5357 }
 0x552   : > { %7330 = vmatmul.mubr.msk.bf16.gmra.mrb[52].mxu1 %vm3504_vm0, %v4508_v17  ;;  %v5918_v3 = vsel %vm5886_vm1, %v5870_v62, 0.0  ;;  %v3409_v51 = vpop.f32.mrb[177].mxu0  ;;  %v5845_v62 = vsub.f32 %v12034_v36, %v10993_v38  ;;  %v12035_v38 = vld [vmem:[#allocation41_spill] sm:$0xff] }
 0x553   : > { %6054 = vrot.lane.b32.xlu1 %v10749_v39, %s8300_s11  ;;  %7333 = vmatprep.mubr.msk.bf16.mxu1 %vm3504_vm0, %v4509_v49  ;;  %v5919_v55 = vadd.f32 %v5918_v3, %v5917_v11  ;;  %v11086_v17 = vpop.f32.mrb[178].mxu0  ;;  %s8305_s11 = smov 96   ;;  %v5875_v11 = vmul.f32 %v5843_v19, %v5843_v19 }
 0x554   : > { %v4514_v39 = vpack.c.bf16 %v11086_v17, %v11079_v24  ;;  %v3412_v49 = vpop.f32.mrb[179].mxu0 }
 0x555   : > { %v11084_v20 = vpop.permute.xlu1 %5994  ;;  %v5921_v30 = vadd.f32 %v5920_v0, %v5919_v55  ;;  %v5771_v37 = vpop.permute.xlu0 %5770  ;;  %v4513_v43 = vpack.c.bf16 %v3412_v49, %v3409_v51  ;;  %v5928_v17 = vsel %vm5886_vm1, %v5875_v11, 0.0 }
 0x556   : > { %v5844_v50 = vsub.f32 %v12032_v15, %v5771_v37 }
 0x557   : > { %5689 = vrot.lane.b32.xlu1 %v5687_v21, %s8305_s11  ;;  %v5923_v52 = vadd.f32 %v5922_v47, %v5921_v30  ;;  %v5877_v21 = vmul.f32 %v5845_v62, %v5845_v62  ;;  %v5847_v30 = vsub.f32 %v12035_v38, %v11038_v63  ;;  %v12036_v47 = vld [vmem:[#allocation38_spill] sm:$0xff]  ;;  %v12038_v63 = vld [vmem:[#allocation39_spill] sm:$0xff] }
 0x558   : > { %v11102_v25 = vpop.f32.mrb[180].mxu0  ;;  %v5876_v26 = vmul.f32 %v5844_v50, %v5844_v50 }
 0x559   : > { %v11093_v13 = vpop.permute.xlu1 %6000  ;;  %v5767_v22 = vpop.permute.xlu0 %5766  ;;  %v5925_v40 = vadd.f32 %v5924_v53, %v5923_v52  ;;  %v5879_v53 = vmul.f32 %v5847_v30, %v5847_v30 }
 0x55a   : > { %7334 = vmatmul.mubr.msk.bf16.gmra.mrb[56].mxu1 %vm3504_vm0, %v4510_v9  ;;  %v5842_v61 = vsub.f32 %v12033_v27, %v5767_v22  ;;  %v3425_v7 = vpop.f32.mrb[181].mxu0  ;;  %v5930_v19 = vsel %vm5886_vm1, %v5876_v26, 0.0  ;;  %v12037_v22 = vld [vmem:[#allocation40_spill] sm:$0xff] }
 0x55b   : > { %7337 = vmatprep.mubr.msk.bf16.mxu1 %vm3504_vm0, %v4511_v41  ;;  %v7140_v33 = vpop.f32.mrb[182].mxu0 }
 0x55c   : > { %v5874_v3 = vmul.f32 %v5842_v61, %v5842_v61  ;;  %v4516_v55 = vpack.c.bf16 %v7140_v33, %v11102_v25  ;;  %v3428_v51 = vpop.f32.mrb[183].mxu0  ;;  %v5932_v25 = vsel %vm5886_vm1, %v5877_v21, 0.0 }
 0x55d   : > { %v11107_v24 = vpop.permute.xlu1 %6006  ;;  %v5779_v9 = vpop.permute.xlu0 %5778  ;;  %v4515_v0 = vpack.c.bf16 %v3428_v51, %v3425_v7  ;;  %v5849_v7 = vsub.f32 %v12038_v63, %v11024_v42 }
 0x55e   : > { %v5926_v41 = vsel %vm5886_vm1, %v5874_v3, 0.0  ;;  %v5848_v52 = vsub.f32 %v12036_v47, %v5779_v9  ;;  %v5936_v9 = vsel %vm5886_vm1, %v5879_v53, 0.0 }
 0x55f   : > { %v5927_v46 = vadd.f32 %v5926_v41, %v5925_v40  ;;  %v5881_v40 = vmul.f32 %v5849_v7, %v5849_v7 }
 0x561   : > { %v6003_v37 = vpop.permute.xlu1 %6002  ;;  %v5929_v49 = vadd.f32 %v5928_v17, %v5927_v46  ;;  %v5775_v54 = vpop.permute.xlu0 %5774  ;;  %v12039_v46 = vld [vmem:[#allocation44_spill] sm:$0xff]  ;;  %v12040_v17 = vld [vmem:[#allocation46_spill] sm:$0xff] }
 0x562   : > { %7338 = vmatmul.mubr.msk.bf16.gmra.mrb[60].mxu1 %vm3504_vm0, %v4512_v58  ;;  %v5846_v50 = vsub.f32 %v12037_v22, %v5775_v54  ;;  %v5880_v58 = vmul.f32 %v5848_v52, %v5848_v52  ;;  %v5940_v54 = vsel %vm5886_vm1, %v5881_v40, 0.0 }
 0x563   : > { %7341 = vmatprep.mubr.msk.bf16.mxu1 %vm3504_vm0, %v4513_v43  ;;  %v5931_v61 = vadd.f32 %v5930_v19, %v5929_v49  ;;  %v5851_v43 = vsub.f32 %v11993_v29, %v11067_v45  ;;  %v12041_v19 = vld [vmem:[#allocation45_spill] sm:$0xff] }
 0x564   : > { %v5878_v62 = vmul.f32 %v5846_v50, %v5846_v50  ;;  %v5938_v42 = vsel %vm5886_vm1, %v5880_v58, 0.0  ;;  %v5853_v52 = vsub.f32 %v12041_v19, %v11054_v6 }
 0x565   : > { %v11125_v11 = vpop.permute.xlu1 %6008  ;;  %v5933_v14 = vadd.f32 %v5932_v25, %v5931_v61  ;;  %v5787_v12 = vpop.permute.xlu0 %5786  ;;  %v5883_v45 = vmul.f32 %v5851_v43, %v5851_v43 }
 0x566   : > { %v5934_v3 = vsel %vm5886_vm1, %v5878_v62, 0.0  ;;  %v5852_v21 = vsub.f32 %v12039_v46, %v5787_v12  ;;  %v5885_v58 = vmul.f32 %v5853_v52, %v5853_v52 }
 0x567   : > { %v5935_v33 = vadd.f32 %v5934_v3, %v5933_v14  ;;  %v12043_v3 = vld [vmem:[#allocation5_spill] sm:$0xff] }
 0x568   : > { %v5884_v62 = vmul.f32 %v5852_v21, %v5852_v21 }
 0x569   : > { %v6005_v51 = vpop.permute.xlu1 %6004  ;;  %v5937_v26 = vadd.f32 %v5936_v9, %v5935_v33  ;;  %v5783_v41 = vpop.permute.xlu0 %5782 }
 0x56a   : > { %7342 = vmatmul.mubr.msk.bf16.gmra.mrb[64].mxu1 %vm3504_vm0, %v4514_v39  ;;  %v5850_v30 = vsub.f32 %v12040_v17, %v5783_v41  ;;  %v12042_v39 = vld [vmem:[#allocation3_spill] sm:$0xff]  ;;  %v12044_v41 = vld [vmem:[#allocation4_spill] sm:$0xff] }
 0x56b   : > { %7345 = vmatprep.mubr.msk.bf16.mxu1 %vm3504_vm0, %v4515_v0  ;;  %v5939_v49 = vadd.f32 %v5938_v42, %v5937_v26  ;;  %v6090_v53 = vsub.f32 %v12042_v39, %v11084_v20  ;;  %v5944_v0 = vsel %vm5886_vm1, %v5883_v45, 0.0  ;;  %v6093_v26 = vsub.f32 %v12002_v48, %v11093_v13 }
 0x56c   : > { %v5882_v50 = vmul.f32 %v5850_v30, %v5850_v30  ;;  %v5946_v20 = vsel %vm5886_vm1, %v5884_v62, 0.0  ;;  %v5948_v30 = vsel %vm5886_vm1, %v5885_v58, 0.0  ;;  %v6095_v48 = vsub.f32 %v12006_v2, %v6005_v51 }
 0x56d   : > { %v6015_v61 = vpop.permute.xlu1 %6014  ;;  %v5941_v25 = vadd.f32 %v5940_v54, %v5939_v49  ;;  %v6122_v43 = vmul.f32 %v6090_v53, %v6090_v53  ;;  %v6094_v49 = vsub.f32 %v12009_v18, %v6003_v37  ;;  %v6096_v62 = vsub.f32 %v12008_v8, %v11107_v24 }
 0x56e   : > { %v5999_v7 = vpop.permute.xlu0 %5998  ;;  %v5942_v14 = vsel %vm5886_vm1, %v5882_v50, 0.0  ;;  %v6127_v2 = vmul.f32 %v6095_v48, %v6095_v48 }
 0x56f   : > { %v5943_v12 = vadd.f32 %v5942_v14, %v5941_v25  ;;  %v6092_v33 = vsub.f32 %v12043_v3, %v5999_v7  ;;  %v6125_v7 = vmul.f32 %v6093_v26, %v6093_v26  ;;  %v6126_v14 = vmul.f32 %v6094_v49, %v6094_v49 }
 0x571   : > { %v6011_v40 = vpop.permute.xlu1 %6010  ;;  %v5945_v9 = vadd.f32 %v5944_v0, %v5943_v12  ;;  %v6124_v54 = vmul.f32 %v6092_v33, %v6092_v33  ;;  %v6160_v3 = vsel %vm6154_vm10, %v6125_v7, 0.0  ;;  %v6097_v33 = vsub.f32 %v12010_v16, %v11125_v11 }
 0x572   : > { %v5997_v6 = vpop.permute.xlu0 %5996  ;;  %7346 = vmatmul.mubr.msk.bf16.gmra.mrb[68].mxu1 %vm3504_vm0, %v4516_v55  ;;  %v6155_v55 = vsel %vm6154_vm10, %v6122_v43, 0.0  ;;  %v6162_v43 = vsel %vm6154_vm10, %v6126_v14, 0.0  ;;  %v6098_v8 = vsub.f32 %v11941_v35, %v6011_v40  ;;  %v6100_v11 = vsub.f32 %v11940_v57, %v6015_v61 }
 0x573   : > { %v6091_v42 = vsub.f32 %v12044_v41, %v5997_v6  ;;  %v5947_v21 = vadd.f32 %v5946_v20, %v5945_v9  ;;  %v6158_v18 = vsel %vm6154_vm10, %v6124_v54, 0.0  ;;  %v6128_v6 = vmul.f32 %v6096_v62, %v6096_v62 }
 0x575   : > { %v6123_v52 = vmul.f32 %v6091_v42, %v6091_v42  ;;  %v6017_v45 = vpop.permute.xlu1 %6016  ;;  %v5949_v50 = vadd.f32 %v5948_v30, %v5947_v21  ;;  %v6129_v42 = vmul.f32 %v6097_v33, %v6097_v33  ;;  %v6164_v21 = vsel %vm6154_vm10, %v6127_v2, 0.0 }
 0x576   : > { %v5360_v25 = vpop.permute.xlu0 %5359  ;;  %v6166_v16 = vsel %vm6154_vm10, %v6128_v6, 0.0  ;;  %v6101_v48 = vsub.f32 %v11943_v23, %v6017_v45  ;;  %v5436_v23 = vsub.f32 %v11968_v44, %v11069_v32 }
 0x577   : > { %v6156_v13 = vsel %vm6154_vm10, %v6123_v52, 0.0  ;;  %v5950_v39 = vrot.slane %v5949_v50, 4  ;;  %v6130_v52 = vmul.f32 %v6098_v8, %v6098_v8  ;;  %v6168_v40 = vsel %vm6154_vm10, %v6129_v42, 0.0 }
 0x578   : > { %v6157_v53 = vadd.f32 %v6156_v13, %v6155_v55  ;;  %v5437_v6 = vsub.f32 %v11960_v28, %v5360_v25 }
 0x579   : > { %v6013_v37 = vpop.permute.xlu1 %6012  ;;  %v5951_v0 = vadd.f32 %v5950_v39, %v5949_v50 }
 0x57a   : > { %v6159_v12 = vadd.f32 %v6158_v18, %v6157_v53  ;;  %v5362_v58 = vpop.permute.xlu0 %5361  ;;  %v6099_v30 = vsub.f32 %v11945_v4, %v6013_v37  ;;  %v6132_v4 = vmul.f32 %v6100_v11, %v6100_v11  ;;  %v6170_v53 = vsel %vm6154_vm10, %v6130_v52, 0.0 }
 0x57b   : > { %v5952_v9 = vrot.slane %v5951_v0, 2  ;;  %v6133_v18 = vmul.f32 %v6101_v48, %v6101_v48 }
 0x57c   : > { %v6161_v51 = vadd.f32 %v6160_v3, %v6159_v12  ;;  %v6131_v13 = vmul.f32 %v6099_v30, %v6099_v30  ;;  %v6174_v45 = vsel %vm6154_vm10, %v6132_v4, 0.0 }
 0x57d   : > { %v6023_v24 = vpop.permute.xlu1 %6022  ;;  %v5953_v41 = vadd.f32 %v5952_v9, %v5951_v0  ;;  %v6176_v9 = vsel %vm6154_vm10, %v6133_v18, 0.0 }
 0x57e   : > { %v6163_v26 = vadd.f32 %v6162_v43, %v6161_v51  ;;  %v5364_v20 = vpop.permute.xlu0 %5363  ;;  %v6172_v37 = vsel %vm6154_vm10, %v6131_v13, 0.0  ;;  %v6104_v0 = vsub.f32 %v12028_v34, %v6023_v24 }
 0x57f   : > { %v5954_v54 = vrot.slane %v5953_v41, 1 }
 0x580   : > { %v6165_v49 = vadd.f32 %v6164_v21, %v6163_v26  ;;  %v5468_v26 = vmul.f32 %v5436_v23, %v5436_v23  ;;  %v6136_v32 = vmul.f32 %v6104_v0, %v6104_v0 }
 0x581   : > { %v6019_v50 = vpop.permute.xlu1 %6018  ;;  %v5955_v35 = vadd.f32 %v5954_v54, %v5953_v41  ;;  %v5438_v41 = vsub.f32 %v12030_v10, %v5362_v58 }
 0x582   : > { %v6167_v55 = vadd.f32 %v6166_v16, %v6165_v49  ;;  %v5366_v7 = vpop.permute.xlu0 %5365  ;;  %v6102_v62 = vsub.f32 %v12025_v31, %v6019_v50  ;;  %v5439_v49 = vsub.f32 %v12033_v27, %v5364_v20  ;;  %v5516_v25 = vsel %vm901_vm6, %v5468_v26, 0.0 }
 0x583   : > { %5957 = vrot.lane.b32.xlu0 %v5955_v35, %s8304_s22  ;;  %v5470_v16 = vmul.f32 %v5438_v41, %v5438_v41  ;;  %v6182_v11 = vsel %vm6154_vm10, %v6136_v32, 0.0  ;;  %v5440_v58 = vsub.f32 %v12031_v1, %v5366_v7  ;;  %v5517_v13 = vadd.f32 %v5516_v25, %v11058_v56 }
 0x584   : > { %v6169_v39 = vadd.f32 %v6168_v40, %v6167_v55  ;;  %v6134_v3 = vmul.f32 %v6102_v62, %v6102_v62  ;;  %v5471_v40 = vmul.f32 %v5439_v49, %v5439_v49 }
 0x585   : > { %v11171_v14 = vpop.permute.xlu1 %6024  ;;  %v5520_v20 = vsel %vm901_vm6, %v5470_v16, 0.0 }
 0x586   : > { %v6171_v57 = vadd.f32 %v6170_v53, %v6169_v39  ;;  %v5368_v61 = vpop.permute.xlu0 %5367  ;;  %v6178_v42 = vsel %vm6154_vm10, %v6134_v3, 0.0  ;;  %v5472_v39 = vmul.f32 %v5440_v58, %v5440_v58 }
 0x587   : > { %v5441_v48 = vsub.f32 %v12032_v15, %v5368_v61 }
 0x588   : > { %v6173_v12 = vadd.f32 %v6172_v37, %v6171_v57  ;;  %v5522_v57 = vsel %vm901_vm6, %v5471_v40, 0.0  ;;  %v5524_v23 = vsel %vm901_vm6, %v5472_v39, 0.0 }
 0x589   : > { %v6021_v33 = vpop.permute.xlu1 %6020  ;;  %v5473_v18 = vmul.f32 %v5441_v48, %v5441_v48 }
 0x58a   : > { %v6175_v2 = vadd.f32 %v6174_v45, %v6173_v12  ;;  %v6103_v31 = vsub.f32 %v11956_v59, %v6021_v33  ;;  %v5370_v51 = vpop.permute.xlu0 %5369  ;;  %v5469_v59 = vmul.f32 %v5437_v6, %v5437_v6 }
 0x58b   : > { %v5442_v4 = vsub.f32 %v12034_v36, %v5370_v51  ;;  %v5526_v33 = vsel %vm901_vm6, %v5473_v18, 0.0 }
 0x58c   : > { %v6177_v43 = vadd.f32 %v6176_v9, %v6175_v2  ;;  %v6135_v8 = vmul.f32 %v6103_v31, %v6103_v31  ;;  %v5518_v35 = vsel %vm901_vm6, %v5469_v59, 0.0 }
 0x58d   : > { %v11183_v21 = vpop.permute.xlu1 %6030  ;;  %v5519_v62 = vadd.f32 %v5518_v35, %v5517_v13  ;;  %v5474_v61 = vmul.f32 %v5442_v4, %v5442_v4 }
 0x58e   : > { %v6179_v34 = vadd.f32 %v6178_v42, %v6177_v43  ;;  %v6180_v24 = vsel %vm6154_vm10, %v6135_v8, 0.0  ;;  %v5372_v30 = vpop.permute.xlu0 %5371 }
 0x58f   : > { %v5443_v37 = vsub.f32 %v12037_v22, %v5372_v30  ;;  %v5521_v12 = vadd.f32 %v5520_v20, %v5519_v62  ;;  %v5528_v9 = vsel %vm901_vm6, %v5474_v61, 0.0  ;;  %v6105_v30 = vsub.f32 %v12029_v60, %v11171_v14 }
 0x590   : > { %v6181_v54 = vadd.f32 %v6180_v24, %v6179_v34 }
 0x591   : > { %v6027_v52 = vpop.permute.xlu1 %6026  ;;  %v5523_v0 = vadd.f32 %v5522_v57, %v5521_v12  ;;  %v5475_v2 = vmul.f32 %v5443_v37, %v5443_v37  ;;  %v6137_v20 = vmul.f32 %v6105_v30, %v6105_v30 }
 0x592   : > { %v11190_v50 = vadd.f32 %v6182_v11, %v6181_v54  ;;  %v5374_v55 = vpop.permute.xlu0 %5373  ;;  %v6861_v11 = vpop.f32.mrb[184].mxu0  ;;  %v6106_v58 = vsub.f32 %v11961_v5, %v6027_v52 }
 0x593   : > { %v5444_v56 = vsub.f32 %v12035_v38, %v5374_v55  ;;  %v5525_v51 = vadd.f32 %v5524_v23, %v5523_v0  ;;  %v5530_v32 = vsel %vm901_vm6, %v5475_v2, 0.0  ;;  %v6862_v48 = vpop.f32.mrb[185].mxu0  ;;  %v6184_v37 = vsel %vm6154_vm10, %v6137_v20, 0.0 }
 0x594   : > { %v6138_v57 = vmul.f32 %v6106_v58, %v6106_v58 }
 0x595   : > { %v11197_v53 = vpop.permute.xlu1 %6032  ;;  %v5476_v6 = vmul.f32 %v5444_v56, %v5444_v56  ;;  %v5527_v26 = vadd.f32 %v5526_v33, %v5525_v51  ;;  %v6185_v56 = vadd.f32 %v6184_v37, %v11190_v50 }
 0x596   : > { %v5376_v7 = vpop.permute.xlu0 %5375  ;;  %v6186_v33 = vsel %vm6154_vm10, %v6138_v57, 0.0 }
 0x597   : > { %v5445_v31 = vsub.f32 %v12036_v47, %v5376_v7  ;;  %v5529_v24 = vadd.f32 %v5528_v9, %v5527_v26  ;;  %v5532_v59 = vsel %vm901_vm6, %v5476_v6, 0.0 }
 0x599   : > { %v6029_v45 = vpop.permute.xlu1 %6028  ;;  %v5477_v42 = vmul.f32 %v5445_v31, %v5445_v31  ;;  %v5531_v25 = vadd.f32 %v5530_v32, %v5529_v24 }
 0x59a   : > { %v5378_v3 = vpop.permute.xlu0 %5377  ;;  %v6107_v60 = vsub.f32 %v11968_v44, %v6029_v45 }
 0x59b   : > { %v5446_v43 = vsub.f32 %v12038_v63, %v5378_v3  ;;  %v5534_v55 = vsel %vm901_vm6, %v5477_v42, 0.0  ;;  %v5533_v13 = vadd.f32 %v5532_v59, %v5531_v25  ;;  %v6108_v3 = vsub.f32 %v11960_v28, %v11183_v21 }
 0x59c   : > { %v6139_v12 = vmul.f32 %v6107_v60, %v6107_v60  ;;  %v6109_v42 = vsub.f32 %v12030_v10, %v11197_v53 }
 0x59d   : > { %v11207_v8 = vpop.permute.xlu1 %6038  ;;  %v5478_v49 = vmul.f32 %v5446_v43, %v5446_v43  ;;  %v5535_v62 = vadd.f32 %v5534_v55, %v5533_v13  ;;  %v6187_v43 = vadd.f32 %v6186_v33, %v6185_v56  ;;  %v6140_v32 = vmul.f32 %v6108_v3, %v6108_v3 }
 0x59e   : > { %v5380_v41 = vpop.permute.xlu0 %5379  ;;  %v6188_v9 = vsel %vm6154_vm10, %v6139_v12, 0.0 }
 0x59f   : > { %v5447_v34 = vsub.f32 %v12040_v17, %v5380_v41  ;;  %v5536_v14 = vsel %vm901_vm6, %v5478_v49, 0.0  ;;  %v6863_v41 = vadd.f32 %v6862_v48, %v6861_v11  ;;  %v6190_v25 = vsel %vm6154_vm10, %v6140_v32, 0.0 }
 0x5a0   : > { %v5537_v18 = vadd.f32 %v5536_v14, %v5535_v62 }
 0x5a1   : > { %v6035_v54 = vpop.permute.xlu1 %6034  ;;  %v5479_v35 = vmul.f32 %v5447_v34, %v5447_v34  ;;  %v6189_v34 = vadd.f32 %v6188_v9, %v6187_v43  ;;  %5289 = vst.msk [vmem:[%s402_s25] sm:$0xff] %vm3504_vm0, %v6863_v41 }
 0x5a2   : > { %v5382_v16 = vpop.permute.xlu0 %5381  ;;  %v6110_v28 = vsub.f32 %v12033_v27, %v6035_v54 }
 0x5a3   : > { %v5448_v40 = vsub.f32 %v11993_v29, %v5382_v16  ;;  %v5538_v5 = vsel %vm901_vm6, %v5479_v35, 0.0  ;;  %v6141_v16 = vmul.f32 %v6109_v42, %v6109_v42  ;;  %v6191_v53 = vadd.f32 %v6190_v25, %v6189_v34 }
 0x5a4   : > { %v5539_v45 = vadd.f32 %v5538_v5, %v5537_v18  ;;  %v6142_v10 = vmul.f32 %v6110_v28, %v6110_v28 }
 0x5a5   : > { %v5480_v39 = vmul.f32 %v5448_v40, %v5448_v40  ;;  %v6041_v4 = vpop.permute.xlu1 %6040  ;;  %v6192_v48 = vsel %vm6154_vm10, %v6141_v16, 0.0 }
 0x5a6   : > { %v5384_v7 = vpop.permute.xlu0 %5383  ;;  %v6194_v13 = vsel %vm6154_vm10, %v6142_v10, 0.0  ;;  %v6193_v20 = vadd.f32 %v6192_v48, %v6191_v53  ;;  %v6113_v5 = vsub.f32 %v12034_v36, %v6041_v4 }
 0x5a7   : > { %v5449_v52 = vsub.f32 %v12039_v46, %v5384_v7  ;;  %v5540_v23 = vsel %vm901_vm6, %v5480_v39, 0.0 }
 0x5a8   : > { %v5541_v51 = vadd.f32 %v5540_v23, %v5539_v45  ;;  %v6195_v62 = vadd.f32 %v6194_v13, %v6193_v20  ;;  %v6145_v23 = vmul.f32 %v6113_v5, %v6113_v5 }
 0x5a9   : > { %v5481_v44 = vmul.f32 %v5449_v52, %v5449_v52  ;;  %v6037_v61 = vpop.permute.xlu1 %6036 }
 0x5aa   : > { %v5386_v0 = vpop.permute.xlu0 %5385  ;;  %v6111_v30 = vsub.f32 %v12031_v1, %v6037_v61  ;;  %v6112_v1 = vsub.f32 %v12032_v15, %v11207_v8  ;;  %v6200_v61 = vsel %vm6154_vm10, %v6145_v23, 0.0 }
 0x5ab   : > { %v5542_v2 = vsel %vm901_vm6, %v5481_v44, 0.0  ;;  %v5450_v31 = vsub.f32 %v12041_v19, %v5386_v0 }
 0x5ac   : > { %v5543_v26 = vadd.f32 %v5542_v2, %v5541_v51  ;;  %v6143_v11 = vmul.f32 %v6111_v30, %v6111_v30  ;;  %v6144_v57 = vmul.f32 %v6112_v1, %v6112_v1 }
 0x5ad   : > { %v5482_v6 = vmul.f32 %v5450_v31, %v5450_v31  ;;  %v6047_v50 = vpop.permute.xlu1 %6046 }
 0x5ae   : > { %v6196_v14 = vsel %vm6154_vm10, %v6143_v11, 0.0  ;;  %v6198_v12 = vsel %vm6154_vm10, %v6144_v57, 0.0  ;;  %v6116_v56 = vsub.f32 %v12036_v47, %v6047_v50 }
 0x5af   : > { %v5544_v21 = vsel %vm901_vm6, %v5482_v6, 0.0  ;;  %vm5552_vm6 = vcmask 253952   ;;  %v6197_v15 = vadd.f32 %v6196_v14, %v6195_v62 }
 0x5b0   : > { %v5545_v24 = vadd.f32 %v5544_v21, %v5543_v26  ;;  %v6148_v2 = vmul.f32 %v6116_v56, %v6116_v56 }
 0x5b1   : > { %v6043_v59 = vpop.permute.xlu1 %6042  ;;  %v6199_v36 = vadd.f32 %v6198_v12, %v6197_v15 }
 0x5b2   : > { %v5546_v49 = vrot.slane %v5545_v24, 4  ;;  %v6114_v52 = vsub.f32 %v12037_v22, %v6043_v59  ;;  %v6206_v6 = vsel %vm6154_vm10, %v6148_v2, 0.0 }
 0x5b3   : > { %v6896_v54 = vpop.f32.mrb[186].mxu0  ;;  %v6201_v0 = vadd.f32 %v6200_v61, %v6199_v36 }
 0x5b4   : > { %v5547_v27 = vadd.f32 %v5546_v49, %v5545_v24  ;;  %v6897_v55 = vpop.f32.mrb[187].mxu0  ;;  %v6146_v44 = vmul.f32 %v6114_v52, %v6114_v52 }
 0x5b5   : > { %v6049_v58 = vpop.permute.xlu1 %6048  ;;  %v6898_v40 = vadd.f32 %v6897_v55, %v6896_v54 }
 0x5b6   : > { %v5548_v35 = vrot.slane %v5547_v27, 2  ;;  %v6202_v45 = vsel %vm6154_vm10, %v6146_v44, 0.0  ;;  %v6117_v31 = vsub.f32 %v12038_v63, %v6049_v58  ;;  %v6057_v63 = vpop.permute.xlu0 %6056 }
 0x5b7   : > { %5290 = vst.msk [vmem:[%s402_s25 + $0x8] sm:$0xff] %vm3504_vm0, %v6898_v40  ;;  %v6203_v33 = vadd.f32 %v6202_v45, %v6201_v0  ;;  %v6121_v59 = vsub.f32 %v12041_v19, %v6057_v63 }
 0x5b8   : > { %v5549_v60 = vadd.f32 %v5548_v35, %v5547_v27  ;;  %v6149_v43 = vmul.f32 %v6117_v31, %v6117_v31  ;;  %v11283_v35 = vld [vmem:[%s11365_s7] ss:$0 sm:$0xff] }
 0x5b9   : > { %v6045_v39 = vpop.permute.xlu1 %6044  ;;  %v6153_v25 = vmul.f32 %v6121_v59, %v6121_v59 }
 0x5ba   : > { %v5550_v7 = vrot.slane %v5549_v60, 1  ;;  %v6115_v18 = vsub.f32 %v12035_v38, %v6045_v39  ;;  %v6208_v41 = vsel %vm6154_vm10, %v6149_v43, 0.0 }
 0x5bc   : > { %v5551_v8 = vadd.f32 %v5550_v7, %v5549_v60  ;;  %v6147_v22 = vmul.f32 %v6115_v18, %v6115_v18 }
 0x5bd   : > { %v6051_v37 = vpop.permute.xlu1 %6050 }
 0x5be   : > { %5553 = vst.msk [vmem:[%s11257_s29] sm:$0x1] %vm5552_vm6, %v5551_v8  ;;  %v6204_v3 = vsel %vm6154_vm10, %v6147_v22, 0.0  ;;  %v6118_v26 = vsub.f32 %v12040_v17, %v6051_v37 }
 0x5bf   : > { %v6205_v51 = vadd.f32 %v6204_v3, %v6203_v33 }
 0x5c0   : > { %v6150_v32 = vmul.f32 %v6118_v26, %v6118_v26 }
 0x5c1   : > { %v6053_v4 = vpop.permute.xlu1 %6052  ;;  %v6207_v47 = vadd.f32 %v6206_v6, %v6205_v51 }
 0x5c2   : > { %v6119_v50 = vsub.f32 %v11993_v29, %v6053_v4  ;;  %v6210_v34 = vsel %vm6154_vm10, %v6150_v32, 0.0 }
 0x5c3   : > { %v6209_v28 = vadd.f32 %v6208_v41, %v6207_v47 }
 0x5c4   : > { %v6151_v21 = vmul.f32 %v6119_v50, %v6119_v50 }
 0x5c5   : > { %v6055_v38 = vpop.permute.xlu1 %6054  ;;  %v6211_v30 = vadd.f32 %v6210_v34, %v6209_v28 }
 0x5c6   : > { %v6120_v42 = vsub.f32 %v12039_v46, %v6055_v38  ;;  %v6212_v49 = vsel %vm6154_vm10, %v6151_v21, 0.0  ;;  %v6216_v46 = vsel %vm6154_vm10, %v6153_v25, 0.0 }
 0x5c7   : > { %v6213_v29 = vadd.f32 %v6212_v49, %v6211_v30 }
 0x5c8   : > { %v6152_v24 = vmul.f32 %v6120_v42, %v6120_v42 }
 0x5c9   : > { %v5690_v9 = vpop.permute.xlu1 %5689 }
 0x5ca   : > { %5693 = vst.msk [vmem:[%s11257_s29] sm:$0x1] %vm5692_vm11, %v5690_v9  ;;  %v6214_v17 = vsel %vm6154_vm10, %v6152_v24, 0.0 }
 0x5cb   : > { %v6215_v16 = vadd.f32 %v6214_v17, %v6213_v29 }
 0x5cd   : > { %v6217_v10 = vadd.f32 %v6216_v46, %v6215_v16 }
 0x5cf   : > { %v6218_v53 = vrot.slane %v6217_v10, 4 }
 0x5d1   : > { %v6219_v27 = vadd.f32 %v6218_v53, %v6217_v10 }
 0x5d3   : > { %v6220_v54 = vrot.slane %v6219_v27, 2 }
 0x5d5   : > { %v6221_v11 = vadd.f32 %v6220_v54, %v6219_v27 }
 0x5d7   : > { %v6222_v58 = vrot.slane %v6221_v11, 1 }
 0x5d9   : > { %v6223_v19 = vadd.f32 %v6222_v58, %v6221_v11 }
 0x5f5   : > { %v5958_v55 = vpop.permute.xlu0 %5957 }
 0x5f6   : > { %5961 = vst.msk [vmem:[%s11257_s29] sm:$0x1] %vm5960_vm12, %v5958_v55 }
 0x5f7   : > { %6225 = vst.msk [vmem:[%s11257_s29] sm:$0x1] %vm6224_vm13, %v6223_v19 }
 0x60d   : > { %v7319_v40 = vpop.f32.mrb[40].mxu1 }
 0x60e   : > { %v4799_v48 = vadd.f32 %v7319_v40, %v11283_v35  ;;  %v4631_v1 = vpop.f32.mrb[41].mxu1 }
 0x60f   : > { %v4797_v13 = vadd.f32 %v11283_v35, %v4631_v1  ;;  %v7320_v20 = vpop.f32.mrb[42].mxu1 }
 0x610   : > { %8211 = vtanh.f32 %v4799_v48  ;;  %v4800_v60 = vadd.f32 %v7320_v20, %v11283_v35  ;;  %v4634_v14 = vpop.f32.mrb[43].mxu1 }
 0x611   : > { %8213 = vtanh.f32 %v4797_v13  ;;  %v4798_v39 = vadd.f32 %v11283_v35, %v4634_v14 }
 0x612   : > { %8215 = vtanh.f32 %v4800_v60 }
 0x613   : > { %8217 = vtanh.f32 %v4798_v39 }
 0x615   : > { %v7323_v62 = vpop.f32.mrb[44].mxu1 }
 0x616   : > { %v4803_v7 = vadd.f32 %v7323_v62, %v11283_v35  ;;  %v4647_v57 = vpop.f32.mrb[45].mxu1 }
 0x617   : > { %v4801_v5 = vadd.f32 %v11283_v35, %v4647_v57  ;;  %v7324_v52 = vpop.f32.mrb[46].mxu1 }
 0x618   : > { %8219 = vtanh.f32 %v4803_v7  ;;  %v4804_v15 = vadd.f32 %v7324_v52, %v11283_v35  ;;  %v4650_v8 = vpop.f32.mrb[47].mxu1 }
 0x619   : > { %8221 = vtanh.f32 %v4801_v5  ;;  %v4802_v18 = vadd.f32 %v11283_v35, %v4650_v8 }
 0x61a   : > { %v8212_v37 = vpop.eup %8211  ;;  %8223 = vtanh.f32 %v4804_v15 }
 0x61b   : > { %v8214_v12 = vpop.eup %8213  ;;  %4863 = vst [vmem:[%s11295_s15 + $0x10] sm:$0xff] %v8212_v37  ;;  %8225 = vtanh.f32 %v4802_v18 }
 0x61c   : > { %v8216_v23 = vpop.eup %8215  ;;  %4861 = vst [vmem:[%s11295_s15] sm:$0xff] %v8214_v12 }
 0x61d   : > { %v8218_v44 = vpop.eup %8217  ;;  %4864 = vst [vmem:[%s11295_s15 + $0x18] sm:$0xff] %v8216_v23  ;;  %v7327_v36 = vpop.f32.mrb[48].mxu1 }
 0x61e   : > { %4862 = vst [vmem:[%s11295_s15 + $0x8] sm:$0xff] %v8218_v44  ;;  %v4807_v22 = vadd.f32 %v7327_v36, %v11283_v35  ;;  %v4663_v4 = vpop.f32.mrb[49].mxu1 }
 0x61f   : > { %v4805_v61 = vadd.f32 %v11283_v35, %v4663_v4  ;;  %v7328_v56 = vpop.f32.mrb[50].mxu1 }
 0x620   : > { %8227 = vtanh.f32 %v4807_v22  ;;  %v4808_v45 = vadd.f32 %v7328_v56, %v11283_v35  ;;  %v4666_v0 = vpop.f32.mrb[51].mxu1 }
 0x621   : > { %8229 = vtanh.f32 %v4805_v61  ;;  %v4806_v3 = vadd.f32 %v11283_v35, %v4666_v0 }
 0x622   : > { %v8220_v38 = vpop.eup %8219  ;;  %8231 = vtanh.f32 %v4808_v45 }
 0x623   : > { %v8222_v33 = vpop.eup %8221  ;;  %4867 = vst [vmem:[%s11295_s15 + $0x30] sm:$0xff] %v8220_v38  ;;  %8233 = vtanh.f32 %v4806_v3 }
 0x624   : > { %v8224_v2 = vpop.eup %8223  ;;  %4865 = vst [vmem:[%s11295_s15 + $0x20] sm:$0xff] %v8222_v33 }
 0x625   : > { %v8226_v31 = vpop.eup %8225  ;;  %4868 = vst [vmem:[%s11295_s15 + $0x38] sm:$0xff] %v8224_v2  ;;  %v7331_v51 = vpop.f32.mrb[52].mxu1 }
 0x626   : > { %4866 = vst [vmem:[%s11295_s15 + $0x28] sm:$0xff] %v8226_v31  ;;  %v4811_v9 = vadd.f32 %v7331_v51, %v11283_v35  ;;  %v4679_v6 = vpop.f32.mrb[53].mxu1 }
 0x627   : > { %v4809_v43 = vadd.f32 %v11283_v35, %v4679_v6  ;;  %v7332_v26 = vpop.f32.mrb[54].mxu1 }
 0x628   : > { %8235 = vtanh.f32 %v4811_v9  ;;  %v4812_v47 = vadd.f32 %v7332_v26, %v11283_v35  ;;  %v4682_v50 = vpop.f32.mrb[55].mxu1 }
 0x629   : > { %8237 = vtanh.f32 %v4809_v43  ;;  %v4810_v41 = vadd.f32 %v11283_v35, %v4682_v50 }
 0x62a   : > { %v8228_v32 = vpop.eup %8227  ;;  %8239 = vtanh.f32 %v4812_v47 }
 0x62b   : > { %v8230_v42 = vpop.eup %8229  ;;  %4871 = vst [vmem:[%s11295_s15 + $0x50] sm:$0xff] %v8228_v32  ;;  %8241 = vtanh.f32 %v4810_v41 }
 0x62c   : > { %v8232_v28 = vpop.eup %8231  ;;  %4869 = vst [vmem:[%s11295_s15 + $0x40] sm:$0xff] %v8230_v42 }
 0x62d   : > { %v8234_v21 = vpop.eup %8233  ;;  %4872 = vst [vmem:[%s11295_s15 + $0x58] sm:$0xff] %v8232_v28  ;;  %v7335_v63 = vpop.f32.mrb[56].mxu1 }
 0x62e   : > { %4870 = vst [vmem:[%s11295_s15 + $0x48] sm:$0xff] %v8234_v21  ;;  %v4815_v34 = vadd.f32 %v7335_v63, %v11283_v35  ;;  %v4695_v24 = vpop.f32.mrb[57].mxu1 }
 0x62f   : > { %v4813_v30 = vadd.f32 %v11283_v35, %v4695_v24  ;;  %v7336_v59 = vpop.f32.mrb[58].mxu1 }
 0x630   : > { %8243 = vtanh.f32 %v4815_v34  ;;  %v4816_v49 = vadd.f32 %v7336_v59, %v11283_v35  ;;  %v4698_v17 = vpop.f32.mrb[59].mxu1 }
 0x631   : > { %8245 = vtanh.f32 %v4813_v30  ;;  %v4814_v29 = vadd.f32 %v11283_v35, %v4698_v17 }
 0x632   : > { %v8236_v25 = vpop.eup %8235  ;;  %8247 = vtanh.f32 %v4816_v49 }
 0x633   : > { %v8238_v16 = vpop.eup %8237  ;;  %4875 = vst [vmem:[%s11295_s15 + $0x70] sm:$0xff] %v8236_v25  ;;  %8249 = vtanh.f32 %v4814_v29 }
 0x634   : > { %v8240_v46 = vpop.eup %8239  ;;  %4873 = vst [vmem:[%s11295_s15 + $0x60] sm:$0xff] %v8238_v16 }
 0x635   : > { %v8242_v10 = vpop.eup %8241  ;;  %4876 = vst [vmem:[%s11295_s15 + $0x78] sm:$0xff] %v8240_v46  ;;  %v7339_v53 = vpop.f32.mrb[60].mxu1 }
 0x636   : > { %4874 = vst [vmem:[%s11295_s15 + $0x68] sm:$0xff] %v8242_v10  ;;  %v4819_v27 = vadd.f32 %v7339_v53, %v11283_v35  ;;  %v4711_v54 = vpop.f32.mrb[61].mxu1 }
 0x637   : > { %v4817_v11 = vadd.f32 %v11283_v35, %v4711_v54  ;;  %v7340_v58 = vpop.f32.mrb[62].mxu1 }
 0x638   : > { %8251 = vtanh.f32 %v4819_v27  ;;  %v4820_v19 = vadd.f32 %v7340_v58, %v11283_v35  ;;  %v4714_v55 = vpop.f32.mrb[63].mxu1 }
 0x639   : > { %8253 = vtanh.f32 %v4817_v11  ;;  %v4818_v40 = vadd.f32 %v11283_v35, %v4714_v55 }
 0x63a   : > { %v8244_v48 = vpop.eup %8243  ;;  %8255 = vtanh.f32 %v4820_v19 }
 0x63b   : > { %v8246_v1 = vpop.eup %8245  ;;  %4879 = vst [vmem:[%s11295_s15 + $0x90] sm:$0xff] %v8244_v48  ;;  %8257 = vtanh.f32 %v4818_v40 }
 0x63c   : > { %v8248_v13 = vpop.eup %8247  ;;  %4877 = vst [vmem:[%s11295_s15 + $0x80] sm:$0xff] %v8246_v1 }
 0x63d   : > { %v8250_v20 = vpop.eup %8249  ;;  %4880 = vst [vmem:[%s11295_s15 + $0x98] sm:$0xff] %v8248_v13  ;;  %v7343_v60 = vpop.f32.mrb[64].mxu1 }
 0x63e   : > { %4878 = vst [vmem:[%s11295_s15 + $0x88] sm:$0xff] %v8250_v20  ;;  %v4823_v14 = vadd.f32 %v7343_v60, %v11283_v35  ;;  %v4727_v39 = vpop.f32.mrb[65].mxu1 }
 0x63f   : > { %v4821_v62 = vadd.f32 %v11283_v35, %v4727_v39  ;;  %v7344_v7 = vpop.f32.mrb[66].mxu1 }
 0x640   : > { %8259 = vtanh.f32 %v4823_v14  ;;  %v4824_v57 = vadd.f32 %v7344_v7, %v11283_v35  ;;  %v4730_v5 = vpop.f32.mrb[67].mxu1 }
 0x641   : > { %8261 = vtanh.f32 %v4821_v62  ;;  %v4822_v52 = vadd.f32 %v11283_v35, %v4730_v5 }
 0x642   : > { %v8252_v15 = vpop.eup %8251  ;;  %8263 = vtanh.f32 %v4824_v57 }
 0x643   : > { %v8254_v8 = vpop.eup %8253  ;;  %4883 = vst [vmem:[%s11295_s15 + $0xb0] sm:$0xff] %v8252_v15  ;;  %8265 = vtanh.f32 %v4822_v52 }
 0x644   : > { %v8256_v18 = vpop.eup %8255  ;;  %4881 = vst [vmem:[%s11295_s15 + $0xa0] sm:$0xff] %v8254_v8 }
 0x645   : > { %v8258_v37 = vpop.eup %8257  ;;  %4884 = vst [vmem:[%s11295_s15 + $0xb8] sm:$0xff] %v8256_v18  ;;  %v7347_v12 = vpop.f32.mrb[68].mxu1 }
 0x646   : > { %4882 = vst [vmem:[%s11295_s15 + $0xa8] sm:$0xff] %v8258_v37  ;;  %v4827_v23 = vadd.f32 %v7347_v12, %v11283_v35  ;;  %v4743_v44 = vpop.f32.mrb[69].mxu1 }
 0x647   : > { %v4825_v36 = vadd.f32 %v11283_v35, %v4743_v44  ;;  %v7348_v22 = vpop.f32.mrb[70].mxu1 }
 0x648   : > { %8267 = vtanh.f32 %v4827_v23  ;;  %v4828_v4 = vadd.f32 %v7348_v22, %v11283_v35  ;;  %v4746_v61 = vpop.f32.mrb[71].mxu1 }
 0x649   : > { %8269 = vtanh.f32 %v4825_v36  ;;  %v4826_v56 = vadd.f32 %v11283_v35, %v4746_v61 }
 0x64a   : > { %v8260_v45 = vpop.eup %8259  ;;  %8271 = vtanh.f32 %v4828_v4 }
 0x64b   : > { %v8262_v0 = vpop.eup %8261  ;;  %4887 = vst [vmem:[%s11295_s15 + $0xd0] sm:$0xff] %v8260_v45  ;;  %8273 = vtanh.f32 %v4826_v56 }
 0x64c   : > { %v8264_v3 = vpop.eup %8263  ;;  %4885 = vst [vmem:[%s11295_s15 + $0xc0] sm:$0xff] %v8262_v0 }
 0x64d   : > { %v8266_v38 = vpop.eup %8265  ;;  %4888 = vst [vmem:[%s11295_s15 + $0xd8] sm:$0xff] %v8264_v3 }
 0x64e   : > { %4886 = vst [vmem:[%s11295_s15 + $0xc8] sm:$0xff] %v8266_v38 }
 0x652   : > { %v8268_v33 = vpop.eup %8267 }
 0x653   : > { %v8270_v2 = vpop.eup %8269  ;;  %4891 = vst [vmem:[%s11295_s15 + $0xf0] sm:$0xff] %v8268_v33 }
 0x654   : > { %v8272_v31 = vpop.eup %8271  ;;  %4889 = vst [vmem:[%s11295_s15 + $0xe0] sm:$0xff] %v8270_v2 }
 0x655   : > { %v8274_v51 = vpop.eup %8273  ;;  %4892 = vst [vmem:[%s11295_s15 + $0xf8] sm:$0xff] %v8272_v31 }
 0x656   : > { %4890 = vst [vmem:[%s11295_s15 + $0xe8] sm:$0xff] %v8274_v51 }
 0x657 PF: > { %s21_s13 = sadd.s32 1, %s8298_s13  }
 0x658   : > { %p18_p5 = scmp.ge.s32.totalorder %s21_s13, 4  }
 0x65a   :  { %20 = sbr.rel (!%p18_p5) target bundleno = 1 (0x1), region = 109 }

</bundles_post_ra>
